<compile_context>
chip_gen: v7x
topology: tpu7x:2x2x1
jax: 0.10.0
libtpu: 0.0.40
codegen_flags: <defaults>
</compile_context>

<pallas_src>
import math

import jax
import jax.numpy as jnp
from jax.experimental import pallas as pl
from jax.experimental.pallas import tpu as pltpu

# ----------------------------- hyper-parameters ------------------------------
B = 2                 # batch
C = 3                 # input channels (RGB)
IMG = 32              # spatial size               (real ViT-B/16: 224)
PATCH = 16            # patch size                 (real: 16)
NP = (IMG // PATCH) ** 2                          # number of patches = 4
S = NP + 1            # sequence length incl. CLS  (real: 197)
D = 64                # hidden dim                 (real: 768)
NH = 4                # attention heads            (real: 12)
DH = D // NH          # head dim
MLP = 4 * D           # MLP dim                    (real: 3072)
LAYERS = 2            # encoder layers             (real: 12)
POST = 256            # classifier post_dim (as in the module)
NCLS = 4              # args.n_classes
NCLS_PAD = 128        # lane-dense padded classifier output width
CPP = C * PATCH * PATCH          # flattened patch size = 768
CPP_AUG = CPP + 2                # + class-token selector + conv-bias selector
LN_EPS = 1e-6         # torchvision ViT LayerNorm eps


# --------------------------------- kernel ------------------------------------
def _layer_norm(v, g, b):
    mu = jnp.mean(v, axis=-1, keepdims=True)
    var = jnp.mean((v - mu) ** 2, axis=-1, keepdims=True)
    return (v - mu) * jax.lax.rsqrt(var + LN_EPS) * g + b


def vit_clf_kernel(
    xa_ref, we_ref, pos_ref,
    ln1g_ref, ln1b_ref, wqkv_ref, bqkv_ref, wo_ref, bo_ref,
    ln2g_ref, ln2b_ref, w1_ref, b1_ref, w2_ref, b2_ref,
    lnfg_ref, lnfb_ref, cw1_ref, cb1_ref, cw2_ref, cb2_ref,
    out_ref,
):
    # ---- patch embedding + class token + conv bias + positional embedding ----
    # xa row 0 selects the class-token row of `we`; rows 1..NP are patches with a
    # selector for the conv-bias row, so the whole embedding is one MXU pass.
    x = (jnp.dot(xa_ref[0], we_ref[...], preferred_element_type=jnp.float32)
         + pos_ref[...])                                        # (S, D)

    for i in range(LAYERS):
        # ---------------- attention block (pre-LN) ----------------
        h = _layer_norm(x, ln1g_ref[i], ln1b_ref[i])
        qkv = (jnp.dot(h, wqkv_ref[i], preferred_element_type=jnp.float32)
               + bqkv_ref[i])                                   # (S, 3D)
        wo_i = wo_ref[i]                                        # (D, D)
        acc = x + bo_ref[i]                                     # residual + out-proj bias
        for hh in range(NH):
            lo = hh * DH
            qh = qkv[:, lo:lo + DH]            # 1/sqrt(DH) folded into wq/bq
            kh = qkv[:, D + lo:D + lo + DH]
            vh = qkv[:, 2 * D + lo:2 * D + lo + DH]
            s = jnp.einsum("qd,kd->qk", qh, kh,
                           preferred_element_type=jnp.float32)  # (S, S)
            s = s - jnp.max(s, axis=-1, keepdims=True)
            p = jnp.exp(s)
            p = p * pl.reciprocal(jnp.sum(p, axis=-1, keepdims=True), approx=True)
            ch = jnp.dot(p, vh, preferred_element_type=jnp.float32)      # (S, DH)
            # per-head slice of the output projection, accumulated in place
            acc = acc + jnp.dot(ch, wo_i[lo:lo + DH, :],
                                preferred_element_type=jnp.float32)
        x = acc

        # ---------------- MLP block (pre-LN) ----------------
        h2 = _layer_norm(x, ln2g_ref[i], ln2b_ref[i])
        m = (jnp.dot(h2, w1_ref[i], preferred_element_type=jnp.float32)
             + b1_ref[i])
        m = 0.5 * m * (1.0 + jax.lax.erf(m * (1.0 / math.sqrt(2.0))))  # exact GELU
        x = (jnp.dot(m, w2_ref[i], preferred_element_type=jnp.float32)
             + b2_ref[i] + x)

    # ---- final LayerNorm, take CLS token, classifier head ----
    xf = _layer_norm(x, lnfg_ref[...], lnfb_ref[...])
    cls = xf[0:1, :]                                            # (1, D)
    # Classifier(dropout, in_dim=D, post_dim=POST, out_dim=NCLS):
    # Linear -> ReLU -> Dropout(identity in eval) -> Linear, fused in one kernel.
    # TODO(synk): `Classifier` source not provided; structure assumed as above.
    hc = jnp.maximum(
        jnp.dot(cls, cw1_ref[...], preferred_element_type=jnp.float32)
        + cb1_ref[...], 0.0)
    logits = (jnp.dot(hc, cw2_ref[...], preferred_element_type=jnp.float32)
              + cb2_ref[...])                                   # (1, NCLS_PAD)
    out_ref[0] = logits


# ------------------------------ wrapper / glue --------------------------------
def extract_patches(x):
    """NCHW -> (B, NP, C*PATCH*PATCH), matching Conv2d(stride=patch) semantics."""
    b, c, h, w = x.shape
    x = x.reshape(b, c, h // PATCH, PATCH, w // PATCH, PATCH)
    x = x.transpose(0, 2, 4, 1, 3, 5)           # B, nh, nw, C, p, p
    return x.reshape(b, (h // PATCH) * (w // PATCH), c * PATCH * PATCH)


def build_aug_tokens(x):
    """Augmented token-input rows: row 0 selects class token; patch rows carry a
    conv-bias selector. Single matmul then yields [cls; patches@W + b]."""
    patches = extract_patches(x)                                 # (B, NP, CPP)
    b = patches.shape[0]
    sel = jnp.concatenate(
        [jnp.zeros((b, NP, 1), jnp.float32), jnp.ones((b, NP, 1), jnp.float32)],
        axis=-1)
    patch_rows = jnp.concatenate([patches, sel], axis=-1)        # (B, NP, CPP+2)
    cls_row = jnp.zeros((b, 1, CPP_AUG), jnp.float32).at[:, :, CPP].set(1.0)
    return jnp.concatenate([cls_row, patch_rows], axis=1)        # (B, S, CPP+2)


def _fs(shape):
    """Full-array BlockSpec that is invariant to the batch grid index."""
    n = len(shape)
    return pl.BlockSpec(shape, lambda b, _n=n: (0,) * _n)


def vit_clf_forward(kp, x):
    xa = build_aug_tokens(x)
    out_pad = pl.pallas_call(
        vit_clf_kernel,
        out_shape=jax.ShapeDtypeStruct((B, 1, NCLS_PAD), jnp.float32),
        grid_spec=pltpu.PrefetchScalarGridSpec(
            num_scalar_prefetch=0,
            grid=(B,),
            in_specs=[
                pl.BlockSpec((1, S, CPP_AUG), lambda b: (b, 0, 0)),   # tokens
                _fs((CPP_AUG, D)),                                    # we
                _fs((S, D)),                                          # pos
                _fs((LAYERS, 1, D)), _fs((LAYERS, 1, D)),             # ln1 g/b
                _fs((LAYERS, D, 3 * D)), _fs((LAYERS, 1, 3 * D)),     # wqkv/bqkv
                _fs((LAYERS, D, D)), _fs((LAYERS, 1, D)),             # wo/bo
                _fs((LAYERS, 1, D)), _fs((LAYERS, 1, D)),             # ln2 g/b
                _fs((LAYERS, D, MLP)), _fs((LAYERS, 1, MLP)),         # w1/b1
                _fs((LAYERS, MLP, D)), _fs((LAYERS, 1, D)),           # w2/b2
                _fs((1, D)), _fs((1, D)),                             # final LN g/b
                _fs((D, POST)), _fs((1, POST)),                       # clf w1/b1
                _fs((POST, NCLS_PAD)), _fs((1, NCLS_PAD)),            # clf w2/b2 (padded)
            ],
            out_specs=pl.BlockSpec((1, 1, NCLS_PAD), lambda b: (b, 0, 0)),
        ),
        compiler_params=pltpu.CompilerParams(
            dimension_semantics=("parallel",),      # shard batch over v7x's 2 TCs
        ),
    )(
        xa, kp["we"], kp["pos"],
        kp["ln1g"], kp["ln1b"], kp["wqkv"], kp["bqkv"], kp["wo"], kp["bo"],
        kp["ln2g"], kp["ln2b"], kp["w1"], kp["b1"], kp["w2"], kp["b2"],
        kp["lnfg"], kp["lnfb"], kp["cw1"], kp["cb1"], kp["cw2"], kp["cb2"],
    )
    return out_pad[:, 0, :NCLS]                                  # (B, NCLS)


# --------------------------- parameter construction ---------------------------
def init_kernel_params(key):
    ks = iter(jax.random.split(key, 64))

    def nrm(shape, scale=0.02):
        return (scale * jax.random.normal(next(ks), shape)).astype(jnp.float32)

    # conv_proj of _process_input: Conv2d(C, D, kernel=PATCH, stride=PATCH)
    conv_w = nrm((D, C, PATCH, PATCH))
    conv_b = nrm((1, D))
    class_token = nrm((1, D))
    pos = nrm((S, D))

    conv_w2d = conv_w.reshape(D, CPP).T                          # (CPP, D)
    # augmented embedding weight: [conv_w ; class_token row ; conv_bias row]
    we = jnp.concatenate([conv_w2d, class_token, conv_b], axis=0)  # (CPP+2, D)

    scale = 1.0 / math.sqrt(DH)
    l = {k: [] for k in
         ["ln1g", "ln1b", "wqkv", "bqkv", "wo", "bo",
          "ln2g", "ln2b", "w1", "b1", "w2", "b2"]}
    for _ in range(LAYERS):
        l["ln1g"].append(jnp.ones((1, D), jnp.float32))
        l["ln1b"].append(jnp.zeros((1, D), jnp.float32))
        wq, wk, wv = nrm((D, D)), nrm((D, D)), nrm((D, D))
        bq = jnp.zeros((1, D), jnp.float32)
        bk = jnp.zeros((1, D), jnp.float32)
        bv = jnp.zeros((1, D), jnp.float32)
        # fold the 1/sqrt(DH) attention scale into the Q projection
        l["wqkv"].append(jnp.concatenate([wq * scale, wk, wv], axis=1))   # (D, 3D)
        l["bqkv"].append(jnp.concatenate([bq * scale, bk, bv], axis=1))   # (1, 3D)
        l["wo"].append(nrm((D, D)))
        l["bo"].append(jnp.zeros((1, D), jnp.float32))
        l["ln2g"].append(jnp.ones((1, D), jnp.float32))
        l["ln2b"].append(jnp.zeros((1, D), jnp.float32))
        l["w1"].append(nrm((D, MLP)))
        l["b1"].append(jnp.zeros((1, MLP), jnp.float32))
        l["w2"].append(nrm((MLP, D)))
        l["b2"].append(jnp.zeros((1, D), jnp.float32))

    cw1 = nrm((D, POST))
    cb1 = jnp.zeros((1, POST), jnp.float32)
    cw2 = nrm((POST, NCLS))
    cb2 = jnp.zeros((1, NCLS), jnp.float32)
    # pad classifier output to a lane-dense 128-wide block (sliced outside)
    cw2p = jnp.zeros((POST, NCLS_PAD), jnp.float32).at[:, :NCLS].set(cw2)
    cb2p = jnp.zeros((1, NCLS_PAD), jnp.float32).at[:, :NCLS].set(cb2)

    params = {"we": we, "pos": pos,
              "lnfg": jnp.ones((1, D), jnp.float32),
              "lnfb": jnp.zeros((1, D), jnp.float32),
              "cw1": cw1, "cb1": cb1, "cw2": cw2p, "cb2": cb2p}
    for k, v in l.items():
        params[k] = jnp.stack(v, axis=0)
    return params


# ----------------------------------- main --------------------------------------
if __name__ == "__main__":
    key = jax.random.PRNGKey(0)
    kx, kp_key = jax.random.split(key)
    x = jax.random.normal(kx, (B, C, IMG, IMG), dtype=jnp.float32)   # NCHW pixels
    params = init_kernel_params(kp_key)

    fwd = jax.jit(vit_clf_forward)
    out = fwd(params, x)
    jax.block_until_ready(out)

    assert out.shape == (B, NCLS), out.shape
    assert jnp.all(jnp.isfinite(out))
    print("KERNEL_OK")
</pallas_src>

<mosaic_0001>
module attributes {stable_mosaic.version = 11 : i64} {
  func.func @vit_clf_kernel(%arg0: i32, %arg1: memref<1x5x770xf32, #tpu.memory_space<vmem>>, %arg2: memref<770x64xf32, #tpu.memory_space<vmem>>, %arg3: memref<5x64xf32, #tpu.memory_space<vmem>>, %arg4: memref<2x1x64xf32, #tpu.memory_space<vmem>>, %arg5: memref<2x1x64xf32, #tpu.memory_space<vmem>>, %arg6: memref<2x64x192xf32, #tpu.memory_space<vmem>>, %arg7: memref<2x1x192xf32, #tpu.memory_space<vmem>>, %arg8: memref<2x64x64xf32, #tpu.memory_space<vmem>>, %arg9: memref<2x1x64xf32, #tpu.memory_space<vmem>>, %arg10: memref<2x1x64xf32, #tpu.memory_space<vmem>>, %arg11: memref<2x1x64xf32, #tpu.memory_space<vmem>>, %arg12: memref<2x64x256xf32, #tpu.memory_space<vmem>>, %arg13: memref<2x1x256xf32, #tpu.memory_space<vmem>>, %arg14: memref<2x256x64xf32, #tpu.memory_space<vmem>>, %arg15: memref<2x1x64xf32, #tpu.memory_space<vmem>>, %arg16: memref<1x64xf32, #tpu.memory_space<vmem>>, %arg17: memref<1x64xf32, #tpu.memory_space<vmem>>, %arg18: memref<64x256xf32, #tpu.memory_space<vmem>>, %arg19: memref<1x256xf32, #tpu.memory_space<vmem>>, %arg20: memref<256x128xf32, #tpu.memory_space<vmem>>, %arg21: memref<1x128xf32, #tpu.memory_space<vmem>>, %arg22: memref<1x1x128xf32, #tpu.memory_space<vmem>>) attributes {dimension_semantics = [#tpu.dimension_semantics<parallel>], iteration_bounds = array<i64: 2>, scalar_prefetch = 0 : i64, scratch_operands = 0 : i64, tpu.core_type = #tpu.core_type<tc>, window_params = [{transform_indices = @transform_0, window_bounds = array<i64: 1, 5, 770>}, {pipeline_mode = #tpu.pipeline_mode<synchronous>, transform_indices = @transform_1, window_bounds = array<i64: 770, 64>}, {pipeline_mode = #tpu.pipeline_mode<synchronous>, transform_indices = @transform_2, window_bounds = array<i64: 5, 64>}, {pipeline_mode = #tpu.pipeline_mode<synchronous>, transform_indices = @transform_3, window_bounds = array<i64: 2, 1, 64>}, {pipeline_mode = #tpu.pipeline_mode<synchronous>, transform_indices = @transform_4, window_bounds = array<i64: 2, 1, 64>}, {pipeline_mode = #tpu.pipeline_mode<synchronous>, transform_indices = @transform_5, window_bounds = array<i64: 2, 64, 192>}, {pipeline_mode = #tpu.pipeline_mode<synchronous>, transform_indices = @transform_6, window_bounds = array<i64: 2, 1, 192>}, {pipeline_mode = #tpu.pipeline_mode<synchronous>, transform_indices = @transform_7, window_bounds = array<i64: 2, 64, 64>}, {pipeline_mode = #tpu.pipeline_mode<synchronous>, transform_indices = @transform_8, window_bounds = array<i64: 2, 1, 64>}, {pipeline_mode = #tpu.pipeline_mode<synchronous>, transform_indices = @transform_9, window_bounds = array<i64: 2, 1, 64>}, {pipeline_mode = #tpu.pipeline_mode<synchronous>, transform_indices = @transform_10, window_bounds = array<i64: 2, 1, 64>}, {pipeline_mode = #tpu.pipeline_mode<synchronous>, transform_indices = @transform_11, window_bounds = array<i64: 2, 64, 256>}, {pipeline_mode = #tpu.pipeline_mode<synchronous>, transform_indices = @transform_12, window_bounds = array<i64: 2, 1, 256>}, {pipeline_mode = #tpu.pipeline_mode<synchronous>, transform_indices = @transform_13, window_bounds = array<i64: 2, 256, 64>}, {pipeline_mode = #tpu.pipeline_mode<synchronous>, transform_indices = @transform_14, window_bounds = array<i64: 2, 1, 64>}, {pipeline_mode = #tpu.pipeline_mode<synchronous>, transform_indices = @transform_15, window_bounds = array<i64: 1, 64>}, {pipeline_mode = #tpu.pipeline_mode<synchronous>, transform_indices = @transform_16, window_bounds = array<i64: 1, 64>}, {pipeline_mode = #tpu.pipeline_mode<synchronous>, transform_indices = @transform_17, window_bounds = array<i64: 64, 256>}, {pipeline_mode = #tpu.pipeline_mode<synchronous>, transform_indices = @transform_18, window_bounds = array<i64: 1, 256>}, {pipeline_mode = #tpu.pipeline_mode<synchronous>, transform_indices = @transform_19, window_bounds = array<i64: 256, 128>}, {pipeline_mode = #tpu.pipeline_mode<synchronous>, transform_indices = @transform_20, window_bounds = array<i64: 1, 128>}, {transform_indices = @transform_21, window_bounds = array<i64: 1, 1, 128>}]} {
    %c0 = arith.constant 0 : index
    %c0_0 = arith.constant 0 : index
    %c0_1 = arith.constant 0 : index
    %0 = vector.load %arg1[%c0, %c0_0, %c0_1] : memref<1x5x770xf32, #tpu.memory_space<vmem>>, vector<1x5x770xf32>
    %1 = vector.shape_cast %0 : vector<1x5x770xf32> to vector<5x770xf32>
    %c0_2 = arith.constant 0 : index
    %c0_3 = arith.constant 0 : index
    %2 = vector.load %arg2[%c0_2, %c0_3] : memref<770x64xf32, #tpu.memory_space<vmem>>, vector<770x64xf32>
    %cst = arith.constant dense<0.000000e+00> : vector<5x64xf32>
    %3 = tpu.matmul %1, %2, %cst {dimension_numbers = #tpu.dot_dimension_numbers<[1], [0], [0], [1], [0, 0, 1, 1], [], []>} : vector<5x770xf32>, vector<770x64xf32>, vector<5x64xf32> -> vector<5x64xf32>
    %c0_4 = arith.constant 0 : index
    %c0_5 = arith.constant 0 : index
    %4 = vector.load %arg3[%c0_4, %c0_5] : memref<5x64xf32, #tpu.memory_space<vmem>>, vector<5x64xf32>
    %5 = arith.addf %3, %4 : vector<5x64xf32>
    %c0_6 = arith.constant 0 : index
    %c0_7 = arith.constant 0 : index
    %c0_8 = arith.constant 0 : index
    %6 = vector.load %arg4[%c0_6, %c0_7, %c0_8] : memref<2x1x64xf32, #tpu.memory_space<vmem>>, vector<1x1x64xf32>
    %7 = vector.shape_cast %6 : vector<1x1x64xf32> to vector<1x64xf32>
    %c0_9 = arith.constant 0 : index
    %c0_10 = arith.constant 0 : index
    %c0_11 = arith.constant 0 : index
    %8 = vector.load %arg5[%c0_9, %c0_10, %c0_11] : memref<2x1x64xf32, #tpu.memory_space<vmem>>, vector<1x1x64xf32>
    %9 = vector.shape_cast %8 : vector<1x1x64xf32> to vector<1x64xf32>
    %cst_12 = arith.constant dense<0.000000e+00> : vector<5xf32>
    %10 = vector.multi_reduction <add>, %5, %cst_12 [1] : vector<5x64xf32> to vector<5xf32>
    %11 = vector.shape_cast %10 : vector<5xf32> to vector<5x1xf32>
    %cst_13 = arith.constant 6.400000e+01 : f32
    %12 = vector.broadcast %cst_13 : f32 to vector<5x1xf32>
    %13 = arith.divf %11, %12 : vector<5x1xf32>
    %14 = vector.broadcast %13 : vector<5x1xf32> to vector<5x64xf32>
    %15 = arith.subf %5, %14 : vector<5x64xf32>
    %16 = arith.mulf %15, %15 : vector<5x64xf32>
    %cst_14 = arith.constant dense<0.000000e+00> : vector<5xf32>
    %17 = vector.multi_reduction <add>, %16, %cst_14 [1] : vector<5x64xf32> to vector<5xf32>
    %18 = vector.shape_cast %17 : vector<5xf32> to vector<5x1xf32>
    %cst_15 = arith.constant 6.400000e+01 : f32
    %19 = vector.broadcast %cst_15 : f32 to vector<5x1xf32>
    %20 = arith.divf %18, %19 : vector<5x1xf32>
    %21 = vector.broadcast %13 : vector<5x1xf32> to vector<5x64xf32>
    %22 = arith.subf %5, %21 : vector<5x64xf32>
    %cst_16 = arith.constant 9.99999997E-7 : f32
    %23 = vector.broadcast %cst_16 : f32 to vector<5x1xf32>
    %24 = arith.addf %20, %23 : vector<5x1xf32>
    %25 = math.rsqrt %24 : vector<5x1xf32>
    %26 = vector.broadcast %25 : vector<5x1xf32> to vector<5x64xf32>
    %27 = arith.mulf %22, %26 : vector<5x64xf32>
    %28 = vector.broadcast %7 : vector<1x64xf32> to vector<5x64xf32>
    %29 = arith.mulf %27, %28 : vector<5x64xf32>
    %30 = vector.broadcast %9 : vector<1x64xf32> to vector<5x64xf32>
    %31 = arith.addf %29, %30 : vector<5x64xf32>
    %c0_17 = arith.constant 0 : index
    %c0_18 = arith.constant 0 : index
    %c0_19 = arith.constant 0 : index
    %32 = vector.load %arg6[%c0_17, %c0_18, %c0_19] : memref<2x64x192xf32, #tpu.memory_space<vmem>>, vector<1x64x192xf32>
    %33 = vector.shape_cast %32 : vector<1x64x192xf32> to vector<64x192xf32>
    %cst_20 = arith.constant dense<0.000000e+00> : vector<5x192xf32>
    %34 = tpu.matmul %31, %33, %cst_20 {dimension_numbers = #tpu.dot_dimension_numbers<[1], [0], [0], [1], [0, 0, 1, 1], [], []>} : vector<5x64xf32>, vector<64x192xf32>, vector<5x192xf32> -> vector<5x192xf32>
    %c0_21 = arith.constant 0 : index
    %c0_22 = arith.constant 0 : index
    %c0_23 = arith.constant 0 : index
    %35 = vector.load %arg7[%c0_21, %c0_22, %c0_23] : memref<2x1x192xf32, #tpu.memory_space<vmem>>, vector<1x1x192xf32>
    %36 = vector.shape_cast %35 : vector<1x1x192xf32> to vector<1x192xf32>
    %37 = vector.broadcast %36 : vector<1x192xf32> to vector<5x192xf32>
    %38 = arith.addf %34, %37 : vector<5x192xf32>
    %c0_24 = arith.constant 0 : index
    %c0_25 = arith.constant 0 : index
    %c0_26 = arith.constant 0 : index
    %39 = vector.load %arg8[%c0_24, %c0_25, %c0_26] : memref<2x64x64xf32, #tpu.memory_space<vmem>>, vector<1x64x64xf32>
    %40 = vector.shape_cast %39 : vector<1x64x64xf32> to vector<64x64xf32>
    %c0_27 = arith.constant 0 : index
    %c0_28 = arith.constant 0 : index
    %c0_29 = arith.constant 0 : index
    %41 = vector.load %arg9[%c0_27, %c0_28, %c0_29] : memref<2x1x64xf32, #tpu.memory_space<vmem>>, vector<1x1x64xf32>
    %42 = vector.shape_cast %41 : vector<1x1x64xf32> to vector<1x64xf32>
    %43 = vector.broadcast %42 : vector<1x64xf32> to vector<5x64xf32>
    %44 = arith.addf %5, %43 : vector<5x64xf32>
    %45 = vector.extract_strided_slice %38 {offsets = [0, 0], sizes = [5, 16], strides = [1, 1]} : vector<5x192xf32> to vector<5x16xf32>
    %46 = vector.extract_strided_slice %38 {offsets = [0, 64], sizes = [5, 16], strides = [1, 1]} : vector<5x192xf32> to vector<5x16xf32>
    %47 = vector.extract_strided_slice %38 {offsets = [0, 128], sizes = [5, 16], strides = [1, 1]} : vector<5x192xf32> to vector<5x16xf32>
    "tpu.trace_start"() <{level = 10 : i32, message = "qd,kd->qk"}> : () -> ()
    %cst_30 = arith.constant dense<0.000000e+00> : vector<5x5xf32>
    %48 = tpu.matmul %45, %46, %cst_30 {dimension_numbers = #tpu.dot_dimension_numbers<[1], [1], [0], [0], [0, 0, 1, 0], [], []>} : vector<5x16xf32>, vector<5x16xf32>, vector<5x5xf32> -> vector<5x5xf32>
    "tpu.trace_stop"() : () -> ()
    %cst_31 = arith.constant dense<0xFF800000> : vector<5xf32>
    %49 = vector.multi_reduction <maximumf>, %48, %cst_31 [1] : vector<5x5xf32> to vector<5xf32>
    %50 = vector.shape_cast %49 : vector<5xf32> to vector<5x1xf32>
    %51 = vector.broadcast %50 : vector<5x1xf32> to vector<5x5xf32>
    %52 = arith.subf %48, %51 : vector<5x5xf32>
    %53 = math.exp %52 : vector<5x5xf32>
    %cst_32 = arith.constant dense<0.000000e+00> : vector<5xf32>
    %54 = vector.multi_reduction <add>, %53, %cst_32 [1] : vector<5x5xf32> to vector<5xf32>
    %55 = vector.shape_cast %54 : vector<5xf32> to vector<5x1xf32>
    %56 = tpu.reciprocal %55 {approx = true} : vector<5x1xf32> -> vector<5x1xf32>
    %57 = vector.broadcast %56 : vector<5x1xf32> to vector<5x5xf32>
    %58 = arith.mulf %53, %57 : vector<5x5xf32>
    %cst_33 = arith.constant dense<0.000000e+00> : vector<5x16xf32>
    %59 = tpu.matmul %58, %47, %cst_33 {dimension_numbers = #tpu.dot_dimension_numbers<[1], [0], [0], [1], [0, 0, 1, 1], [], []>} : vector<5x5xf32>, vector<5x16xf32>, vector<5x16xf32> -> vector<5x16xf32>
    %60 = vector.extract_strided_slice %40 {offsets = [0, 0], sizes = [16, 64], strides = [1, 1]} : vector<64x64xf32> to vector<16x64xf32>
    %cst_34 = arith.constant dense<0.000000e+00> : vector<5x64xf32>
    %61 = tpu.matmul %59, %60, %cst_34 {dimension_numbers = #tpu.dot_dimension_numbers<[1], [0], [0], [1], [0, 0, 1, 1], [], []>} : vector<5x16xf32>, vector<16x64xf32>, vector<5x64xf32> -> vector<5x64xf32>
    %62 = arith.addf %44, %61 : vector<5x64xf32>
    %63 = vector.extract_strided_slice %38 {offsets = [0, 16], sizes = [5, 16], strides = [1, 1]} : vector<5x192xf32> to vector<5x16xf32>
    %64 = vector.extract_strided_slice %38 {offsets = [0, 80], sizes = [5, 16], strides = [1, 1]} : vector<5x192xf32> to vector<5x16xf32>
    %65 = vector.extract_strided_slice %38 {offsets = [0, 144], sizes = [5, 16], strides = [1, 1]} : vector<5x192xf32> to vector<5x16xf32>
    "tpu.trace_start"() <{level = 10 : i32, message = "qd,kd->qk"}> : () -> ()
    %cst_35 = arith.constant dense<0.000000e+00> : vector<5x5xf32>
    %66 = tpu.matmul %63, %64, %cst_35 {dimension_numbers = #tpu.dot_dimension_numbers<[1], [1], [0], [0], [0, 0, 1, 0], [], []>} : vector<5x16xf32>, vector<5x16xf32>, vector<5x5xf32> -> vector<5x5xf32>
    "tpu.trace_stop"() : () -> ()
    %cst_36 = arith.constant dense<0xFF800000> : vector<5xf32>
    %67 = vector.multi_reduction <maximumf>, %66, %cst_36 [1] : vector<5x5xf32> to vector<5xf32>
    %68 = vector.shape_cast %67 : vector<5xf32> to vector<5x1xf32>
    %69 = vector.broadcast %68 : vector<5x1xf32> to vector<5x5xf32>
    %70 = arith.subf %66, %69 : vector<5x5xf32>
    %71 = math.exp %70 : vector<5x5xf32>
    %cst_37 = arith.constant dense<0.000000e+00> : vector<5xf32>
    %72 = vector.multi_reduction <add>, %71, %cst_37 [1] : vector<5x5xf32> to vector<5xf32>
    %73 = vector.shape_cast %72 : vector<5xf32> to vector<5x1xf32>
    %74 = tpu.reciprocal %73 {approx = true} : vector<5x1xf32> -> vector<5x1xf32>
    %75 = vector.broadcast %74 : vector<5x1xf32> to vector<5x5xf32>
    %76 = arith.mulf %71, %75 : vector<5x5xf32>
    %cst_38 = arith.constant dense<0.000000e+00> : vector<5x16xf32>
    %77 = tpu.matmul %76, %65, %cst_38 {dimension_numbers = #tpu.dot_dimension_numbers<[1], [0], [0], [1], [0, 0, 1, 1], [], []>} : vector<5x5xf32>, vector<5x16xf32>, vector<5x16xf32> -> vector<5x16xf32>
    %78 = vector.extract_strided_slice %40 {offsets = [16, 0], sizes = [16, 64], strides = [1, 1]} : vector<64x64xf32> to vector<16x64xf32>
    %cst_39 = arith.constant dense<0.000000e+00> : vector<5x64xf32>
    %79 = tpu.matmul %77, %78, %cst_39 {dimension_numbers = #tpu.dot_dimension_numbers<[1], [0], [0], [1], [0, 0, 1, 1], [], []>} : vector<5x16xf32>, vector<16x64xf32>, vector<5x64xf32> -> vector<5x64xf32>
    %80 = arith.addf %62, %79 : vector<5x64xf32>
    %81 = vector.extract_strided_slice %38 {offsets = [0, 32], sizes = [5, 16], strides = [1, 1]} : vector<5x192xf32> to vector<5x16xf32>
    %82 = vector.extract_strided_slice %38 {offsets = [0, 96], sizes = [5, 16], strides = [1, 1]} : vector<5x192xf32> to vector<5x16xf32>
    %83 = vector.extract_strided_slice %38 {offsets = [0, 160], sizes = [5, 16], strides = [1, 1]} : vector<5x192xf32> to vector<5x16xf32>
    "tpu.trace_start"() <{level = 10 : i32, message = "qd,kd->qk"}> : () -> ()
    %cst_40 = arith.constant dense<0.000000e+00> : vector<5x5xf32>
    %84 = tpu.matmul %81, %82, %cst_40 {dimension_numbers = #tpu.dot_dimension_numbers<[1], [1], [0], [0], [0, 0, 1, 0], [], []>} : vector<5x16xf32>, vector<5x16xf32>, vector<5x5xf32> -> vector<5x5xf32>
    "tpu.trace_stop"() : () -> ()
    %cst_41 = arith.constant dense<0xFF800000> : vector<5xf32>
    %85 = vector.multi_reduction <maximumf>, %84, %cst_41 [1] : vector<5x5xf32> to vector<5xf32>
    %86 = vector.shape_cast %85 : vector<5xf32> to vector<5x1xf32>
    %87 = vector.broadcast %86 : vector<5x1xf32> to vector<5x5xf32>
    %88 = arith.subf %84, %87 : vector<5x5xf32>
    %89 = math.exp %88 : vector<5x5xf32>
    %cst_42 = arith.constant dense<0.000000e+00> : vector<5xf32>
    %90 = vector.multi_reduction <add>, %89, %cst_42 [1] : vector<5x5xf32> to vector<5xf32>
    %91 = vector.shape_cast %90 : vector<5xf32> to vector<5x1xf32>
    %92 = tpu.reciprocal %91 {approx = true} : vector<5x1xf32> -> vector<5x1xf32>
    %93 = vector.broadcast %92 : vector<5x1xf32> to vector<5x5xf32>
    %94 = arith.mulf %89, %93 : vector<5x5xf32>
    %cst_43 = arith.constant dense<0.000000e+00> : vector<5x16xf32>
    %95 = tpu.matmul %94, %83, %cst_43 {dimension_numbers = #tpu.dot_dimension_numbers<[1], [0], [0], [1], [0, 0, 1, 1], [], []>} : vector<5x5xf32>, vector<5x16xf32>, vector<5x16xf32> -> vector<5x16xf32>
    %96 = vector.extract_strided_slice %40 {offsets = [32, 0], sizes = [16, 64], strides = [1, 1]} : vector<64x64xf32> to vector<16x64xf32>
    %cst_44 = arith.constant dense<0.000000e+00> : vector<5x64xf32>
    %97 = tpu.matmul %95, %96, %cst_44 {dimension_numbers = #tpu.dot_dimension_numbers<[1], [0], [0], [1], [0, 0, 1, 1], [], []>} : vector<5x16xf32>, vector<16x64xf32>, vector<5x64xf32> -> vector<5x64xf32>
    %98 = arith.addf %80, %97 : vector<5x64xf32>
    %99 = vector.extract_strided_slice %38 {offsets = [0, 48], sizes = [5, 16], strides = [1, 1]} : vector<5x192xf32> to vector<5x16xf32>
    %100 = vector.extract_strided_slice %38 {offsets = [0, 112], sizes = [5, 16], strides = [1, 1]} : vector<5x192xf32> to vector<5x16xf32>
    %101 = vector.extract_strided_slice %38 {offsets = [0, 176], sizes = [5, 16], strides = [1, 1]} : vector<5x192xf32> to vector<5x16xf32>
    "tpu.trace_start"() <{level = 10 : i32, message = "qd,kd->qk"}> : () -> ()
    %cst_45 = arith.constant dense<0.000000e+00> : vector<5x5xf32>
    %102 = tpu.matmul %99, %100, %cst_45 {dimension_numbers = #tpu.dot_dimension_numbers<[1], [1], [0], [0], [0, 0, 1, 0], [], []>} : vector<5x16xf32>, vector<5x16xf32>, vector<5x5xf32> -> vector<5x5xf32>
    "tpu.trace_stop"() : () -> ()
    %cst_46 = arith.constant dense<0xFF800000> : vector<5xf32>
    %103 = vector.multi_reduction <maximumf>, %102, %cst_46 [1] : vector<5x5xf32> to vector<5xf32>
    %104 = vector.shape_cast %103 : vector<5xf32> to vector<5x1xf32>
    %105 = vector.broadcast %104 : vector<5x1xf32> to vector<5x5xf32>
    %106 = arith.subf %102, %105 : vector<5x5xf32>
    %107 = math.exp %106 : vector<5x5xf32>
    %cst_47 = arith.constant dense<0.000000e+00> : vector<5xf32>
    %108 = vector.multi_reduction <add>, %107, %cst_47 [1] : vector<5x5xf32> to vector<5xf32>
    %109 = vector.shape_cast %108 : vector<5xf32> to vector<5x1xf32>
    %110 = tpu.reciprocal %109 {approx = true} : vector<5x1xf32> -> vector<5x1xf32>
    %111 = vector.broadcast %110 : vector<5x1xf32> to vector<5x5xf32>
    %112 = arith.mulf %107, %111 : vector<5x5xf32>
    %cst_48 = arith.constant dense<0.000000e+00> : vector<5x16xf32>
    %113 = tpu.matmul %112, %101, %cst_48 {dimension_numbers = #tpu.dot_dimension_numbers<[1], [0], [0], [1], [0, 0, 1, 1], [], []>} : vector<5x5xf32>, vector<5x16xf32>, vector<5x16xf32> -> vector<5x16xf32>
    %114 = vector.extract_strided_slice %40 {offsets = [48, 0], sizes = [16, 64], strides = [1, 1]} : vector<64x64xf32> to vector<16x64xf32>
    %cst_49 = arith.constant dense<0.000000e+00> : vector<5x64xf32>
    %115 = tpu.matmul %113, %114, %cst_49 {dimension_numbers = #tpu.dot_dimension_numbers<[1], [0], [0], [1], [0, 0, 1, 1], [], []>} : vector<5x16xf32>, vector<16x64xf32>, vector<5x64xf32> -> vector<5x64xf32>
    %116 = arith.addf %98, %115 : vector<5x64xf32>
    %c0_50 = arith.constant 0 : index
    %c0_51 = arith.constant 0 : index
    %c0_52 = arith.constant 0 : index
    %117 = vector.load %arg10[%c0_50, %c0_51, %c0_52] : memref<2x1x64xf32, #tpu.memory_space<vmem>>, vector<1x1x64xf32>
    %118 = vector.shape_cast %117 : vector<1x1x64xf32> to vector<1x64xf32>
    %c0_53 = arith.constant 0 : index
    %c0_54 = arith.constant 0 : index
    %c0_55 = arith.constant 0 : index
    %119 = vector.load %arg11[%c0_53, %c0_54, %c0_55] : memref<2x1x64xf32, #tpu.memory_space<vmem>>, vector<1x1x64xf32>
    %120 = vector.shape_cast %119 : vector<1x1x64xf32> to vector<1x64xf32>
    %cst_56 = arith.constant dense<0.000000e+00> : vector<5xf32>
    %121 = vector.multi_reduction <add>, %116, %cst_56 [1] : vector<5x64xf32> to vector<5xf32>
    %122 = vector.shape_cast %121 : vector<5xf32> to vector<5x1xf32>
    %cst_57 = arith.constant 6.400000e+01 : f32
    %123 = vector.broadcast %cst_57 : f32 to vector<5x1xf32>
    %124 = arith.divf %122, %123 : vector<5x1xf32>
    %125 = vector.broadcast %124 : vector<5x1xf32> to vector<5x64xf32>
    %126 = arith.subf %116, %125 : vector<5x64xf32>
    %127 = arith.mulf %126, %126 : vector<5x64xf32>
    %cst_58 = arith.constant dense<0.000000e+00> : vector<5xf32>
    %128 = vector.multi_reduction <add>, %127, %cst_58 [1] : vector<5x64xf32> to vector<5xf32>
    %129 = vector.shape_cast %128 : vector<5xf32> to vector<5x1xf32>
    %cst_59 = arith.constant 6.400000e+01 : f32
    %130 = vector.broadcast %cst_59 : f32 to vector<5x1xf32>
    %131 = arith.divf %129, %130 : vector<5x1xf32>
    %132 = vector.broadcast %124 : vector<5x1xf32> to vector<5x64xf32>
    %133 = arith.subf %116, %132 : vector<5x64xf32>
    %cst_60 = arith.constant 9.99999997E-7 : f32
    %134 = vector.broadcast %cst_60 : f32 to vector<5x1xf32>
    %135 = arith.addf %131, %134 : vector<5x1xf32>
    %136 = math.rsqrt %135 : vector<5x1xf32>
    %137 = vector.broadcast %136 : vector<5x1xf32> to vector<5x64xf32>
    %138 = arith.mulf %133, %137 : vector<5x64xf32>
    %139 = vector.broadcast %118 : vector<1x64xf32> to vector<5x64xf32>
    %140 = arith.mulf %138, %139 : vector<5x64xf32>
    %141 = vector.broadcast %120 : vector<1x64xf32> to vector<5x64xf32>
    %142 = arith.addf %140, %141 : vector<5x64xf32>
    %c0_61 = arith.constant 0 : index
    %c0_62 = arith.constant 0 : index
    %c0_63 = arith.constant 0 : index
    %143 = vector.load %arg12[%c0_61, %c0_62, %c0_63] : memref<2x64x256xf32, #tpu.memory_space<vmem>>, vector<1x64x256xf32>
    %144 = vector.shape_cast %143 : vector<1x64x256xf32> to vector<64x256xf32>
    %cst_64 = arith.constant dense<0.000000e+00> : vector<5x256xf32>
    %145 = tpu.matmul %142, %144, %cst_64 {dimension_numbers = #tpu.dot_dimension_numbers<[1], [0], [0], [1], [0, 0, 1, 1], [], []>} : vector<5x64xf32>, vector<64x256xf32>, vector<5x256xf32> -> vector<5x256xf32>
    %c0_65 = arith.constant 0 : index
    %c0_66 = arith.constant 0 : index
    %c0_67 = arith.constant 0 : index
    %146 = vector.load %arg13[%c0_65, %c0_66, %c0_67] : memref<2x1x256xf32, #tpu.memory_space<vmem>>, vector<1x1x256xf32>
    %147 = vector.shape_cast %146 : vector<1x1x256xf32> to vector<1x256xf32>
    %148 = vector.broadcast %147 : vector<1x256xf32> to vector<5x256xf32>
    %149 = arith.addf %145, %148 : vector<5x256xf32>
    %cst_68 = arith.constant 5.000000e-01 : f32
    %150 = vector.broadcast %cst_68 : f32 to vector<5x256xf32>
    %151 = arith.mulf %150, %149 : vector<5x256xf32>
    %cst_69 = arith.constant 0.707106769 : f32
    %152 = vector.broadcast %cst_69 : f32 to vector<5x256xf32>
    %153 = arith.mulf %149, %152 : vector<5x256xf32>
    %154 = math.erf %153 : vector<5x256xf32>
    %cst_70 = arith.constant 1.000000e+00 : f32
    %155 = vector.broadcast %cst_70 : f32 to vector<5x256xf32>
    %156 = arith.addf %155, %154 : vector<5x256xf32>
    %157 = arith.mulf %151, %156 : vector<5x256xf32>
    %c0_71 = arith.constant 0 : index
    %c0_72 = arith.constant 0 : index
    %c0_73 = arith.constant 0 : index
    %158 = vector.load %arg14[%c0_71, %c0_72, %c0_73] : memref<2x256x64xf32, #tpu.memory_space<vmem>>, vector<1x256x64xf32>
    %159 = vector.shape_cast %158 : vector<1x256x64xf32> to vector<256x64xf32>
    %cst_74 = arith.constant dense<0.000000e+00> : vector<5x64xf32>
    %160 = tpu.matmul %157, %159, %cst_74 {dimension_numbers = #tpu.dot_dimension_numbers<[1], [0], [0], [1], [0, 0, 1, 1], [], []>} : vector<5x256xf32>, vector<256x64xf32>, vector<5x64xf32> -> vector<5x64xf32>
    %c0_75 = arith.constant 0 : index
    %c0_76 = arith.constant 0 : index
    %c0_77 = arith.constant 0 : index
    %161 = vector.load %arg15[%c0_75, %c0_76, %c0_77] : memref<2x1x64xf32, #tpu.memory_space<vmem>>, vector<1x1x64xf32>
    %162 = vector.shape_cast %161 : vector<1x1x64xf32> to vector<1x64xf32>
    %163 = vector.broadcast %162 : vector<1x64xf32> to vector<5x64xf32>
    %164 = arith.addf %160, %163 : vector<5x64xf32>
    %165 = arith.addf %164, %116 : vector<5x64xf32>
    %c1 = arith.constant 1 : index
    %c0_78 = arith.constant 0 : index
    %c0_79 = arith.constant 0 : index
    %166 = vector.load %arg4[%c1, %c0_78, %c0_79] : memref<2x1x64xf32, #tpu.memory_space<vmem>>, vector<1x1x64xf32>
    %167 = vector.shape_cast %166 : vector<1x1x64xf32> to vector<1x64xf32>
    %c1_80 = arith.constant 1 : index
    %c0_81 = arith.constant 0 : index
    %c0_82 = arith.constant 0 : index
    %168 = vector.load %arg5[%c1_80, %c0_81, %c0_82] : memref<2x1x64xf32, #tpu.memory_space<vmem>>, vector<1x1x64xf32>
    %169 = vector.shape_cast %168 : vector<1x1x64xf32> to vector<1x64xf32>
    %cst_83 = arith.constant dense<0.000000e+00> : vector<5xf32>
    %170 = vector.multi_reduction <add>, %165, %cst_83 [1] : vector<5x64xf32> to vector<5xf32>
    %171 = vector.shape_cast %170 : vector<5xf32> to vector<5x1xf32>
    %cst_84 = arith.constant 6.400000e+01 : f32
    %172 = vector.broadcast %cst_84 : f32 to vector<5x1xf32>
    %173 = arith.divf %171, %172 : vector<5x1xf32>
    %174 = vector.broadcast %173 : vector<5x1xf32> to vector<5x64xf32>
    %175 = arith.subf %165, %174 : vector<5x64xf32>
    %176 = arith.mulf %175, %175 : vector<5x64xf32>
    %cst_85 = arith.constant dense<0.000000e+00> : vector<5xf32>
    %177 = vector.multi_reduction <add>, %176, %cst_85 [1] : vector<5x64xf32> to vector<5xf32>
    %178 = vector.shape_cast %177 : vector<5xf32> to vector<5x1xf32>
    %cst_86 = arith.constant 6.400000e+01 : f32
    %179 = vector.broadcast %cst_86 : f32 to vector<5x1xf32>
    %180 = arith.divf %178, %179 : vector<5x1xf32>
    %181 = vector.broadcast %173 : vector<5x1xf32> to vector<5x64xf32>
    %182 = arith.subf %165, %181 : vector<5x64xf32>
    %cst_87 = arith.constant 9.99999997E-7 : f32
    %183 = vector.broadcast %cst_87 : f32 to vector<5x1xf32>
    %184 = arith.addf %180, %183 : vector<5x1xf32>
    %185 = math.rsqrt %184 : vector<5x1xf32>
    %186 = vector.broadcast %185 : vector<5x1xf32> to vector<5x64xf32>
    %187 = arith.mulf %182, %186 : vector<5x64xf32>
    %188 = vector.broadcast %167 : vector<1x64xf32> to vector<5x64xf32>
    %189 = arith.mulf %187, %188 : vector<5x64xf32>
    %190 = vector.broadcast %169 : vector<1x64xf32> to vector<5x64xf32>
    %191 = arith.addf %189, %190 : vector<5x64xf32>
    %c1_88 = arith.constant 1 : index
    %c0_89 = arith.constant 0 : index
    %c0_90 = arith.constant 0 : index
    %192 = vector.load %arg6[%c1_88, %c0_89, %c0_90] : memref<2x64x192xf32, #tpu.memory_space<vmem>>, vector<1x64x192xf32>
    %193 = vector.shape_cast %192 : vector<1x64x192xf32> to vector<64x192xf32>
    %cst_91 = arith.constant dense<0.000000e+00> : vector<5x192xf32>
    %194 = tpu.matmul %191, %193, %cst_91 {dimension_numbers = #tpu.dot_dimension_numbers<[1], [0], [0], [1], [0, 0, 1, 1], [], []>} : vector<5x64xf32>, vector<64x192xf32>, vector<5x192xf32> -> vector<5x192xf32>
    %c1_92 = arith.constant 1 : index
    %c0_93 = arith.constant 0 : index
    %c0_94 = arith.constant 0 : index
    %195 = vector.load %arg7[%c1_92, %c0_93, %c0_94] : memref<2x1x192xf32, #tpu.memory_space<vmem>>, vector<1x1x192xf32>
    %196 = vector.shape_cast %195 : vector<1x1x192xf32> to vector<1x192xf32>
    %197 = vector.broadcast %196 : vector<1x192xf32> to vector<5x192xf32>
    %198 = arith.addf %194, %197 : vector<5x192xf32>
    %c1_95 = arith.constant 1 : index
    %c0_96 = arith.constant 0 : index
    %c0_97 = arith.constant 0 : index
    %199 = vector.load %arg8[%c1_95, %c0_96, %c0_97] : memref<2x64x64xf32, #tpu.memory_space<vmem>>, vector<1x64x64xf32>
    %200 = vector.shape_cast %199 : vector<1x64x64xf32> to vector<64x64xf32>
    %c1_98 = arith.constant 1 : index
    %c0_99 = arith.constant 0 : index
    %c0_100 = arith.constant 0 : index
    %201 = vector.load %arg9[%c1_98, %c0_99, %c0_100] : memref<2x1x64xf32, #tpu.memory_space<vmem>>, vector<1x1x64xf32>
    %202 = vector.shape_cast %201 : vector<1x1x64xf32> to vector<1x64xf32>
    %203 = vector.broadcast %202 : vector<1x64xf32> to vector<5x64xf32>
    %204 = arith.addf %165, %203 : vector<5x64xf32>
    %205 = vector.extract_strided_slice %198 {offsets = [0, 0], sizes = [5, 16], strides = [1, 1]} : vector<5x192xf32> to vector<5x16xf32>
    %206 = vector.extract_strided_slice %198 {offsets = [0, 64], sizes = [5, 16], strides = [1, 1]} : vector<5x192xf32> to vector<5x16xf32>
    %207 = vector.extract_strided_slice %198 {offsets = [0, 128], sizes = [5, 16], strides = [1, 1]} : vector<5x192xf32> to vector<5x16xf32>
    "tpu.trace_start"() <{level = 10 : i32, message = "qd,kd->qk"}> : () -> ()
    %cst_101 = arith.constant dense<0.000000e+00> : vector<5x5xf32>
    %208 = tpu.matmul %205, %206, %cst_101 {dimension_numbers = #tpu.dot_dimension_numbers<[1], [1], [0], [0], [0, 0, 1, 0], [], []>} : vector<5x16xf32>, vector<5x16xf32>, vector<5x5xf32> -> vector<5x5xf32>
    "tpu.trace_stop"() : () -> ()
    %cst_102 = arith.constant dense<0xFF800000> : vector<5xf32>
    %209 = vector.multi_reduction <maximumf>, %208, %cst_102 [1] : vector<5x5xf32> to vector<5xf32>
    %210 = vector.shape_cast %209 : vector<5xf32> to vector<5x1xf32>
    %211 = vector.broadcast %210 : vector<5x1xf32> to vector<5x5xf32>
    %212 = arith.subf %208, %211 : vector<5x5xf32>
    %213 = math.exp %212 : vector<5x5xf32>
    %cst_103 = arith.constant dense<0.000000e+00> : vector<5xf32>
    %214 = vector.multi_reduction <add>, %213, %cst_103 [1] : vector<5x5xf32> to vector<5xf32>
    %215 = vector.shape_cast %214 : vector<5xf32> to vector<5x1xf32>
    %216 = tpu.reciprocal %215 {approx = true} : vector<5x1xf32> -> vector<5x1xf32>
    %217 = vector.broadcast %216 : vector<5x1xf32> to vector<5x5xf32>
    %218 = arith.mulf %213, %217 : vector<5x5xf32>
    %cst_104 = arith.constant dense<0.000000e+00> : vector<5x16xf32>
    %219 = tpu.matmul %218, %207, %cst_104 {dimension_numbers = #tpu.dot_dimension_numbers<[1], [0], [0], [1], [0, 0, 1, 1], [], []>} : vector<5x5xf32>, vector<5x16xf32>, vector<5x16xf32> -> vector<5x16xf32>
    %220 = vector.extract_strided_slice %200 {offsets = [0, 0], sizes = [16, 64], strides = [1, 1]} : vector<64x64xf32> to vector<16x64xf32>
    %cst_105 = arith.constant dense<0.000000e+00> : vector<5x64xf32>
    %221 = tpu.matmul %219, %220, %cst_105 {dimension_numbers = #tpu.dot_dimension_numbers<[1], [0], [0], [1], [0, 0, 1, 1], [], []>} : vector<5x16xf32>, vector<16x64xf32>, vector<5x64xf32> -> vector<5x64xf32>
    %222 = arith.addf %204, %221 : vector<5x64xf32>
    %223 = vector.extract_strided_slice %198 {offsets = [0, 16], sizes = [5, 16], strides = [1, 1]} : vector<5x192xf32> to vector<5x16xf32>
    %224 = vector.extract_strided_slice %198 {offsets = [0, 80], sizes = [5, 16], strides = [1, 1]} : vector<5x192xf32> to vector<5x16xf32>
    %225 = vector.extract_strided_slice %198 {offsets = [0, 144], sizes = [5, 16], strides = [1, 1]} : vector<5x192xf32> to vector<5x16xf32>
    "tpu.trace_start"() <{level = 10 : i32, message = "qd,kd->qk"}> : () -> ()
    %cst_106 = arith.constant dense<0.000000e+00> : vector<5x5xf32>
    %226 = tpu.matmul %223, %224, %cst_106 {dimension_numbers = #tpu.dot_dimension_numbers<[1], [1], [0], [0], [0, 0, 1, 0], [], []>} : vector<5x16xf32>, vector<5x16xf32>, vector<5x5xf32> -> vector<5x5xf32>
    "tpu.trace_stop"() : () -> ()
    %cst_107 = arith.constant dense<0xFF800000> : vector<5xf32>
    %227 = vector.multi_reduction <maximumf>, %226, %cst_107 [1] : vector<5x5xf32> to vector<5xf32>
    %228 = vector.shape_cast %227 : vector<5xf32> to vector<5x1xf32>
    %229 = vector.broadcast %228 : vector<5x1xf32> to vector<5x5xf32>
    %230 = arith.subf %226, %229 : vector<5x5xf32>
    %231 = math.exp %230 : vector<5x5xf32>
    %cst_108 = arith.constant dense<0.000000e+00> : vector<5xf32>
    %232 = vector.multi_reduction <add>, %231, %cst_108 [1] : vector<5x5xf32> to vector<5xf32>
    %233 = vector.shape_cast %232 : vector<5xf32> to vector<5x1xf32>
    %234 = tpu.reciprocal %233 {approx = true} : vector<5x1xf32> -> vector<5x1xf32>
    %235 = vector.broadcast %234 : vector<5x1xf32> to vector<5x5xf32>
    %236 = arith.mulf %231, %235 : vector<5x5xf32>
    %cst_109 = arith.constant dense<0.000000e+00> : vector<5x16xf32>
    %237 = tpu.matmul %236, %225, %cst_109 {dimension_numbers = #tpu.dot_dimension_numbers<[1], [0], [0], [1], [0, 0, 1, 1], [], []>} : vector<5x5xf32>, vector<5x16xf32>, vector<5x16xf32> -> vector<5x16xf32>
    %238 = vector.extract_strided_slice %200 {offsets = [16, 0], sizes = [16, 64], strides = [1, 1]} : vector<64x64xf32> to vector<16x64xf32>
    %cst_110 = arith.constant dense<0.000000e+00> : vector<5x64xf32>
    %239 = tpu.matmul %237, %238, %cst_110 {dimension_numbers = #tpu.dot_dimension_numbers<[1], [0], [0], [1], [0, 0, 1, 1], [], []>} : vector<5x16xf32>, vector<16x64xf32>, vector<5x64xf32> -> vector<5x64xf32>
    %240 = arith.addf %222, %239 : vector<5x64xf32>
    %241 = vector.extract_strided_slice %198 {offsets = [0, 32], sizes = [5, 16], strides = [1, 1]} : vector<5x192xf32> to vector<5x16xf32>
    %242 = vector.extract_strided_slice %198 {offsets = [0, 96], sizes = [5, 16], strides = [1, 1]} : vector<5x192xf32> to vector<5x16xf32>
    %243 = vector.extract_strided_slice %198 {offsets = [0, 160], sizes = [5, 16], strides = [1, 1]} : vector<5x192xf32> to vector<5x16xf32>
    "tpu.trace_start"() <{level = 10 : i32, message = "qd,kd->qk"}> : () -> ()
    %cst_111 = arith.constant dense<0.000000e+00> : vector<5x5xf32>
    %244 = tpu.matmul %241, %242, %cst_111 {dimension_numbers = #tpu.dot_dimension_numbers<[1], [1], [0], [0], [0, 0, 1, 0], [], []>} : vector<5x16xf32>, vector<5x16xf32>, vector<5x5xf32> -> vector<5x5xf32>
    "tpu.trace_stop"() : () -> ()
    %cst_112 = arith.constant dense<0xFF800000> : vector<5xf32>
    %245 = vector.multi_reduction <maximumf>, %244, %cst_112 [1] : vector<5x5xf32> to vector<5xf32>
    %246 = vector.shape_cast %245 : vector<5xf32> to vector<5x1xf32>
    %247 = vector.broadcast %246 : vector<5x1xf32> to vector<5x5xf32>
    %248 = arith.subf %244, %247 : vector<5x5xf32>
    %249 = math.exp %248 : vector<5x5xf32>
    %cst_113 = arith.constant dense<0.000000e+00> : vector<5xf32>
    %250 = vector.multi_reduction <add>, %249, %cst_113 [1] : vector<5x5xf32> to vector<5xf32>
    %251 = vector.shape_cast %250 : vector<5xf32> to vector<5x1xf32>
    %252 = tpu.reciprocal %251 {approx = true} : vector<5x1xf32> -> vector<5x1xf32>
    %253 = vector.broadcast %252 : vector<5x1xf32> to vector<5x5xf32>
    %254 = arith.mulf %249, %253 : vector<5x5xf32>
    %cst_114 = arith.constant dense<0.000000e+00> : vector<5x16xf32>
    %255 = tpu.matmul %254, %243, %cst_114 {dimension_numbers = #tpu.dot_dimension_numbers<[1], [0], [0], [1], [0, 0, 1, 1], [], []>} : vector<5x5xf32>, vector<5x16xf32>, vector<5x16xf32> -> vector<5x16xf32>
    %256 = vector.extract_strided_slice %200 {offsets = [32, 0], sizes = [16, 64], strides = [1, 1]} : vector<64x64xf32> to vector<16x64xf32>
    %cst_115 = arith.constant dense<0.000000e+00> : vector<5x64xf32>
    %257 = tpu.matmul %255, %256, %cst_115 {dimension_numbers = #tpu.dot_dimension_numbers<[1], [0], [0], [1], [0, 0, 1, 1], [], []>} : vector<5x16xf32>, vector<16x64xf32>, vector<5x64xf32> -> vector<5x64xf32>
    %258 = arith.addf %240, %257 : vector<5x64xf32>
    %259 = vector.extract_strided_slice %198 {offsets = [0, 48], sizes = [5, 16], strides = [1, 1]} : vector<5x192xf32> to vector<5x16xf32>
    %260 = vector.extract_strided_slice %198 {offsets = [0, 112], sizes = [5, 16], strides = [1, 1]} : vector<5x192xf32> to vector<5x16xf32>
    %261 = vector.extract_strided_slice %198 {offsets = [0, 176], sizes = [5, 16], strides = [1, 1]} : vector<5x192xf32> to vector<5x16xf32>
    "tpu.trace_start"() <{level = 10 : i32, message = "qd,kd->qk"}> : () -> ()
    %cst_116 = arith.constant dense<0.000000e+00> : vector<5x5xf32>
    %262 = tpu.matmul %259, %260, %cst_116 {dimension_numbers = #tpu.dot_dimension_numbers<[1], [1], [0], [0], [0, 0, 1, 0], [], []>} : vector<5x16xf32>, vector<5x16xf32>, vector<5x5xf32> -> vector<5x5xf32>
    "tpu.trace_stop"() : () -> ()
    %cst_117 = arith.constant dense<0xFF800000> : vector<5xf32>
    %263 = vector.multi_reduction <maximumf>, %262, %cst_117 [1] : vector<5x5xf32> to vector<5xf32>
    %264 = vector.shape_cast %263 : vector<5xf32> to vector<5x1xf32>
    %265 = vector.broadcast %264 : vector<5x1xf32> to vector<5x5xf32>
    %266 = arith.subf %262, %265 : vector<5x5xf32>
    %267 = math.exp %266 : vector<5x5xf32>
    %cst_118 = arith.constant dense<0.000000e+00> : vector<5xf32>
    %268 = vector.multi_reduction <add>, %267, %cst_118 [1] : vector<5x5xf32> to vector<5xf32>
    %269 = vector.shape_cast %268 : vector<5xf32> to vector<5x1xf32>
    %270 = tpu.reciprocal %269 {approx = true} : vector<5x1xf32> -> vector<5x1xf32>
    %271 = vector.broadcast %270 : vector<5x1xf32> to vector<5x5xf32>
    %272 = arith.mulf %267, %271 : vector<5x5xf32>
    %cst_119 = arith.constant dense<0.000000e+00> : vector<5x16xf32>
    %273 = tpu.matmul %272, %261, %cst_119 {dimension_numbers = #tpu.dot_dimension_numbers<[1], [0], [0], [1], [0, 0, 1, 1], [], []>} : vector<5x5xf32>, vector<5x16xf32>, vector<5x16xf32> -> vector<5x16xf32>
    %274 = vector.extract_strided_slice %200 {offsets = [48, 0], sizes = [16, 64], strides = [1, 1]} : vector<64x64xf32> to vector<16x64xf32>
    %cst_120 = arith.constant dense<0.000000e+00> : vector<5x64xf32>
    %275 = tpu.matmul %273, %274, %cst_120 {dimension_numbers = #tpu.dot_dimension_numbers<[1], [0], [0], [1], [0, 0, 1, 1], [], []>} : vector<5x16xf32>, vector<16x64xf32>, vector<5x64xf32> -> vector<5x64xf32>
    %276 = arith.addf %258, %275 : vector<5x64xf32>
    %c1_121 = arith.constant 1 : index
    %c0_122 = arith.constant 0 : index
    %c0_123 = arith.constant 0 : index
    %277 = vector.load %arg10[%c1_121, %c0_122, %c0_123] : memref<2x1x64xf32, #tpu.memory_space<vmem>>, vector<1x1x64xf32>
    %278 = vector.shape_cast %277 : vector<1x1x64xf32> to vector<1x64xf32>
    %c1_124 = arith.constant 1 : index
    %c0_125 = arith.constant 0 : index
    %c0_126 = arith.constant 0 : index
    %279 = vector.load %arg11[%c1_124, %c0_125, %c0_126] : memref<2x1x64xf32, #tpu.memory_space<vmem>>, vector<1x1x64xf32>
    %280 = vector.shape_cast %279 : vector<1x1x64xf32> to vector<1x64xf32>
    %cst_127 = arith.constant dense<0.000000e+00> : vector<5xf32>
    %281 = vector.multi_reduction <add>, %276, %cst_127 [1] : vector<5x64xf32> to vector<5xf32>
    %282 = vector.shape_cast %281 : vector<5xf32> to vector<5x1xf32>
    %cst_128 = arith.constant 6.400000e+01 : f32
    %283 = vector.broadcast %cst_128 : f32 to vector<5x1xf32>
    %284 = arith.divf %282, %283 : vector<5x1xf32>
    %285 = vector.broadcast %284 : vector<5x1xf32> to vector<5x64xf32>
    %286 = arith.subf %276, %285 : vector<5x64xf32>
    %287 = arith.mulf %286, %286 : vector<5x64xf32>
    %cst_129 = arith.constant dense<0.000000e+00> : vector<5xf32>
    %288 = vector.multi_reduction <add>, %287, %cst_129 [1] : vector<5x64xf32> to vector<5xf32>
    %289 = vector.shape_cast %288 : vector<5xf32> to vector<5x1xf32>
    %cst_130 = arith.constant 6.400000e+01 : f32
    %290 = vector.broadcast %cst_130 : f32 to vector<5x1xf32>
    %291 = arith.divf %289, %290 : vector<5x1xf32>
    %292 = vector.broadcast %284 : vector<5x1xf32> to vector<5x64xf32>
    %293 = arith.subf %276, %292 : vector<5x64xf32>
    %cst_131 = arith.constant 9.99999997E-7 : f32
    %294 = vector.broadcast %cst_131 : f32 to vector<5x1xf32>
    %295 = arith.addf %291, %294 : vector<5x1xf32>
    %296 = math.rsqrt %295 : vector<5x1xf32>
    %297 = vector.broadcast %296 : vector<5x1xf32> to vector<5x64xf32>
    %298 = arith.mulf %293, %297 : vector<5x64xf32>
    %299 = vector.broadcast %278 : vector<1x64xf32> to vector<5x64xf32>
    %300 = arith.mulf %298, %299 : vector<5x64xf32>
    %301 = vector.broadcast %280 : vector<1x64xf32> to vector<5x64xf32>
    %302 = arith.addf %300, %301 : vector<5x64xf32>
    %c1_132 = arith.constant 1 : index
    %c0_133 = arith.constant 0 : index
    %c0_134 = arith.constant 0 : index
    %303 = vector.load %arg12[%c1_132, %c0_133, %c0_134] : memref<2x64x256xf32, #tpu.memory_space<vmem>>, vector<1x64x256xf32>
    %304 = vector.shape_cast %303 : vector<1x64x256xf32> to vector<64x256xf32>
    %cst_135 = arith.constant dense<0.000000e+00> : vector<5x256xf32>
    %305 = tpu.matmul %302, %304, %cst_135 {dimension_numbers = #tpu.dot_dimension_numbers<[1], [0], [0], [1], [0, 0, 1, 1], [], []>} : vector<5x64xf32>, vector<64x256xf32>, vector<5x256xf32> -> vector<5x256xf32>
    %c1_136 = arith.constant 1 : index
    %c0_137 = arith.constant 0 : index
    %c0_138 = arith.constant 0 : index
    %306 = vector.load %arg13[%c1_136, %c0_137, %c0_138] : memref<2x1x256xf32, #tpu.memory_space<vmem>>, vector<1x1x256xf32>
    %307 = vector.shape_cast %306 : vector<1x1x256xf32> to vector<1x256xf32>
    %308 = vector.broadcast %307 : vector<1x256xf32> to vector<5x256xf32>
    %309 = arith.addf %305, %308 : vector<5x256xf32>
    %cst_139 = arith.constant 5.000000e-01 : f32
    %310 = vector.broadcast %cst_139 : f32 to vector<5x256xf32>
    %311 = arith.mulf %310, %309 : vector<5x256xf32>
    %cst_140 = arith.constant 0.707106769 : f32
    %312 = vector.broadcast %cst_140 : f32 to vector<5x256xf32>
    %313 = arith.mulf %309, %312 : vector<5x256xf32>
    %314 = math.erf %313 : vector<5x256xf32>
    %cst_141 = arith.constant 1.000000e+00 : f32
    %315 = vector.broadcast %cst_141 : f32 to vector<5x256xf32>
    %316 = arith.addf %315, %314 : vector<5x256xf32>
    %317 = arith.mulf %311, %316 : vector<5x256xf32>
    %c1_142 = arith.constant 1 : index
    %c0_143 = arith.constant 0 : index
    %c0_144 = arith.constant 0 : index
    %318 = vector.load %arg14[%c1_142, %c0_143, %c0_144] : memref<2x256x64xf32, #tpu.memory_space<vmem>>, vector<1x256x64xf32>
    %319 = vector.shape_cast %318 : vector<1x256x64xf32> to vector<256x64xf32>
    %cst_145 = arith.constant dense<0.000000e+00> : vector<5x64xf32>
    %320 = tpu.matmul %317, %319, %cst_145 {dimension_numbers = #tpu.dot_dimension_numbers<[1], [0], [0], [1], [0, 0, 1, 1], [], []>} : vector<5x256xf32>, vector<256x64xf32>, vector<5x64xf32> -> vector<5x64xf32>
    %c1_146 = arith.constant 1 : index
    %c0_147 = arith.constant 0 : index
    %c0_148 = arith.constant 0 : index
    %321 = vector.load %arg15[%c1_146, %c0_147, %c0_148] : memref<2x1x64xf32, #tpu.memory_space<vmem>>, vector<1x1x64xf32>
    %322 = vector.shape_cast %321 : vector<1x1x64xf32> to vector<1x64xf32>
    %323 = vector.broadcast %322 : vector<1x64xf32> to vector<5x64xf32>
    %324 = arith.addf %320, %323 : vector<5x64xf32>
    %325 = arith.addf %324, %276 : vector<5x64xf32>
    %c0_149 = arith.constant 0 : index
    %c0_150 = arith.constant 0 : index
    %326 = vector.load %arg16[%c0_149, %c0_150] : memref<1x64xf32, #tpu.memory_space<vmem>>, vector<1x64xf32>
    %c0_151 = arith.constant 0 : index
    %c0_152 = arith.constant 0 : index
    %327 = vector.load %arg17[%c0_151, %c0_152] : memref<1x64xf32, #tpu.memory_space<vmem>>, vector<1x64xf32>
    %cst_153 = arith.constant dense<0.000000e+00> : vector<5xf32>
    %328 = vector.multi_reduction <add>, %325, %cst_153 [1] : vector<5x64xf32> to vector<5xf32>
    %329 = vector.shape_cast %328 : vector<5xf32> to vector<5x1xf32>
    %cst_154 = arith.constant 6.400000e+01 : f32
    %330 = vector.broadcast %cst_154 : f32 to vector<5x1xf32>
    %331 = arith.divf %329, %330 : vector<5x1xf32>
    %332 = vector.broadcast %331 : vector<5x1xf32> to vector<5x64xf32>
    %333 = arith.subf %325, %332 : vector<5x64xf32>
    %334 = arith.mulf %333, %333 : vector<5x64xf32>
    %cst_155 = arith.constant dense<0.000000e+00> : vector<5xf32>
    %335 = vector.multi_reduction <add>, %334, %cst_155 [1] : vector<5x64xf32> to vector<5xf32>
    %336 = vector.shape_cast %335 : vector<5xf32> to vector<5x1xf32>
    %cst_156 = arith.constant 6.400000e+01 : f32
    %337 = vector.broadcast %cst_156 : f32 to vector<5x1xf32>
    %338 = arith.divf %336, %337 : vector<5x1xf32>
    %339 = vector.broadcast %331 : vector<5x1xf32> to vector<5x64xf32>
    %340 = arith.subf %325, %339 : vector<5x64xf32>
    %cst_157 = arith.constant 9.99999997E-7 : f32
    %341 = vector.broadcast %cst_157 : f32 to vector<5x1xf32>
    %342 = arith.addf %338, %341 : vector<5x1xf32>
    %343 = math.rsqrt %342 : vector<5x1xf32>
    %344 = vector.broadcast %343 : vector<5x1xf32> to vector<5x64xf32>
    %345 = arith.mulf %340, %344 : vector<5x64xf32>
    %346 = vector.broadcast %326 : vector<1x64xf32> to vector<5x64xf32>
    %347 = arith.mulf %345, %346 : vector<5x64xf32>
    %348 = vector.broadcast %327 : vector<1x64xf32> to vector<5x64xf32>
    %349 = arith.addf %347, %348 : vector<5x64xf32>
    %350 = vector.extract_strided_slice %349 {offsets = [0, 0], sizes = [1, 64], strides = [1, 1]} : vector<5x64xf32> to vector<1x64xf32>
    %c0_158 = arith.constant 0 : index
    %c0_159 = arith.constant 0 : index
    %351 = vector.load %arg18[%c0_158, %c0_159] : memref<64x256xf32, #tpu.memory_space<vmem>>, vector<64x256xf32>
    %cst_160 = arith.constant dense<0.000000e+00> : vector<1x256xf32>
    %352 = tpu.matmul %350, %351, %cst_160 {dimension_numbers = #tpu.dot_dimension_numbers<[1], [0], [0], [1], [0, 0, 1, 1], [], []>} : vector<1x64xf32>, vector<64x256xf32>, vector<1x256xf32> -> vector<1x256xf32>
    %c0_161 = arith.constant 0 : index
    %c0_162 = arith.constant 0 : index
    %353 = vector.load %arg19[%c0_161, %c0_162] : memref<1x256xf32, #tpu.memory_space<vmem>>, vector<1x256xf32>
    %354 = arith.addf %352, %353 : vector<1x256xf32>
    %cst_163 = arith.constant 0.000000e+00 : f32
    %355 = vector.broadcast %cst_163 : f32 to vector<1x256xf32>
    %356 = arith.maximumf %354, %355 : vector<1x256xf32>
    %c0_164 = arith.constant 0 : index
    %c0_165 = arith.constant 0 : index
    %357 = vector.load %arg20[%c0_164, %c0_165] : memref<256x128xf32, #tpu.memory_space<vmem>>, vector<256x128xf32>
    %cst_166 = arith.constant dense<0.000000e+00> : vector<1x128xf32>
    %358 = tpu.matmul %356, %357, %cst_166 {dimension_numbers = #tpu.dot_dimension_numbers<[1], [0], [0], [1], [0, 0, 1, 1], [], []>} : vector<1x256xf32>, vector<256x128xf32>, vector<1x128xf32> -> vector<1x128xf32>
    %c0_167 = arith.constant 0 : index
    %c0_168 = arith.constant 0 : index
    %359 = vector.load %arg21[%c0_167, %c0_168] : memref<1x128xf32, #tpu.memory_space<vmem>>, vector<1x128xf32>
    %360 = arith.addf %358, %359 : vector<1x128xf32>
    %c0_169 = arith.constant 0 : index
    %c0_170 = arith.constant 0 : index
    %c0_171 = arith.constant 0 : index
    %361 = vector.load %arg22[%c0_169, %c0_170, %c0_171] : memref<1x1x128xf32, #tpu.memory_space<vmem>>, vector<1x1x128xf32>
    %362 = vector.shape_cast %361 : vector<1x1x128xf32> to vector<1x128xf32>
    %363 = vector.shape_cast %360 : vector<1x128xf32> to vector<1x1x128xf32>
    tpu.vector_store %arg22[%c0_169, %c0_170, %c0_171], %363 {strides = array<i32>} : memref<1x1x128xf32, #tpu.memory_space<vmem>>, vector<1x1x128xf32>,
    return
  }
  func.func @transform_0(%arg0: i32) -> (i32, i32, i32) {
    %c0_i32 = arith.constant 0 : i32
    %c0_i32_0 = arith.constant 0 : i32
    %c0_i32_1 = arith.constant 0 : i32
    return %arg0, %c0_i32, %c0_i32_0 : i32, i32, i32
  }
  func.func @transform_1(%arg0: i32) -> (i32, i32) {
    %c0_i32 = arith.constant 0 : i32
    %c0_i32_0 = arith.constant 0 : i32
    %c0_i32_1 = arith.constant 0 : i32
    return %c0_i32, %c0_i32_0 : i32, i32
  }
  func.func @transform_2(%arg0: i32) -> (i32, i32) {
    %c0_i32 = arith.constant 0 : i32
    %c0_i32_0 = arith.constant 0 : i32
    %c0_i32_1 = arith.constant 0 : i32
    return %c0_i32, %c0_i32_0 : i32, i32
  }
  func.func @transform_3(%arg0: i32) -> (i32, i32, i32) {
    %c0_i32 = arith.constant 0 : i32
    %c0_i32_0 = arith.constant 0 : i32
    %c0_i32_1 = arith.constant 0 : i32
    %c0_i32_2 = arith.constant 0 : i32
    return %c0_i32, %c0_i32_0, %c0_i32_1 : i32, i32, i32
  }
  func.func @transform_4(%arg0: i32) -> (i32, i32, i32) {
    %c0_i32 = arith.constant 0 : i32
    %c0_i32_0 = arith.constant 0 : i32
    %c0_i32_1 = arith.constant 0 : i32
    %c0_i32_2 = arith.constant 0 : i32
    return %c0_i32, %c0_i32_0, %c0_i32_1 : i32, i32, i32
  }
  func.func @transform_5(%arg0: i32) -> (i32, i32, i32) {
    %c0_i32 = arith.constant 0 : i32
    %c0_i32_0 = arith.constant 0 : i32
    %c0_i32_1 = arith.constant 0 : i32
    %c0_i32_2 = arith.constant 0 : i32
    return %c0_i32, %c0_i32_0, %c0_i32_1 : i32, i32, i32
  }
  func.func @transform_6(%arg0: i32) -> (i32, i32, i32) {
    %c0_i32 = arith.constant 0 : i32
    %c0_i32_0 = arith.constant 0 : i32
    %c0_i32_1 = arith.constant 0 : i32
    %c0_i32_2 = arith.constant 0 : i32
    return %c0_i32, %c0_i32_0, %c0_i32_1 : i32, i32, i32
  }
  func.func @transform_7(%arg0: i32) -> (i32, i32, i32) {
    %c0_i32 = arith.constant 0 : i32
    %c0_i32_0 = arith.constant 0 : i32
    %c0_i32_1 = arith.constant 0 : i32
    %c0_i32_2 = arith.constant 0 : i32
    return %c0_i32, %c0_i32_0, %c0_i32_1 : i32, i32, i32
  }
  func.func @transform_8(%arg0: i32) -> (i32, i32, i32) {
    %c0_i32 = arith.constant 0 : i32
    %c0_i32_0 = arith.constant 0 : i32
    %c0_i32_1 = arith.constant 0 : i32
    %c0_i32_2 = arith.constant 0 : i32
    return %c0_i32, %c0_i32_0, %c0_i32_1 : i32, i32, i32
  }
  func.func @transform_9(%arg0: i32) -> (i32, i32, i32) {
    %c0_i32 = arith.constant 0 : i32
    %c0_i32_0 = arith.constant 0 : i32
    %c0_i32_1 = arith.constant 0 : i32
    %c0_i32_2 = arith.constant 0 : i32
    return %c0_i32, %c0_i32_0, %c0_i32_1 : i32, i32, i32
  }
  func.func @transform_10(%arg0: i32) -> (i32, i32, i32) {
    %c0_i32 = arith.constant 0 : i32
    %c0_i32_0 = arith.constant 0 : i32
    %c0_i32_1 = arith.constant 0 : i32
    %c0_i32_2 = arith.constant 0 : i32
    return %c0_i32, %c0_i32_0, %c0_i32_1 : i32, i32, i32
  }
  func.func @transform_11(%arg0: i32) -> (i32, i32, i32) {
    %c0_i32 = arith.constant 0 : i32
    %c0_i32_0 = arith.constant 0 : i32
    %c0_i32_1 = arith.constant 0 : i32
    %c0_i32_2 = arith.constant 0 : i32
    return %c0_i32, %c0_i32_0, %c0_i32_1 : i32, i32, i32
  }
  func.func @transform_12(%arg0: i32) -> (i32, i32, i32) {
    %c0_i32 = arith.constant 0 : i32
    %c0_i32_0 = arith.constant 0 : i32
    %c0_i32_1 = arith.constant 0 : i32
    %c0_i32_2 = arith.constant 0 : i32
    return %c0_i32, %c0_i32_0, %c0_i32_1 : i32, i32, i32
  }
  func.func @transform_13(%arg0: i32) -> (i32, i32, i32) {
    %c0_i32 = arith.constant 0 : i32
    %c0_i32_0 = arith.constant 0 : i32
    %c0_i32_1 = arith.constant 0 : i32
    %c0_i32_2 = arith.constant 0 : i32
    return %c0_i32, %c0_i32_0, %c0_i32_1 : i32, i32, i32
  }
  func.func @transform_14(%arg0: i32) -> (i32, i32, i32) {
    %c0_i32 = arith.constant 0 : i32
    %c0_i32_0 = arith.constant 0 : i32
    %c0_i32_1 = arith.constant 0 : i32
    %c0_i32_2 = arith.constant 0 : i32
    return %c0_i32, %c0_i32_0, %c0_i32_1 : i32, i32, i32
  }
  func.func @transform_15(%arg0: i32) -> (i32, i32) {
    %c0_i32 = arith.constant 0 : i32
    %c0_i32_0 = arith.constant 0 : i32
    %c0_i32_1 = arith.constant 0 : i32
    return %c0_i32, %c0_i32_0 : i32, i32
  }
  func.func @transform_16(%arg0: i32) -> (i32, i32) {
    %c0_i32 = arith.constant 0 : i32
    %c0_i32_0 = arith.constant 0 : i32
    %c0_i32_1 = arith.constant 0 : i32
    return %c0_i32, %c0_i32_0 : i32, i32
  }
  func.func @transform_17(%arg0: i32) -> (i32, i32) {
    %c0_i32 = arith.constant 0 : i32
    %c0_i32_0 = arith.constant 0 : i32
    %c0_i32_1 = arith.constant 0 : i32
    return %c0_i32, %c0_i32_0 : i32, i32
  }
  func.func @transform_18(%arg0: i32) -> (i32, i32) {
    %c0_i32 = arith.constant 0 : i32
    %c0_i32_0 = arith.constant 0 : i32
    %c0_i32_1 = arith.constant 0 : i32
    return %c0_i32, %c0_i32_0 : i32, i32
  }
  func.func @transform_19(%arg0: i32) -> (i32, i32) {
    %c0_i32 = arith.constant 0 : i32
    %c0_i32_0 = arith.constant 0 : i32
    %c0_i32_1 = arith.constant 0 : i32
    return %c0_i32, %c0_i32_0 : i32, i32
  }
  func.func @transform_20(%arg0: i32) -> (i32, i32) {
    %c0_i32 = arith.constant 0 : i32
    %c0_i32_0 = arith.constant 0 : i32
    %c0_i32_1 = arith.constant 0 : i32
    return %c0_i32, %c0_i32_0 : i32, i32
  }
  func.func @transform_21(%arg0: i32) -> (i32, i32, i32) {
    %c0_i32 = arith.constant 0 : i32
    %c0_i32_0 = arith.constant 0 : i32
    %c0_i32_1 = arith.constant 0 : i32
    return %arg0, %c0_i32, %c0_i32_0 : i32, i32, i32
  }
}

</mosaic_0001>

<bundles_post_ra>
// kernel: vit_clf_forward.1
= control target key start
LH: loop header
LB: loop body
LE: loop exit
PB: predicated region body
PF: predicated region fallthrough
CT: control target
= control target key end

     0   :  { %s6522_s0 = inlined_call_operand.vmem [shape: f32[2,5,770], index: 0, kind: input, shape index: {}]   ;;  %s6523_s1 = inlined_call_operand.vmem [shape: f32[770,64], index: 1, kind: input, shape index: {}]   ;;  %s6524_s2 = inlined_call_operand.vmem [shape: f32[5,64], index: 2, kind: input, shape index: {}]   ;;  %s6525_s3 = inlined_call_operand.vmem [shape: f32[2,1,64], index: 3, kind: input, shape index: {}]   ;;  %s6526_s4 = inlined_call_operand.vmem [shape: f32[2,1,64], index: 4, kind: input, shape index: {}]   ;;  %s6527_s5 = inlined_call_operand.vmem [shape: f32[2,64,192], index: 5, kind: input, shape index: {}]   ;;  %s6528_s6 = inlined_call_operand.vmem [shape: f32[2,1,192], index: 6, kind: input, shape index: {}]   ;;  %s6529_s7 = inlined_call_operand.vmem [shape: f32[2,64,64], index: 7, kind: input, shape index: {}]   ;;  %s6530_s8 = inlined_call_operand.vmem [shape: f32[2,1,64], index: 8, kind: input, shape index: {}]   ;;  %s6531_s9 = inlined_call_operand.vmem [shape: f32[2,1,64], index: 9, kind: input, shape index: {}]   ;;  %s6532_s10 = inlined_call_operand.vmem [shape: f32[2,1,64], index: 10, kind: input, shape index: {}]   ;;  %s6533_s11 = inlined_call_operand.vmem [shape: f32[2,64,256], index: 11, kind: input, shape index: {}]   ;;  %s6534_s12 = inlined_call_operand.vmem [shape: f32[2,1,256], index: 12, kind: input, shape index: {}]   ;;  %s6535_s13 = inlined_call_operand.vmem [shape: f32[2,256,64], index: 13, kind: input, shape index: {}]   ;;  %s6536_s14 = inlined_call_operand.vmem [shape: f32[2,1,64], index: 14, kind: input, shape index: {}]   ;;  %s6537_s15 = inlined_call_operand.vmem [shape: f32[1,64], index: 15, kind: input, shape index: {}]   ;;  %s6538_s16 = inlined_call_operand.vmem [shape: f32[1,64], index: 16, kind: input, shape index: {}]   ;;  %s6539_s17 = inlined_call_operand.vmem [shape: f32[64,256], index: 17, kind: input, shape index: {}]   ;;  %s6540_s18 = inlined_call_operand.vmem [shape: f32[1,256], index: 18, kind: input, shape index: {}]   ;;  %s6541_s19 = inlined_call_operand.vmem [shape: f32[256,128], index: 19, kind: input, shape index: {}]   ;;  %s6542_s20 = inlined_call_operand.vmem [shape: f32[1,128], index: 20, kind: input, shape index: {}]   ;;  %s6543_s21 = inlined_call_operand.hbm [shape: f32[2,1,128], index: 21, kind: output, shape index: {}]  }
   0x1   :  { %6566 = sst [smem:[#allocation11_spill]] %s6522_s0 }
   0x2   :  { %6567 = sst [smem:[#allocation12_spill]] %s6523_s1 }
   0x3   :  { %6568 = sst [smem:[#allocation13_spill]] %s6524_s2 }
   0x4   :  { %6569 = sst [smem:[#allocation14_spill]] %s6525_s3 }
   0x5   :  { %6570 = sst [smem:[#allocation15_spill]] %s6526_s4 }
   0x6   :  { %6571 = sst [smem:[#allocation16_spill]] %s6527_s5 }
   0x7   :  { %6572 = sst [smem:[#allocation17_spill]] %s6528_s6 }
   0x8   :  { %6573 = sst [smem:[#allocation18_spill]] %s6542_s20 }
   0x9   :  { %6574 = sst [smem:[#allocation19_spill]] %s6543_s21 }
   0xa   :  { %26 = vsyncpa [#allocation3], 0 }
   0xb   :  { %28 = vsyncpa [#allocation3 + $0x1], 0  ;;  %s5236_s2 = smov 0   ;;  %s5238_s25 = smov 0  }
   0xc   :  { %s5240_s26 = smov 0   ;;  %s5242_s27 = smov 0  }
   0xd LB: > { %6575 = sst [smem:[#allocation5_spill]] %s5101_s2  ;;  %s5257_s3 = sadd.s32 4294967295, %s5113_s27   ;;  %s5113_s27 = sphi %s5242_s27, %s6602_s27   ;;  %s5109_s26 = sphi %s5240_s26, %s6604_s26   ;;  %s5105_s25 = sphi %s5238_s25, %s6606_s25   ;;  %s5101_s2 = sphi %s5236_s2, %s6605_s2  }
   0xe   : > { %6576 = sst [smem:[#allocation6_spill]] %s5109_s26  ;;  %s4083_s28 = sadd.s32 4294967294, %s5113_s27  }
   0xf   : > { %6577 = sst [smem:[#allocation7_spill]] %s5113_s27  ;;  %s5261_s29 = sadd.s32 1, %s5113_s27  }
  0x10   : > { %6578 = sst [smem:[#allocation8_spill]] %s5261_s29  ;;  %s487_s0 = sadd.s32 1, %s5109_s26 }
  0x11   : > { %s484_s4 = ssub.s32 %s5113_s27, %s5261_s29  ;;  %p497_p0 = scmp.ne.s32.totalorder %s5109_s26, %s5105_s25 }
  0x12   : > { %p485_p1 = scmp.eq.s32.totalorder %s484_s4, 0  ;;  %p498_p2 = scmp.eq.s32.totalorder %s5257_s3, 1 }
  0x13   : > { %p503_p3 = scmp.ne.s32.totalorder %s5105_s25, %s5101_s2  ;;  %p504_p4 = scmp.eq.s32.totalorder %s4083_s28, 1 }
  0x14   : > { %s5272_s30 = scalar_select %p485_p1, %s5109_s26, %s487_s0  }
  0x15   : > { %p5274_p5 = por %p498_p2, %p497_p0  ;;  %p5278_p6 = por %p504_p4, %p503_p3 }
  0x16   : > { %6579 = sst [smem:[#allocation9_spill]] %s5272_s30  ;;  %p4086_p7 = scmp.ge.s32.totalorder %s5113_s27, 1 }
  0x17   : > { %s6581_s22 = scalar_select %p5278_p6, 1, 0 }
  0x18   : > { %p590_p8 = scmp.lt.s32.totalorder %s5113_s27, 3 }
  0x19   : > { %6582 = sst [smem:[#allocation10_spill]] %s6581_s22 }
  0x1a   : > { %p591_p9 = pnand %p4086_p7, %p590_p8 }
  0x1b   : > { %s6583_s24 = sld [smem:[#allocation12_spill]] (!%p591_p9)  ;;  %p649_p10 = scmp.lt.s32.totalorder (!%p591_p9), %s5257_s3, 1  ;;  %vm763_vm0 = vcmask (!%p591_p9), 1041408   ;;  %vm759_vm1 = vcmask (!%p591_p9), 15360   ;;  %vm5116_vm2 = vmmov (!%p591_p9), 0   ;;  %vm1049_vm3 = vcmask (!%p591_p9), 520192  }
  0x1c   : > { %594 = sbr.rel (%p591_p9) target bundleno = 7452 (0x1d1c), region = 104  ;;  %s6584_s23 = sld [smem:[#allocation11_spill]] (!%p591_p9)  ;;  %vm1106_vm4 = vcmask (!%p591_p9), 523264   ;;  %vm1200_vm5 = vcmask (!%p591_p9), 130048   ;;  %vm1291_vm6 = vcmask (!%p591_p9), 1044480   ;;  %vm1275_vm7 = vcmask (!%p591_p9), 36864  }
  0x1d   : > { %s6585_s2 = sld [smem:[#allocation13_spill]] (!%p591_p9)  ;;  %s6587_s29 = sld [smem:[#allocation14_spill]] (!%p591_p9)  ;;  %vm1287_vm8 = vcmask (!%p591_p9), 39936  }
  0x1e   : > { %s6588_s22 = sld [smem:[#allocation15_spill]] (!%p591_p9)  ;;  %s6589_s6 = sld [smem:[#allocation17_spill]] (!%p591_p9) }
  0x1f   : > { %s6562_s0 = smov (!%p591_p9), 112   ;;  %s6561_s21 = smov (!%p591_p9), 32  }
  0x20   : > { %s6558_s4 = smov (!%p591_p9), 96   ;;  %s6555_s28 = smov (!%p591_p9), 16  }
  0x21   : > { %v677_v0 = vld [vmem:[%s6583_s24 + $0x80] sm:$0xff] (!%p591_p9)  ;;  %v678_v1 = vld [vmem:[%s6583_s24 + $0x88] sm:$0xff] (!%p591_p9)  ;;  %v679_v11 = vld [vmem:[%s6583_s24 + $0x90] sm:$0xff] (!%p591_p9)  ;;  %s6595_s20 = smov (!%p591_p9), 80  }
  0x22   : > { %v661_v2 = vld [vmem:[%s6583_s24] sm:$0xff] (!%p591_p9)  ;;  %v4641_v3 = vpack.c.bf16 (!%p591_p9), %v678_v1, %v677_v0  ;;  %v662_v4 = vld [vmem:[%s6583_s24 + $0x8] sm:$0xff] (!%p591_p9)  ;;  %v680_v13 = vld [vmem:[%s6583_s24 + $0x98] sm:$0xff] (!%p591_p9) }
  0x23   : > { %v709_v5 = vld [vmem:[%s6583_s24 + $0x180] sm:$0xff]  ;;  %v710_v6 = vld [vmem:[%s6583_s24 + $0x188] sm:$0xff]  ;;  %v4643_v7 = vpack.c.bf16 %v662_v4, %v661_v2  ;;  %v663_v14 = vld [vmem:[%s6583_s24 + $0x10] sm:$0xff]  ;;  %v4645_v16 = vpack.c.bf16 %v680_v13, %v679_v11  ;;  %s5378_s26 = scalar_select %p649_p10, %s5257_s3, 1 }
  0x24   : > { %v4673_v8 = vpack.c.bf16 %v710_v6, %v709_v5  ;;  %v693_v9 = vld [vmem:[%s6583_s24 + $0x100] sm:$0xff]  ;;  %v694_v10 = vld [vmem:[%s6583_s24 + $0x108] sm:$0xff]  ;;  %4642 = vmatprep.subr.bf16.mxu0 %v4641_v3  ;;  %v664_v15 = vld [vmem:[%s6583_s24 + $0x18] sm:$0xff] }
  0x25   : > { %v4675_v12 = vpack.c.bf16 %v694_v10, %v693_v9  ;;  %4644 = vmatpush3.bf16.msra.mxu0 %v4643_v7  ;;  %v4647_v17 = vpack.c.bf16 %v664_v15, %v663_v14  ;;  %v711_v18 = vld [vmem:[%s6583_s24 + $0x190] sm:$0xff]  ;;  %v712_v19 = vld [vmem:[%s6583_s24 + $0x198] sm:$0xff]  ;;  %v681_v23 = vld [vmem:[%s6583_s24 + $0xa0] sm:$0xff]  ;;  %s4951_s30 = smul.u32 56, %s5378_s26  ;;  %s6560_s26 = smov 48  }
  0x26   : > { %4674 = vmatprep.subr.bf16.mxu1 %v4673_v8  ;;  %v695_v20 = vld [vmem:[%s6583_s24 + $0x110] sm:$0xff]  ;;  %v4677_v21 = vpack.c.bf16 %v712_v19, %v711_v18  ;;  %v696_v22 = vld [vmem:[%s6583_s24 + $0x118] sm:$0xff]  ;;  %v682_v24 = vld [vmem:[%s6583_s24 + $0xa8] sm:$0xff]  ;;  %4646 = vmatprep.subr.bf16.mxu0 %v4645_v16 }
  0x27   : > { %4676 = vmatpush3.bf16.msra.mxu1 %v4675_v12  ;;  %v4679_v25 = vpack.c.bf16 %v696_v22, %v695_v20  ;;  %v4649_v26 = vpack.c.bf16 %v682_v24, %v681_v23  ;;  %v665_v27 = vld [vmem:[%s6583_s24 + $0x20] sm:$0xff]  ;;  %v666_v28 = vld [vmem:[%s6583_s24 + $0x28] sm:$0xff]  ;;  %v683_v35 = vld [vmem:[%s6583_s24 + $0xb0] sm:$0xff]  ;;  %s5435_s1 = scalar_lea.vmem %s6584_s23, %s4951_s30  ;;  %s6586_s30 = sld [smem:[#allocation16_spill]] }
  0x28   : > { %v713_v29 = vld [vmem:[%s6583_s24 + $0x1a0] sm:$0xff]  ;;  %4678 = vmatprep.subr.bf16.mxu1 %v4677_v21  ;;  %v714_v30 = vld [vmem:[%s6583_s24 + $0x1a8] sm:$0xff]  ;;  %v4651_v33 = vpack.c.bf16 %v666_v28, %v665_v27  ;;  %v684_v36 = vld [vmem:[%s6583_s24 + $0xb8] sm:$0xff]  ;;  %s6564_s23 = smov 64  }
  0x29   : > { %v697_v31 = vld [vmem:[%s6583_s24 + $0x120] sm:$0xff]  ;;  %v698_v32 = vld [vmem:[%s6583_s24 + $0x128] sm:$0xff]  ;;  %4648 = vmatpush3.bf16.msra.mxu0 %v4647_v17  ;;  %v4681_v34 = vpack.c.bf16 %v714_v30, %v713_v29  ;;  %v667_v37 = vld [vmem:[%s6583_s24 + $0x30] sm:$0xff]  ;;  %v4653_v39 = vpack.c.bf16 %v684_v36, %v683_v35 }
  0x2a   : > { %4650 = vmatprep.subr.bf16.mxu0 %v4649_v26  ;;  %v4683_v38 = vpack.c.bf16 %v698_v32, %v697_v31  ;;  %v668_v40 = vld [vmem:[%s6583_s24 + $0x38] sm:$0xff]  ;;  %v715_v41 = vld [vmem:[%s6583_s24 + $0x1b0] sm:$0xff]  ;;  %v685_v46 = vld [vmem:[%s6583_s24 + $0xc0] sm:$0xff] }
  0x2b   : > { %4680 = vmatpush3.bf16.msra.mxu1 %v4679_v25  ;;  %v716_v42 = vld [vmem:[%s6583_s24 + $0x1b8] sm:$0xff]  ;;  %v699_v44 = vld [vmem:[%s6583_s24 + $0x130] sm:$0xff]  ;;  %v686_v47 = vld [vmem:[%s6583_s24 + $0xc8] sm:$0xff]  ;;  %v4655_v48 = vpack.c.bf16 %v668_v40, %v667_v37 }
  0x2c   : > { %4682 = vmatprep.subr.bf16.mxu1 %v4681_v34  ;;  %v4685_v43 = vpack.c.bf16 %v716_v42, %v715_v41  ;;  %v700_v45 = vld [vmem:[%s6583_s24 + $0x138] sm:$0xff]  ;;  %v717_v49 = vld [vmem:[%s6583_s24 + $0x1c0] sm:$0xff]  ;;  %v718_v50 = vld [vmem:[%s6583_s24 + $0x1c8] sm:$0xff]  ;;  %v4657_v52 = vpack.c.bf16 %v686_v47, %v685_v46 }
  0x2d   : > { %4652 = vmatpush3.bf16.msra.mxu0 %v4651_v33  ;;  %v4687_v51 = vpack.c.bf16 %v700_v45, %v699_v44  ;;  %v669_v53 = vld [vmem:[%s6583_s24 + $0x40] sm:$0xff]  ;;  %v670_v54 = vld [vmem:[%s6583_s24 + $0x48] sm:$0xff]  ;;  %v4689_v56 = vpack.c.bf16 %v718_v50, %v717_v49  ;;  %v687_v58 = vld [vmem:[%s6583_s24 + $0xd0] sm:$0xff]  ;;  %v5115_v50 = vmov 0.0  }
  0x2e   : > { %4654 = vmatprep.subr.bf16.mxu0 %v4653_v39  ;;  %v701_v55 = vld [vmem:[%s6583_s24 + $0x140] sm:$0xff]  ;;  %v702_v57 = vld [vmem:[%s6583_s24 + $0x148] sm:$0xff]  ;;  %v688_v59 = vld [vmem:[%s6583_s24 + $0xd8] sm:$0xff]  ;;  %v4659_v62 = vpack.c.bf16 %v670_v54, %v669_v53 }
  0x2f   : > { %4684 = vmatpush3.bf16.msra.mxu1 %v4683_v38  ;;  %v719_v60 = vld [vmem:[%s6583_s24 + $0x1d0] sm:$0xff]  ;;  %v720_v61 = vld [vmem:[%s6583_s24 + $0x1d8] sm:$0xff]  ;;  %v4691_v63 = vpack.c.bf16 %v702_v57, %v701_v55  ;;  %v4661_v0 = vpack.c.bf16 %v688_v59, %v687_v58  ;;  %v689_v6 = vld [vmem:[%s6583_s24 + $0xe0] sm:$0xff] }
  0x30   : > { %4686 = vmatprep.subr.bf16.mxu1 %v4685_v43  ;;  %v671_v1 = vld [vmem:[%s6583_s24 + $0x50] sm:$0xff]  ;;  %v672_v2 = vld [vmem:[%s6583_s24 + $0x58] sm:$0xff]  ;;  %v4693_v4 = vpack.c.bf16 %v720_v61, %v719_v60  ;;  %v690_v7 = vld [vmem:[%s6583_s24 + $0xe8] sm:$0xff] }
  0x31   : > { %4656 = vmatpush3.bf16.msra.mxu0 %v4655_v48  ;;  %v703_v3 = vld [vmem:[%s6583_s24 + $0x150] sm:$0xff]  ;;  %v704_v5 = vld [vmem:[%s6583_s24 + $0x158] sm:$0xff]  ;;  %v721_v8 = vld [vmem:[%s6583_s24 + $0x1e0] sm:$0xff]  ;;  %v4663_v10 = vpack.c.bf16 %v672_v2, %v671_v1  ;;  %v4665_v14 = vpack.c.bf16 %v690_v7, %v689_v6 }
  0x32   : > { %4658 = vmatprep.subr.bf16.mxu0 %v4657_v52  ;;  %v722_v9 = vld [vmem:[%s6583_s24 + $0x1e8] sm:$0xff]  ;;  %v673_v11 = vld [vmem:[%s6583_s24 + $0x60] sm:$0xff]  ;;  %v4695_v13 = vpack.c.bf16 %v704_v5, %v703_v3  ;;  %v691_v19 = vld [vmem:[%s6583_s24 + $0xf0] sm:$0xff] }
  0x33   : > { %4688 = vmatpush3.bf16.msra.mxu1 %v4687_v51  ;;  %v655_v12 = vld [vmem:[%s5435_s1 + $0x8] sm:$0x1f]  ;;  %v705_v16 = vld [vmem:[%s6583_s24 + $0x160] sm:$0xff]  ;;  %v4697_v18 = vpack.c.bf16 %v722_v9, %v721_v8  ;;  %v692_v20 = vld [vmem:[%s6583_s24 + $0xf8] sm:$0xff] }
  0x34   : > { %4690 = vmatprep.subr.bf16.mxu1 %v4689_v56  ;;  %v674_v15 = vld [vmem:[%s6583_s24 + $0x68] sm:$0xff]  ;;  %831 = vmatprep.mubr.f32.mxu0 %v655_v12  ;;  %v657_v21 = vld [vmem:[%s5435_s1 + $0x18] sm:$0x1f]  ;;  %v723_v22 = vld [vmem:[%s6583_s24 + $0x1f0] sm:$0xff]  ;;  %v4669_v26 = vpack.c.bf16 %v692_v20, %v691_v19 }
  0x35   : > { %4660 = vmatpush3.bf16.msra.mxu0 %v4659_v62  ;;  %v706_v17 = vld [vmem:[%s6583_s24 + $0x168] sm:$0xff]  ;;  %v724_v23 = vld [vmem:[%s6583_s24 + $0x1f8] sm:$0xff]  ;;  %901 = vmatprep.mubr.f32.mxu1 %v657_v21  ;;  %v4667_v24 = vpack.c.bf16 %v674_v15, %v673_v11  ;;  %v675_v27 = vld [vmem:[%s6583_s24 + $0x70] sm:$0xff] }
  0x36   : > { %4662 = vmatprep.subr.bf16.mxu0 %v4661_v0  ;;  %v4699_v25 = vpack.c.bf16 %v706_v17, %v705_v16  ;;  %v676_v28 = vld [vmem:[%s6583_s24 + $0x78] sm:$0xff]  ;;  %v707_v29 = vld [vmem:[%s6583_s24 + $0x170] sm:$0xff]  ;;  %v4701_v30 = vpack.c.bf16 %v724_v23, %v723_v22  ;;  %v741_v32 = vld [vmem:[%s6583_s24 + $0x280] sm:$0xff] }
  0x37   : > { %4692 = vmatpush3.bf16.msra.mxu1 %v4691_v63  ;;  %v708_v31 = vld [vmem:[%s6583_s24 + $0x178] sm:$0xff]  ;;  %v742_v33 = vld [vmem:[%s6583_s24 + $0x288] sm:$0xff]  ;;  %v4671_v34 = vpack.c.bf16 %v676_v28, %v675_v27  ;;  %v725_v37 = vld [vmem:[%s6583_s24 + $0x200] sm:$0xff] }
  0x38   : > { %4694 = vmatprep.subr.bf16.mxu1 %v4693_v4  ;;  %v4703_v35 = vpack.c.bf16 %v708_v31, %v707_v29  ;;  %v4705_v36 = vpack.c.bf16 %v742_v33, %v741_v32  ;;  %v726_v38 = vld [vmem:[%s6583_s24 + $0x208] sm:$0xff]  ;;  %v743_v39 = vld [vmem:[%s6583_s24 + $0x290] sm:$0xff]  ;;  %v744_v40 = vld [vmem:[%s6583_s24 + $0x298] sm:$0xff] }
  0x39   : > { %4664 = vmatpush3.bf16.msra.mxu0 %v4663_v10  ;;  %v654_v41 = vld [vmem:[%s5435_s1] sm:$0x1f]  ;;  %v4707_v42 = vpack.c.bf16 %v726_v38, %v725_v37  ;;  %v656_v43 = vld [vmem:[%s5435_s1 + $0x10] sm:$0x1f]  ;;  %v4709_v44 = vpack.c.bf16 %v744_v40, %v743_v39  ;;  %v728_v46 = vld [vmem:[%s6583_s24 + $0x218] sm:$0xff] }
  0x3a   : > { %4666 = vmatprep.subr.bf16.mxu0 %v4665_v14  ;;  %v727_v45 = vld [vmem:[%s6583_s24 + $0x210] sm:$0xff]  ;;  %v745_v47 = vld [vmem:[%s6583_s24 + $0x2a0] sm:$0xff]  ;;  %v746_v48 = vld [vmem:[%s6583_s24 + $0x2a8] sm:$0xff] }
  0x3b   : > { %4696 = vmatpush3.bf16.msra.mxu1 %v4695_v13  ;;  %v659_v49 = vld [vmem:[%s5435_s1 + $0x28] sm:$0x1f]  ;;  %v757_v51 = vld [vmem:[%s6583_s24 + $0x300] sm:$0x3]  ;;  %v4711_v52 = vpack.c.bf16 %v728_v46, %v727_v45  ;;  %v4713_v53 = vpack.c.bf16 %v746_v48, %v745_v47  ;;  %v660_v56 = vld [vmem:[%s5435_s1 + $0x30] sm:$0x1f] }
  0x3c   : > { %4698 = vmatprep.subr.bf16.mxu1 %v4697_v18  ;;  %v729_v54 = vld [vmem:[%s6583_s24 + $0x220] sm:$0xff]  ;;  %v730_v55 = vld [vmem:[%s6583_s24 + $0x228] sm:$0xff]  ;;  %v747_v57 = vld [vmem:[%s6583_s24 + $0x2b0] sm:$0xff] }
  0x3d   : > { %4668 = vmatpush3.bf16.msra.mxu0 %v4667_v24  ;;  %v748_v58 = vld [vmem:[%s6583_s24 + $0x2b8] sm:$0xff]  ;;  %v4715_v59 = vpack.c.bf16 %v730_v55, %v729_v54  ;;  %v731_v61 = vld [vmem:[%s6583_s24 + $0x230] sm:$0xff]  ;;  %v749_v63 = vld [vmem:[%s6583_s24 + $0x2c0] sm:$0xff] }
  0x3e   : > { %4670 = vmatprep.subr.bf16.mxu0 %v4669_v26  ;;  %v4717_v60 = vpack.c.bf16 %v748_v58, %v747_v57  ;;  %v732_v62 = vld [vmem:[%s6583_s24 + $0x238] sm:$0xff]  ;;  %v750_v0 = vld [vmem:[%s6583_s24 + $0x2c8] sm:$0xff]  ;;  %v733_v3 = vld [vmem:[%s6583_s24 + $0x240] sm:$0xff] }
  0x3f   : > { %4700 = vmatpush3.bf16.msra.mxu1 %v4699_v25  ;;  %v4719_v1 = vpack.c.bf16 %v732_v62, %v731_v61  ;;  %v4721_v2 = vpack.c.bf16 %v750_v0, %v749_v63  ;;  %v734_v4 = vld [vmem:[%s6583_s24 + $0x248] sm:$0xff]  ;;  %v751_v5 = vld [vmem:[%s6583_s24 + $0x2d0] sm:$0xff]  ;;  %v752_v6 = vld [vmem:[%s6583_s24 + $0x2d8] sm:$0xff] }
  0x40   : > { %4702 = vmatprep.subr.bf16.mxu1 %v4701_v30  ;;  %v4723_v7 = vpack.c.bf16 %v734_v4, %v733_v3  ;;  %v4725_v8 = vpack.c.bf16 %v752_v6, %v751_v5  ;;  %v735_v9 = vld [vmem:[%s6583_s24 + $0x250] sm:$0xff]  ;;  %v736_v10 = vld [vmem:[%s6583_s24 + $0x258] sm:$0xff]  ;;  %v753_v11 = vld [vmem:[%s6583_s24 + $0x2e0] sm:$0xff] }
  0x41   : > { %4672 = vmatpush3.bf16.msra.mxu0 %v4671_v34  ;;  %v754_v12 = vld [vmem:[%s6583_s24 + $0x2e8] sm:$0xff]  ;;  %v4727_v13 = vpack.c.bf16 %v736_v10, %v735_v9  ;;  %v737_v15 = vld [vmem:[%s6583_s24 + $0x260] sm:$0xff]  ;;  %v755_v17 = vld [vmem:[%s6583_s24 + $0x2f0] sm:$0xff] }
  0x42   : > { %4706 = vmatprep.subr.bf16.mxu0 %v4705_v36  ;;  %v4729_v14 = vpack.c.bf16 %v754_v12, %v753_v11  ;;  %v738_v16 = vld [vmem:[%s6583_s24 + $0x268] sm:$0xff]  ;;  %v756_v18 = vld [vmem:[%s6583_s24 + $0x2f8] sm:$0xff]  ;;  %v739_v21 = vld [vmem:[%s6583_s24 + $0x270] sm:$0xff] }
  0x43   : > { %4704 = vmatpush3.bf16.msra.mxu1 %v4703_v35  ;;  %v4731_v19 = vpack.c.bf16 %v738_v16, %v737_v15  ;;  %v4733_v20 = vpack.c.bf16 %v756_v18, %v755_v17  ;;  %v740_v22 = vld [vmem:[%s6583_s24 + $0x278] sm:$0xff]  ;;  %v658_v24 = vld [vmem:[%s5435_s1 + $0x20] sm:$0x1f]  ;;  %v1079_v47 = vld [vmem:[%s6586_s30 + $0x8] sm:$0xff]  ;;  %v1096_v17 = vlaneseq  ;;  %s6590_s1 = smov 64   ;;  %s6592_s24 = smov 32  }
  0x44   : > { %4500 = vmatprep.subr.mxu1 %v5115_v50  ;;  %832 = vmatmul.mubr.f32.vlgmr.msra.gmra.mrb[0].mxu0 %v654_v41  ;;  %v4735_v23 = vpack.c.bf16 %v740_v22, %v739_v21  ;;  %v758_v26 = vld [vmem:[%s6585_s2] sm:$0x1f]  ;;  %v1081_v48 = vld [vmem:[%s6586_s30 + $0x18] sm:$0xff]  ;;  %v1083_v54 = vld [vmem:[%s6586_s30 + $0x28] sm:$0xff]  ;;  %s6556_s2 = smov 80  }
  0x45   : > { %4708 = vmatpush3.bf16.msra.mxu0 %v4707_v42  ;;  %971 = vmatprep.mubr.f32.mxu0 %v659_v49  ;;  %v4737_v49 = vpack.c.bf16 %v1081_v48, %v1079_v47  ;;  %v1085_v55 = vld [vmem:[%s6586_s30 + $0x38] sm:$0xff]  ;;  %v1082_v57 = vld [vmem:[%s6586_s30 + $0x20] sm:$0xff]  ;;  %v1084_v58 = vld [vmem:[%s6586_s30 + $0x30] sm:$0xff]  ;;  %v1097_v18 = vshrl.u32 %v1096_v17, 7 }
  0x46   : > { %902 = vmatmul.mubr.f32.vlgmr.msra.gmra.mrb[0].mxu1 %v656_v43  ;;  %4710 = vmatprep.subr.bf16.mxu0 %v4709_v44  ;;  %v1089_v61 = vld [vmem:[%s6586_s30 + $0x58] sm:$0xff]  ;;  %v1086_v63 = vld [vmem:[%s6586_s30 + $0x40] sm:$0xff]  ;;  %v1088_v0 = vld [vmem:[%s6586_s30 + $0x50] sm:$0xff] }
  0x47   : > { %4501 = vmatpush3.msk.msra.mxu1 %vm763_vm0, %v757_v51  ;;  %4502 = vmatprep.mubr.msk.f32.mxu1 %vm5116_vm2, %v5115_v50  ;;  %v1078_v51 = vld [vmem:[%s6586_s30] sm:$0xff]  ;;  %v1093_v3 = vld [vmem:[%s6586_s30 + $0x78] sm:$0xff]  ;;  %v1092_v6 = vld [vmem:[%s6586_s30 + $0x70] sm:$0xff] }
  0x48   : > { %4738 = vmatprep.subr.bf16.mxu1 %v4737_v49  ;;  %v1090_v5 = vld [vmem:[%s6586_s30 + $0x60] sm:$0xff] }
  0x49   : > { %4712 = vmatpush3.bf16.msra.mxu0 %v4711_v52  ;;  %v1080_v52 = vld [vmem:[%s6586_s30 + $0x10] sm:$0xff]  ;;  %v4090_v12 = vld [vmem:[%s6587_s29] ss:$0 sm:$0xff] }
  0x4a   : > { %4503 = vmatmul.mubr.msk.f32.vlgmr.msra.gmra.mrb[2].mxu1 %vm759_vm1, %v660_v56  ;;  %4714 = vmatprep.subr.bf16.mxu0 %v4713_v53  ;;  %v4739_v53 = vpack.c.bf16 %v1080_v52, %v1078_v51  ;;  %v4741_v56 = vpack.c.bf16 %v1085_v55, %v1083_v54 }
  0x4b   : > { %1174 = vmatprep.mubr.f32.mxu1 %v5115_v50 }
  0x4c   : > { %4740 = vmatpush1.bf16.msra.mxu1 %v4739_v53 }
  0x4d   : > { %4716 = vmatpush3.bf16.msra.mxu0 %v4715_v59  ;;  %v4743_v59 = vpack.c.bf16 %v1084_v58, %v1082_v57  ;;  %4742 = vmatprep.subr.bf16.mxu1 %v4741_v56  ;;  %v1181_v58 = vld [vmem:[%s6529_s7] sm:$0xff] }
  0x4e   : > { %4718 = vmatprep.subr.bf16.mxu0 %v4717_v60  ;;  %v1087_v60 = vld [vmem:[%s6586_s30 + $0x48] sm:$0xff] }
  0x4f   : > { %v4745_v62 = vpack.c.bf16 %v1089_v61, %v1087_v60  ;;  %v5124_v60 = vmov 0.0|0.0  }
  0x50   : > { %4744 = vmatpush1.bf16.msra.mxu1 %v4743_v59  ;;  %v1182_v59 = vld [vmem:[%s6529_s7 + $0x8] sm:$0xff] }
  0x51   : > { %4720 = vmatpush3.bf16.msra.mxu0 %v4719_v1  ;;  %v4747_v1 = vpack.c.bf16 %v1088_v0, %v1086_v63  ;;  %4746 = vmatprep.subr.bf16.mxu1 %v4745_v62  ;;  %v4754_v61 = vpack.c.bf16 %v1182_v59, %v1181_v58  ;;  %v2188_v58 = vld [vmem:[%s6533_s11] sm:$0xff]  ;;  %v2190_v59 = vld [vmem:[%s6533_s11 + $0x10] sm:$0xff] }
  0x52   : > { %4722 = vmatprep.subr.bf16.mxu0 %v4721_v2  ;;  %v1091_v2 = vld [vmem:[%s6586_s30 + $0x68] sm:$0xff] }
  0x53   : > { %v4749_v4 = vpack.c.bf16 %v1093_v3, %v1091_v2 }
  0x54   : > { %4748 = vmatpush1.bf16.msra.mxu1 %v4747_v1 }
  0x55   : > { %4724 = vmatpush3.bf16.msra.mxu0 %v4723_v7  ;;  %v4751_v7 = vpack.c.bf16 %v1092_v6, %v1090_v5  ;;  %4750 = vmatprep.subr.bf16.mxu1 %v4749_v4 }
  0x56   : > { %4726 = vmatprep.subr.bf16.mxu0 %v4725_v8 }
  0x58   : > { %4752 = vmatpush1.bf16.msra.mxu1 %v4751_v7 }
  0x59   : > { %4728 = vmatpush3.bf16.msra.mxu0 %v4727_v13  ;;  %4505 = vmatprep.subr.mxu1 %v5115_v50 }
  0x5a   : > { %4730 = vmatprep.subr.bf16.mxu0 %v4729_v14  ;;  %v4091_v14 = vld [vmem:[%s6588_s22] ss:$0 sm:$0xff] }
  0x5d   : > { %4732 = vmatpush3.bf16.msra.mxu0 %v4731_v19  ;;  %v5668_v19 = vsub.s32 0, %v1097_v18 }
  0x5e   : > { %4734 = vmatprep.subr.bf16.mxu0 %v4733_v20  ;;  %v1094_v20 = vld [vmem:[%s6589_s6] sm:$0x3] }
  0x5f   : > { %v1099_v21 = vrot.slane %v1094_v20, %v5668_v19 }
  0x61   : > { %4736 = vmatpush3.bf16.msra.mxu0 %v4735_v23 }
  0x62   : > { %4522 = vmatprep.subr.mxu0 %v5115_v50 }
  0x64   : > { %972 = vmatmul.mubr.f32.vlgmr.msra.gmra.mrb[2].mxu0 %v658_v24 }
  0x65   : > { %4524 = vmatprep.mubr.msk.f32.mxu0 %vm5116_vm2, %v5115_v50 }
 0x117   : > { %v4264_v25 = vpop.f32.mrb[0].mxu0 }
 0x118   : > { %v4265_v27 = vpop.f32.mrb[1].mxu0 }
 0x119   : > { %v4299_v28 = vpop.f32.mrb[0].mxu1  ;;  %v4266_v29 = vadd.f32 %v4265_v27, %v4264_v25  ;;  %v5686_v25 = vsub.s32 1, %v1097_v18 }
 0x11a   : > { %v4300_v30 = vpop.f32.mrb[1].mxu1 }
 0x11b   : > { %v4301_v31 = vadd.f32 %v4300_v30, %v4299_v28  ;;  %v834_v32 = vadd.f32 %v4266_v29, %v758_v26  ;;  %v1103_v26 = vrot.slane %v1094_v20, %v5686_v25  ;;  %v1183_v20 = vld [vmem:[%s6529_s7 + $0x10] sm:$0xff] }
 0x11d   : > { %v1043_v33 = vpop.f32.mrb[2].mxu1  ;;  %v904_v34 = vadd.f32 %v4301_v31, %v834_v32 }
 0x11e   : > { %v4504_v35 = vpop.f32.mrb[3].mxu1 }
 0x137   : > { %v4334_v36 = vpop.f32.mrb[2].mxu0 }
 0x138   : > { %v4335_v37 = vpop.f32.mrb[3].mxu0 }
 0x139   : > { %v4336_v38 = vadd.f32 %v4335_v37, %v4334_v36 }
 0x13b   : > { %v974_v39 = vadd.f32 %v4336_v38, %v904_v34 }
 0x13d   : > { %v5604_v40 = vadd.f32 %v1043_v33, %v974_v39 }
 0x13f   : > { %v1050_v41 = vsel %vm1049_vm3, %v5604_v40, 0.0 }
 0x140   : > { %1051 = vadd.xlane.f32.xlu0 %v1050_v41 }
 0x1cd   : > { %v1052_v42 = vpop.xlane.xlu0 %1051 }
 0x1ce   : > { %v1054_v43 = vmul.f32 0.015625, %v1052_v42 }
 0x1d0   : > { %v1055_v44 = vsub.f32 %v5604_v40, %v1054_v43 }
 0x1d2   : > { %v1056_v45 = vmul.f32 %v1055_v44, %v1055_v44 }
 0x1d4   : > { %v1057_v46 = vsel %vm1049_vm3, %v1056_v45, 0.0 }
 0x1d5   : > { %1058 = vadd.xlane.f32.xlu0 %v1057_v46 }
 0x262   : > { %v1059_v8 = vpop.xlane.xlu0 %1058 }
 0x263   : > { %v1060_v9 = vmul.f32 0.015625, %v1059_v8 }
 0x265   : > { %v1061_v10 = vadd.f32 1e-06, %v1060_v9 }
 0x267   : > { %5001 = vrsqrt.f32 %v1061_v10 }
 0x271   : > { %v5002_v11 = vpop.eup %5001 }
 0x272   : > { %v1063_v13 = vmul.f32 %v5002_v11, %v1055_v44 }
 0x274   : > { %v1070_v15 = vmul.f32 %v4090_v12, %v1063_v13 }
 0x276   : > { %v1077_v16 = vadd.f32 %v4091_v14, %v1070_v15 }
 0x278   : > { %4092 = vmatmul.mubr.msk.f32.vlgmr.msra.gmra.mrb[4].mxu1 %vm1106_vm4, %v1077_v16 }
 0x279   : > { %4507 = vmatprep.mubr.msk.f32.mxu1 %vm5116_vm2, %v5115_v50 }
 0x34b   : > { %v1176_v22 = vpop.f32.mrb[4].mxu1 }
 0x34c   : > { %v5674_v23 = vadd.f32 %v1176_v22, %v1099_v21  ;;  %v1178_v24 = vpop.f32.mrb[5].mxu1  ;;  %v1184_v21 = vld [vmem:[%s6529_s7 + $0x18] sm:$0xff] }
 0x34d   : > { %v5691_v28 = vadd.f32 %v1178_v24, %v1103_v26  ;;  %v4757_v22 = vpack.c.bf16 %v1184_v21, %v1183_v20 }
 0x34e   : > { %1439 = vrot.lane.b32.xlu0 %v5674_v23, %s6562_s0  ;;  %1198 = vrot.lane.b32.xlu1 %v5674_v23, %s6564_s23 }
 0x352   : > { %1441 = vrot.lane.b32.xlu1 %v5674_v23, %s6560_s26  ;;  %s6594_s26 = smov 96  }
 0x356   : > { %1681 = vrot.lane.b32.xlu1 %v5674_v23, %s6561_s21 }
 0x35a   : > { %1679 = vrot.lane.b32.xlu1 %v5674_v23, %s6558_s4 }
 0x3c0   : > { %v1199_v27 = vpop.permute.xlu1 %1198  ;;  %v1440_v30 = vpop.permute.xlu0 %1439 }
 0x3c1   : > { %4506 = vmatpush3.xpose.msk.msra.mxu1 %vm1200_vm5, %v1199_v27 }
 0x3c2   : > { %4510 = vmatprep.subr.mxu1 %v5115_v50 }
 0x3c4   : > { %4508 = vmatmul.mubr.msk.f32.vlgmr.msra.gmra.mrb[6].mxu1 %vm1200_vm5, %v5674_v23  ;;  %v1442_v29 = vpop.permute.xlu1 %1441 }
 0x3c5   : > { %4511 = vmatpush3.msk.msra.mxu1 %vm1291_vm6, %v5691_v28  ;;  %4523 = vmatpush3.xpose.msk.msra.mxu0 %vm1200_vm5, %v1442_v29 }
 0x3c6   : > { %4539 = vmatprep.subr.mxu0 %v5115_v50  ;;  %4512 = vmatprep.mubr.msk.f32.mxu1 %vm5116_vm2, %v5115_v50 }
 0x3c7   : > { %4753 = vmatprep.subr.bf16.mxu1 %v5124_v60 }
 0x3c8   : > { %4525 = vmatmul.mubr.msk.f32.vlgmr.msra.gmra.mrb[4].mxu0 %vm1200_vm5, %v1440_v30  ;;  %v1682_v31 = vpop.permute.xlu1 %1681  ;;  %v1185_v30 = vld [vmem:[%s6529_s7 + $0x20] sm:$0xff] }
 0x3c9   : > { %4540 = vmatpush3.xpose.msk.msra.mxu0 %vm1200_vm5, %v1682_v31  ;;  %4541 = vmatprep.mubr.msk.f32.mxu0 %vm5116_vm2, %v5115_v50  ;;  %v1186_v31 = vld [vmem:[%s6529_s7 + $0x28] sm:$0xff] }
 0x3ca   : > { %4544 = vmatprep.subr.mxu0 %v5115_v50 }
 0x3cc   : > { %v1680_v32 = vpop.permute.xlu1 %1679 }
 0x3cd   : > { %4542 = vmatmul.mubr.msk.f32.vlgmr.msra.gmra.mrb[6].mxu0 %vm1200_vm5, %v1680_v32  ;;  %v4760_v32 = vpack.c.bf16 %v1186_v31, %v1185_v30  ;;  %v4115_v30 = vld [vmem:[%s6532_s10] ss:$0 sm:$0xff]  ;;  %v2318_v31 = vld [vmem:[%s6535_s13 + $0x90] sm:$0xff] }
 0x3ce   : > { %4546 = vmatprep.mubr.msk.f32.mxu0 %vm5116_vm2, %v5115_v50 }
 0x497   : > { %v1271_v33 = vpop.f32.mrb[6].mxu1 }
 0x498   : > { %v4509_v34 = vpop.f32.mrb[7].mxu1  ;;  %v1276_v35 = vsel %vm1275_vm7, %v1271_v33, -inf }
 0x499   : > { %1277 = vmax.xlane.f32.xlu1 %v1276_v35 }
 0x49b   : > { %v1513_v36 = vpop.f32.mrb[4].mxu0 }
 0x49c   : > { %v4526_v37 = vpop.f32.mrb[5].mxu0  ;;  %v1517_v53 = vsel %vm1275_vm7, %v1513_v36, -inf }
 0x49d   : > { %v1188_v37 = vld [vmem:[%s6529_s7 + $0x38] sm:$0xff] }
 0x4a0   : > { %v1753_v38 = vpop.f32.mrb[6].mxu0 }
 0x4a1   : > { %v4543_v39 = vpop.f32.mrb[7].mxu0  ;;  %v1757_v41 = vsel %vm1275_vm7, %v1753_v38, -inf }
 0x4a2   : > { %1758 = vmax.xlane.f32.xlu0 %v1757_v41 }
 0x4b8   : > { %1921 = vrot.lane.b32.xlu0 %v5674_v23, %s6555_s28  ;;  %s6596_s28 = smov 16  }
 0x526   : > { %v1278_v42 = vpop.xlane.xlu1 %1277 }
 0x527   : > { %v1279_v43 = vsub.f32 %v1271_v33, %v1278_v42 }
 0x529   : > { %v1280_v44 = vmul.f32 1.442695, %v1279_v43 }
 0x52b   : > { %5003 = vpow2.f32 %v1280_v44  ;;  %v4093_v44 = vld [vmem:[%s6530_s8] ss:$0 sm:$0xff] }
 0x52f   : > { %v1759_v47 = vpop.xlane.xlu0 %1758 }
 0x530   : > { %v1760_v48 = vsub.f32 %v1753_v38, %v1759_v47 }
 0x532   : > { %v1761_v49 = vmul.f32 1.442695, %v1760_v48 }
 0x533   : > { %v1922_v1 = vpop.permute.xlu0 %1921 }
 0x534   : > { %5005 = vpow2.f32 %v1761_v49 }
 0x535   : > { %v5004_v45 = vpop.eup %5003 }
 0x536   : > { %v1282_v46 = vsel %vm1275_vm7, %v5004_v45, 0.0 }
 0x537   : > { %1283 = vadd.xlane.f32.xlu1 %v1282_v46 }
 0x53e   : > { %v5006_v51 = vpop.eup %5005 }
 0x53f   : > { %v1763_v52 = vsel %vm1275_vm7, %v5006_v51, 0.0 }
 0x548   : > { %1768 = vrot.lane.b32.xlu1 %v5691_v28, %s6558_s4  ;;  %s6591_s4 = smov 112  }
 0x56c   : > { %1764 = vadd.xlane.f32.xlu1 %v1763_v52 }
 0x57d   : > { %1919 = vrot.lane.b32.xlu1 %v5674_v23, %s6556_s2 }
 0x5a1   : > { %1518 = vmax.xlane.f32.xlu1 %v1517_v53 }
 0x5c4   : > { %v1284_v54 = vpop.xlane.xlu1 %1283 }
 0x5c5   : > { %5007 = vrcp.f32 %v1284_v54 }
 0x5c8   : > { %v1769_v55 = vpop.permute.xlu1 %1768 }
 0x5c9   : > { %4545 = vmatpush3.msk.msra.mxu0 %vm1291_vm6, %v1769_v55 }
 0x5ca   : > { %4556 = vmatprep.subr.mxu0 %v5115_v50 }
 0x5cf   : > { %v5008_v56 = vpop.eup %5007 }
 0x5d0   : > { %v1286_v57 = vmul.f32 %v5008_v56, %v5004_v45  ;;  %v1196_v45 = vadd.f32 %v4093_v44, %v5604_v40  ;;  %v2189_v40 = vld [vmem:[%s6533_s11 + $0x8] sm:$0xff]  ;;  %v2191_v56 = vld [vmem:[%s6533_s11 + $0x18] sm:$0xff] }
 0x5d1   : > { %v2305_v44 = vld [vmem:[%s6535_s13 + $0x28] sm:$0xff] }
 0x5d2   : > { %4513 = vmatmul.mubr.msk.f32.vlgmr.msra.gmra.mrb[8].mxu1 %vm1287_vm8, %v1286_v57  ;;  %v4765_v57 = vpack.c.bf16 %v2191_v56, %v2189_v40  ;;  %v2308_v56 = vld [vmem:[%s6535_s13 + $0x40] sm:$0xff] }
 0x5d3   : > { %4519 = vmatprep.mubr.msk.f32.mxu1 %vm5116_vm2, %v5115_v50  ;;  %4755 = vmatpush3.bf16.msra.mxu1 %v4754_v61  ;;  %v4767_v61 = vpack.c.bf16 %v2190_v59, %v2188_v58  ;;  %v2326_v59 = vld [vmem:[%s6535_s13 + $0xd0] sm:$0xff] }
 0x5d4   : > { %4527 = vmatprep.subr.mxu1 %v5115_v50 }
 0x5f9   : > { %v1765_v62 = vpop.xlane.xlu1 %1764 }
 0x5fa   : > { %5009 = vrcp.f32 %v1765_v62  ;;  %v2193_v62 = vld [vmem:[%s6533_s11 + $0x28] sm:$0xff] }
 0x5fd   : > { %v1920_v2 = vpop.permute.xlu1 %1919 }
 0x604   : > { %v5010_v63 = vpop.eup %5009 }
 0x605   : > { %v1767_v0 = vmul.f32 %v5010_v63, %v5006_v51  ;;  %v2195_v63 = vld [vmem:[%s6533_s11 + $0x38] sm:$0xff] }
 0x607   : > { %4547 = vmatmul.mubr.msk.f32.vlgmr.msra.gmra.mrb[8].mxu0 %vm1287_vm8, %v1767_v0  ;;  %v4769_v0 = vpack.c.bf16 %v2195_v63, %v2193_v62  ;;  %v2310_v63 = vld [vmem:[%s6535_s13 + $0x50] sm:$0xff] }
 0x608   : > { %4557 = vmatpush3.xpose.msk.msra.mxu0 %vm1200_vm5, %v1922_v1  ;;  %4558 = vmatprep.mubr.msk.f32.mxu0 %vm5116_vm2, %v5115_v50  ;;  %v2192_v1 = vld [vmem:[%s6533_s11 + $0x20] sm:$0xff] }
 0x60b   : > { %4559 = vmatmul.mubr.msk.f32.vlgmr.msra.gmra.mrb[10].mxu0 %vm1200_vm5, %v1920_v2  ;;  %v2194_v2 = vld [vmem:[%s6533_s11 + $0x30] sm:$0xff] }
 0x60c   : > { %2538 = vmatprep.mubr.f32.mxu0 %v5115_v50 }
 0x62e   : > { %v1519_v3 = vpop.xlane.xlu1 %1518 }
 0x62f   : > { %v1520_v4 = vsub.f32 %v1513_v36, %v1519_v3  ;;  %v1187_v36 = vld [vmem:[%s6529_s7 + $0x30] sm:$0xff]  ;;  %v4771_v3 = vpack.c.bf16 %v2194_v2, %v2192_v1  ;;  %v2328_v2 = vld [vmem:[%s6535_s13 + $0xe0] sm:$0xff] }
 0x630   : > { %v4763_v39 = vpack.c.bf16 %v1188_v37, %v1187_v36  ;;  %v2302_v36 = vld [vmem:[%s6535_s13 + $0x10] sm:$0xff]  ;;  %v2303_v37 = vld [vmem:[%s6535_s13 + $0x18] sm:$0xff] }
 0x631   : > { %v1521_v5 = vmul.f32 1.442695, %v1520_v4  ;;  %v2197_v4 = vld [vmem:[%s6533_s11 + $0x48] sm:$0xff] }
 0x633   : > { %5011 = vpow2.f32 %v1521_v5  ;;  %v2199_v5 = vld [vmem:[%s6533_s11 + $0x58] sm:$0xff] }
 0x63d   : > { %v5012_v6 = vpop.eup %5011 }
 0x63e   : > { %v1523_v7 = vsel %vm1275_vm7, %v5012_v6, 0.0 }
 0x63f   : > { %1524 = vadd.xlane.f32.xlu0 %v1523_v7  ;;  %v2196_v7 = vld [vmem:[%s6533_s11 + $0x40] sm:$0xff] }
 0x655   : > { %1528 = vrot.lane.b32.xlu0 %v5691_v28, %s6562_s0 }
 0x6a5   : > { %v1361_v8 = vpop.f32.mrb[8].mxu1 }
 0x6a6   : > { %v4514_v9 = vpop.f32.mrb[9].mxu1  ;;  %4520 = vmatmul.mubr.msk.f32.vlgmr.msra.gmra.mrb[10].mxu1 %vm1200_vm5, %v1361_v8  ;;  %v2198_v8 = vld [vmem:[%s6533_s11 + $0x50] sm:$0xff] }
 0x6a7   : > { %4529 = vmatprep.mubr.msk.f32.mxu1 %vm5116_vm2, %v5115_v50  ;;  %v4775_v9 = vpack.c.bf16 %v2198_v8, %v2196_v7  ;;  %v2330_v8 = vld [vmem:[%s6535_s13 + $0xf0] sm:$0xff] }
 0x6cc   : > { %v1525_v10 = vpop.xlane.xlu0 %1524 }
 0x6cd   : > { %5013 = vrcp.f32 %v1525_v10  ;;  %v2201_v10 = vld [vmem:[%s6533_s11 + $0x68] sm:$0xff] }
 0x6d0   : > { %v1529_v11 = vpop.permute.xlu0 %1528 }
 0x6d1   : > { %4528 = vmatpush3.msk.msra.mxu1 %vm1291_vm6, %v1529_v11  ;;  %v2203_v11 = vld [vmem:[%s6533_s11 + $0x78] sm:$0xff] }
 0x6d2   : > { %4756 = vmatprep.subr.bf16.mxu1 %v5124_v60 }
 0x6d7   : > { %v5014_v12 = vpop.eup %5013 }
 0x6d8   : > { %v1527_v13 = vmul.f32 %v5014_v12, %v5012_v6  ;;  %v4773_v6 = vpack.c.bf16 %v2199_v5, %v2197_v4  ;;  %v2200_v12 = vld [vmem:[%s6533_s11 + $0x60] sm:$0xff] }
 0x6d9   : > { %v2312_v5 = vld [vmem:[%s6535_s13 + $0x60] sm:$0xff] }
 0x6da   : > { %4530 = vmatmul.mubr.msk.f32.vlgmr.msra.gmra.mrb[12].mxu1 %vm1287_vm8, %v1527_v13  ;;  %v1841_v14 = vpop.f32.mrb[8].mxu0  ;;  %v4777_v13 = vpack.c.bf16 %v2203_v11, %v2201_v10  ;;  %v2314_v11 = vld [vmem:[%s6535_s13 + $0x70] sm:$0xff] }
 0x6db   : > { %v4548_v15 = vpop.f32.mrb[9].mxu0  ;;  %4536 = vmatprep.mubr.msk.f32.mxu1 %vm5116_vm2, %v5115_v50  ;;  %4758 = vmatpush3.bf16.msra.mxu1 %v4757_v22 }
 0x6dc   : > { %4759 = vmatprep.subr.bf16.mxu1 %v5124_v60 }
 0x6de   : > { %v1993_v16 = vpop.f32.mrb[10].mxu0 }
 0x6df   : > { %v4560_v17 = vpop.f32.mrb[11].mxu0  ;;  %v1997_v18 = vsel %vm1275_vm7, %v1993_v16, -inf }
 0x6e0   : > { %1998 = vmax.xlane.f32.xlu1 %v1997_v18  ;;  %v2317_v17 = vld [vmem:[%s6535_s13 + $0x88] sm:$0xff] }
 0x76d   : > { %v1999_v23 = vpop.xlane.xlu1 %1998 }
 0x76e   : > { %v2000_v24 = vsub.f32 %v1993_v16, %v1999_v23  ;;  %v2316_v16 = vld [vmem:[%s6535_s13 + $0x80] sm:$0xff] }
 0x76f   : > { %v4781_v18 = vpack.c.bf16 %v2317_v17, %v2316_v16 }
 0x770   : > { %v2001_v26 = vmul.f32 1.442695, %v2000_v24  ;;  %v4114_v24 = vld [vmem:[%s6531_s9] ss:$0 sm:$0xff] }
 0x772   : > { %5015 = vpow2.f32 %v2001_v26 }
 0x77c   : > { %v5016_v27 = vpop.eup %5015 }
 0x77d   : > { %v2003_v29 = vsel %vm1275_vm7, %v5016_v27, 0.0 }
 0x77e   : > { %2004 = vadd.xlane.f32.xlu1 %v2003_v29  ;;  %v2301_v29 = vld [vmem:[%s6535_s13 + $0x8] sm:$0xff] }
 0x78f   : > { %2008 = vrot.lane.b32.xlu1 %v5691_v28, %s6556_s2  ;;  %s6593_s2 = smov 48  }
 0x7ad   : > { %v1601_v33 = vpop.f32.mrb[12].mxu1 }
 0x7ae   : > { %v4531_v34 = vpop.f32.mrb[13].mxu1  ;;  %4537 = vmatmul.mubr.msk.f32.vlgmr.msra.gmra.mrb[10].mxu1 %vm1200_vm5, %v1601_v33 }
 0x7af   : > { %4761 = vmatpush3.bf16.msra.mxu1 %v4760_v32  ;;  %4553 = vmatprep.mubr.msk.f32.mxu1 %vm5116_vm2, %v5115_v50  ;;  %v2319_v32 = vld [vmem:[%s6535_s13 + $0x98] sm:$0xff] }
 0x7b0   : > { %4561 = vmatprep.subr.mxu1 %v5115_v50 }
 0x7b6   : > { %4554 = vmatmul.mubr.msk.f32.vlgmr.msra.gmra.mrb[10].mxu1 %vm1200_vm5, %v1841_v14  ;;  %v2202_v14 = vld [vmem:[%s6533_s11 + $0x70] sm:$0xff] }
 0x7b7   : > { %4563 = vmatprep.mubr.msk.f32.mxu1 %vm5116_vm2, %v5115_v50  ;;  %v4779_v15 = vpack.c.bf16 %v2202_v14, %v2200_v12  ;;  %v2315_v12 = vld [vmem:[%s6535_s13 + $0x78] sm:$0xff]  ;;  %v2204_v14 = vld [vmem:[%s6534_s12] sm:$0x3] }
 0x7b8   : > { %v2213_v16 = vrot.slane %v2204_v14, %v5686_v25 }
 0x80b   : > { %v2005_v28 = vpop.xlane.xlu1 %2004 }
 0x80c   : > { %5017 = vrcp.f32 %v2005_v28 }
 0x80f   : > { %v2009_v35 = vpop.permute.xlu1 %2008 }
 0x810   : > { %4562 = vmatpush3.msk.msra.mxu1 %vm1291_vm6, %v2009_v35  ;;  %v4785_v35 = vpack.c.bf16 %v2319_v32, %v2318_v31 }
 0x811   : > { %4762 = vmatprep.subr.bf16.mxu1 %v5124_v60 }
 0x816   : > { %v5018_v38 = vpop.eup %5017 }
 0x817   : > { %v2007_v41 = vmul.f32 %v5018_v38, %v5016_v27  ;;  %v2300_v27 = vld [vmem:[%s6535_s13] sm:$0xff] }
 0x818   : > { %v4783_v34 = vpack.c.bf16 %v2301_v29, %v2300_v27  ;;  %v2320_v38 = vld [vmem:[%s6535_s13 + $0xa0] sm:$0xff] }
 0x819   : > { %4564 = vmatmul.mubr.msk.f32.vlgmr.msra.gmra.mrb[14].mxu1 %vm1287_vm8, %v2007_v41  ;;  %v4787_v41 = vpack.c.bf16 %v2303_v37, %v2302_v36 }
 0x81a   : > { %4764 = vmatpush3.bf16.msra.mxu1 %v4763_v39  ;;  %4570 = vmatprep.mubr.msk.f32.mxu1 %vm5116_vm2, %v5115_v50  ;;  %v2321_v39 = vld [vmem:[%s6535_s13 + $0xa8] sm:$0xff] }
 0x81b   : > { %4766 = vmatprep.subr.bf16.mxu1 %v4765_v57  ;;  %v2309_v57 = vld [vmem:[%s6535_s13 + $0x48] sm:$0xff] }
 0x81c   : > { %v4799_v58 = vpack.c.bf16 %v2309_v57, %v2308_v56  ;;  %v4128_v56 = vld [vmem:[%s6586_s30 + $0xb0] sm:$0xff] }
 0x8ec   : > { %v2081_v42 = vpop.f32.mrb[14].mxu1 }
 0x8ed   : > { %v4565_v43 = vpop.f32.mrb[15].mxu1  ;;  %4571 = vmatmul.mubr.msk.f32.vlgmr.msra.gmra.mrb[10].mxu1 %vm1200_vm5, %v2081_v42  ;;  %v4789_v42 = vpack.c.bf16 %v2321_v39, %v2320_v38 }
 0x8ee   : > { %2283 = vmatprep.mubr.f32.mxu1 %v5115_v50  ;;  %4768 = vmatpush1.bf16.msra.mxu1 %v4767_v61  ;;  %v2304_v43 = vld [vmem:[%s6535_s13 + $0x20] sm:$0xff]  ;;  %v2327_v61 = vld [vmem:[%s6535_s13 + $0xd8] sm:$0xff] }
 0x8ef   : > { %4770 = vmatprep.subr.bf16.mxu1 %v4769_v0  ;;  %v4801_v62 = vpack.c.bf16 %v2327_v61, %v2326_v59  ;;  %v2311_v0 = vld [vmem:[%s6535_s13 + $0x58] sm:$0xff] }
 0x8f0   : > { %v4803_v1 = vpack.c.bf16 %v2311_v0, %v2310_v63  ;;  %v4133_v59 = vld [vmem:[%s6586_s30 + $0xd8] sm:$0xff]  ;;  %v4132_v63 = vld [vmem:[%s6586_s30 + $0xd0] sm:$0xff] }
 0x8f2   : > { %4772 = vmatpush1.bf16.msra.mxu1 %v4771_v3  ;;  %v2329_v3 = vld [vmem:[%s6535_s13 + $0xe8] sm:$0xff] }
 0x8f3   : > { %4774 = vmatprep.subr.bf16.mxu1 %v4773_v6  ;;  %v4805_v4 = vpack.c.bf16 %v2329_v3, %v2328_v2  ;;  %v2313_v6 = vld [vmem:[%s6535_s13 + $0x68] sm:$0xff]  ;;  %v4137_v2 = vld [vmem:[%s6586_s30 + $0xf8] sm:$0xff]  ;;  %v4134_v3 = vld [vmem:[%s6586_s30 + $0xe0] sm:$0xff] }
 0x8f4   : > { %v4807_v7 = vpack.c.bf16 %v2313_v6, %v2312_v5  ;;  %v4136_v5 = vld [vmem:[%s6586_s30 + $0xf0] sm:$0xff] }
 0x8f5   : > { %v4827_v6 = vpack.c.bf16 %v4136_v5, %v4134_v3 }
 0x8f6   : > { %4776 = vmatpush1.bf16.msra.mxu1 %v4775_v9  ;;  %v2331_v9 = vld [vmem:[%s6535_s13 + $0xf8] sm:$0xff] }
 0x8f7   : > { %4778 = vmatprep.subr.bf16.mxu1 %v4777_v13  ;;  %v4809_v10 = vpack.c.bf16 %v2331_v9, %v2330_v8  ;;  %v4811_v13 = vpack.c.bf16 %v2315_v12, %v2314_v11  ;;  %v4120_v11 = vld [vmem:[%s6587_s29 + $0x1] ss:$0 sm:$0xff] }
 0x8fa   : > { %4780 = vmatpush1.bf16.msra.mxu1 %v4779_v15  ;;  %v2209_v15 = vrot.slane %v2204_v14, %v5668_v19 }
 0x8fb   : > { %4782 = vmatprep.subr.bf16.mxu1 %v4781_v18 }
 0x9c0   : > { %v2154_v46 = vpop.f32.mrb[10].mxu1 }
 0x9c1   : > { %v5791_v47 = vadd.f32 %v2154_v46, %v1196_v45  ;;  %v4572_v48 = vpop.f32.mrb[11].mxu1  ;;  %v4791_v45 = vpack.c.bf16 %v2305_v44, %v2304_v43  ;;  %v2322_v46 = vld [vmem:[%s6535_s13 + $0xb0] sm:$0xff] }
 0x9c2   : > { %v2323_v48 = vld [vmem:[%s6535_s13 + $0xb8] sm:$0xff] }
 0x9c3   : > { %v2161_v49 = vsel %vm1049_vm3, %v5791_v47, 0.0 }
 0x9c4   : > { %2162 = vadd.xlane.f32.xlu0 %v2161_v49  ;;  %v4793_v49 = vpack.c.bf16 %v2323_v48, %v2322_v46  ;;  %v4123_v46 = vld [vmem:[%s6586_s30 + $0x88] sm:$0xff] }
 0xa51   : > { %v2163_v51 = vpop.xlane.xlu0 %2162 }
 0xa52   : > { %v2164_v52 = vmul.f32 0.015625, %v2163_v51  ;;  %v2306_v51 = vld [vmem:[%s6535_s13 + $0x30] sm:$0xff] }
 0xa54   : > { %v2165_v53 = vsub.f32 %v5791_v47, %v2164_v52  ;;  %v2307_v52 = vld [vmem:[%s6535_s13 + $0x38] sm:$0xff] }
 0xa56   : > { %v2166_v54 = vmul.f32 %v2165_v53, %v2165_v53 }
 0xa58   : > { %v2167_v55 = vsel %vm1049_vm3, %v2166_v54, 0.0  ;;  %v2324_v54 = vld [vmem:[%s6535_s13 + $0xc0] sm:$0xff] }
 0xa59   : > { %2168 = vadd.xlane.f32.xlu1 %v2167_v55  ;;  %v2325_v55 = vld [vmem:[%s6535_s13 + $0xc8] sm:$0xff] }
 0xa5a   : > { %v4797_v40 = vpack.c.bf16 %v2325_v55, %v2324_v54  ;;  %v4129_v54 = vld [vmem:[%s6586_s30 + $0xb8] sm:$0xff] }
 0xae6   : > { %v2169_v20 = vpop.xlane.xlu1 %2168 }
 0xae7   : > { %v2170_v21 = vmul.f32 0.015625, %v2169_v20 }
 0xae9   : > { %v2171_v22 = vadd.f32 1e-06, %v2170_v21 }
 0xaeb   : > { %5019 = vrsqrt.f32 %v2171_v22 }
 0xaf5   : > { %v5020_v23 = vpop.eup %5019 }
 0xaf6   : > { %v2173_v26 = vmul.f32 %v5020_v23, %v2165_v53  ;;  %v4795_v53 = vpack.c.bf16 %v2307_v52, %v2306_v51  ;;  %v4124_v51 = vld [vmem:[%s6586_s30 + $0x90] sm:$0xff] }
 0xaf8   : > { %v2180_v33 = vmul.f32 %v4114_v24, %v2173_v26 }
 0xafa   : > { %v2187_v28 = vadd.f32 %v4115_v30, %v2180_v33 }
 0xafc   : > { %4116 = vmatmul.mubr.msk.f32.vlgmr.msra.gmra.mrb[16].mxu1 %vm1106_vm4, %v2187_v28  ;;  %v4117_v28 = vld [vmem:[%s6536_s14] ss:$0 sm:$0xff] }
 0xafd   : > { %4784 = vmatpush3.bf16.msra.mxu1 %v4783_v34 }
 0xafe   : > { %4786 = vmatprep.subr.bf16.mxu1 %v4785_v35 }
 0xb01   : > { %4788 = vmatpush3.bf16.msra.mxu1 %v4787_v41 }
 0xb02   : > { %4790 = vmatprep.subr.bf16.mxu1 %v4789_v42 }
 0xb05   : > { %4792 = vmatpush3.bf16.msra.mxu1 %v4791_v45 }
 0xb06   : > { %4794 = vmatprep.subr.bf16.mxu1 %v4793_v49  ;;  %v4122_v49 = vld [vmem:[%s6586_s30 + $0x80] sm:$0xff] }
 0xb07   : > { %v4815_v52 = vpack.c.bf16 %v4124_v51, %v4122_v49 }
 0xb09   : > { %4796 = vmatpush3.bf16.msra.mxu1 %v4795_v53  ;;  %v4127_v53 = vld [vmem:[%s6586_s30 + $0xa8] sm:$0xff] }
 0xb0a   : > { %4798 = vmatprep.subr.bf16.mxu1 %v4797_v40  ;;  %v4817_v55 = vpack.c.bf16 %v4129_v54, %v4127_v53  ;;  %v4126_v40 = vld [vmem:[%s6586_s30 + $0xa0] sm:$0xff] }
 0xb0b   : > { %v4819_v57 = vpack.c.bf16 %v4128_v56, %v4126_v40 }
 0xb0d   : > { %4800 = vmatpush3.bf16.msra.mxu1 %v4799_v58  ;;  %v4131_v58 = vld [vmem:[%s6586_s30 + $0xc8] sm:$0xff] }
 0xb0e   : > { %4802 = vmatprep.subr.bf16.mxu1 %v4801_v62  ;;  %v4821_v61 = vpack.c.bf16 %v4133_v59, %v4131_v58  ;;  %v4130_v62 = vld [vmem:[%s6586_s30 + $0xc0] sm:$0xff] }
 0xb0f   : > { %v4823_v0 = vpack.c.bf16 %v4132_v63, %v4130_v62 }
 0xb11   : > { %4804 = vmatpush3.bf16.msra.mxu1 %v4803_v1  ;;  %v4135_v1 = vld [vmem:[%s6586_s30 + $0xe8] sm:$0xff] }
 0xb12   : > { %4806 = vmatprep.subr.bf16.mxu1 %v4805_v4  ;;  %v4825_v4 = vpack.c.bf16 %v4137_v2, %v4135_v1 }
 0xb15   : > { %4808 = vmatpush3.bf16.msra.mxu1 %v4807_v7 }
 0xb16   : > { %4810 = vmatprep.subr.bf16.mxu1 %v4809_v10 }
 0xb19   : > { %4812 = vmatpush3.bf16.msra.mxu1 %v4811_v13  ;;  %v4121_v13 = vld [vmem:[%s6588_s22 + $0x1] ss:$0 sm:$0xff] }
 0xb1a   : > { %4829 = vmatprep.subr.bf16.mxu1 %v5124_v60 }
 0xbcf   : > { %v2285_v17 = vpop.f32.mrb[16].mxu1 }
 0xbd0   : > { %v2286_v18 = vadd.f32 %v2285_v17, %v2209_v15  ;;  %v2287_v20 = vpop.f32.mrb[17].mxu1 }
 0xbd1   : > { %v2288_v21 = vadd.f32 %v2287_v20, %v2213_v16  ;;  %v4138_v16 = vld [vmem:[%s6589_s6 + $0x2] sm:$0x3] }
 0xbd2   : > { %v2292_v22 = vmul.f32 0.70710677, %v2286_v18  ;;  %v2290_v31 = vmul.f32 0.5, %v2286_v18  ;;  %v2464_v17 = vrot.slane %v4138_v16, %v5668_v19 }
 0xbd3   : > { %v2293_v23 = vmul.f32 0.70710677, %v2288_v21  ;;  %v2291_v29 = vmul.f32 0.5, %v2288_v21 }
 0xbd4   : > { %5021 = verf.f32 %v2292_v22  ;;  %v2468_v22 = vrot.slane %v4138_v16, %v5686_v25  ;;  %v4142_v16 = vld [vmem:[%s6529_s7 + $0x50] sm:$0xff] }
 0xbd5   : > { %5023 = verf.f32 %v2293_v23 }
 0xbde   : > { %v5022_v24 = vpop.eup %5021 }
 0xbdf   : > { %v5024_v26 = vpop.eup %5023  ;;  %v2296_v27 = vadd.f32 1.0, %v5022_v24 }
 0xbe0   : > { %v2297_v30 = vadd.f32 1.0, %v5024_v26 }
 0xbe1   : > { %v2298_v33 = vmul.f32 %v2296_v27, %v2290_v31 }
 0xbe2   : > { %v2299_v32 = vmul.f32 %v2297_v30, %v2291_v29 }
 0xbe4   : > { %2403 = vmatprep.mubr.f32.mxu1 %v2299_v32 }
 0xbe5   : > { %2404 = vmatmul.mubr.f32.vlgmr.msra.gmra.mrb[18].mxu1 %v2298_v33 }
 0xbe6   : > { %4587 = vmatprep.mubr.msk.f32.mxu1 %vm5116_vm2, %v5115_v50 }
 0xcb8   : > { %v4399_v34 = vpop.f32.mrb[18].mxu1 }
 0xcb9   : > { %v4400_v35 = vpop.f32.mrb[19].mxu1 }
 0xcba   : > { %v4401_v36 = vadd.f32 %v4400_v35, %v4399_v34  ;;  %v4141_v35 = vld [vmem:[%s6529_s7 + $0x48] sm:$0xff] }
 0xcbc   : > { %v2406_v37 = vadd.f32 %v4401_v36, %v4117_v28  ;;  %v4140_v28 = vld [vmem:[%s6529_s7 + $0x40] sm:$0xff] }
 0xcbd   : > { %v4830_v36 = vpack.c.bf16 %v4141_v35, %v4140_v28  ;;  %v4147_v28 = vld [vmem:[%s6529_s7 + $0x78] sm:$0xff] }
 0xcbe   : > { %v5960_v38 = vadd.f32 %v5791_v47, %v2406_v37  ;;  %v4125_v47 = vld [vmem:[%s6586_s30 + $0x98] sm:$0xff] }
 0xcbf   : > { %v4813_v48 = vpack.c.bf16 %v4125_v47, %v4123_v46  ;;  %4831 = vmatpush3.bf16.msra.mxu1 %v4830_v36 }
 0xcc0   : > { %v2414_v39 = vsel %vm1049_vm3, %v5960_v38, 0.0  ;;  %4595 = vmatprep.subr.mxu1 %v5115_v50 }
 0xcc1   : > { %2415 = vadd.xlane.f32.xlu0 %v2414_v39  ;;  %4814 = vmatprep.subr.bf16.mxu0 %v4813_v48 }
 0xcc2   : > { %4816 = vmatpush1.bf16.msra.mxu0 %v4815_v52 }
 0xcc3   : > { %4818 = vmatprep.subr.bf16.mxu0 %v4817_v55 }
 0xcc6   : > { %4820 = vmatpush1.bf16.msra.mxu0 %v4819_v57 }
 0xcc7   : > { %4822 = vmatprep.subr.bf16.mxu0 %v4821_v61 }
 0xcca   : > { %4824 = vmatpush1.bf16.msra.mxu0 %v4823_v0 }
 0xccb   : > { %4826 = vmatprep.subr.bf16.mxu0 %v4825_v4 }
 0xcce   : > { %4828 = vmatpush1.bf16.msra.mxu0 %v4827_v6 }
 0xccf   : > { %4573 = vmatprep.subr.mxu0 %v5115_v50 }
 0xd4e   : > { %v2416_v41 = vpop.xlane.xlu0 %2415 }
 0xd4f   : > { %v2417_v42 = vmul.f32 0.015625, %v2416_v41 }
 0xd51   : > { %v2418_v43 = vsub.f32 %v5960_v38, %v2417_v42 }
 0xd53   : > { %v2419_v44 = vmul.f32 %v2418_v43, %v2418_v43 }
 0xd55   : > { %v2420_v45 = vsel %vm1049_vm3, %v2419_v44, 0.0 }
 0xd56   : > { %2421 = vadd.xlane.f32.xlu0 %v2420_v45 }
 0xde3   : > { %v2422_v7 = vpop.xlane.xlu0 %2421 }
 0xde4   : > { %v2423_v8 = vmul.f32 0.015625, %v2422_v7 }
 0xde6   : > { %v2424_v9 = vadd.f32 1e-06, %v2423_v8 }
 0xde8   : > { %5025 = vrsqrt.f32 %v2424_v9 }
 0xdf2   : > { %v5026_v10 = vpop.eup %5025 }
 0xdf3   : > { %v2426_v12 = vmul.f32 %v5026_v10, %v2418_v43 }
 0xdf5   : > { %v2433_v14 = vmul.f32 %v4120_v11, %v2426_v12 }
 0xdf7   : > { %v2440_v15 = vadd.f32 %v4121_v13, %v2433_v14 }
 0xdf9   : > { %4139 = vmatmul.mubr.msk.f32.vlgmr.msra.gmra.mrb[12].mxu0 %vm1106_vm4, %v2440_v15 }
 0xdfa   : > { %4575 = vmatprep.mubr.msk.f32.mxu0 %vm5116_vm2, %v5115_v50 }
 0xecc   : > { %v2540_v18 = vpop.f32.mrb[12].mxu0 }
 0xecd   : > { %v6028_v20 = vadd.f32 %v2540_v18, %v2464_v17  ;;  %v2542_v21 = vpop.f32.mrb[13].mxu0  ;;  %v4143_v17 = vld [vmem:[%s6529_s7 + $0x58] sm:$0xff] }
 0xece   : > { %v6039_v24 = vadd.f32 %v2542_v21, %v2468_v22  ;;  %v4833_v18 = vpack.c.bf16 %v4143_v17, %v4142_v16  ;;  %v4193_v16 = vld [vmem:[%s6535_s13 + $0x108] sm:$0xff]  ;;  %v4210_v17 = vld [vmem:[%s6535_s13 + $0x190] sm:$0xff] }
 0xecf   : > { %2564 = vrot.lane.b32.xlu0 %v6028_v20, %s6590_s1  ;;  %s647_s1 = sand.u32 1, %s5105_s25  }
 0xed0   : > { %s648_s21 = scalar_lea.vmem [#allocation2], %s647_s1  ;;  %s4016_s6 = scalar_lea.sflag [#allocation3], %s647_s1 }
 0xed1   : > { %s4028_s0 = sshll.u32 %s648_s21, 4  ;;  %s6482_s0 = int_to_ptr.vmem [resolvable:$true] %s4028_s0 }
 0xed3   : > { %2801 = vrot.lane.b32.xlu0 %v6028_v20, %s6591_s4 }
 0xed7   : > { %3043 = vrot.lane.b32.xlu0 %v6028_v20, %s6592_s24 }
 0xf41   : > { %v2565_v23 = vpop.permute.xlu0 %2564 }
 0xf42   : > { %4574 = vmatpush3.xpose.msk.msra.mxu0 %vm1200_vm5, %v2565_v23 }
 0xf43   : > { %4578 = vmatprep.subr.mxu0 %v5115_v50 }
 0xf45   : > { %4576 = vmatmul.mubr.msk.f32.vlgmr.msra.gmra.mrb[14].mxu0 %vm1200_vm5, %v6028_v20  ;;  %v2802_v42 = vpop.permute.xlu0 %2801 }
 0xf46   : > { %4579 = vmatpush3.msk.msra.mxu0 %vm1291_vm6, %v6039_v24  ;;  %4580 = vmatprep.mubr.msk.f32.mxu0 %vm5116_vm2, %v5115_v50 }
 0xf47   : > { %4590 = vmatprep.subr.mxu0 %v5115_v50 }
 0xf49   : > { %v3044_v44 = vpop.permute.xlu0 %3043 }
0x1018   : > { %v2636_v26 = vpop.f32.mrb[14].mxu0 }
0x1019   : > { %v4577_v27 = vpop.f32.mrb[15].mxu0  ;;  %v2640_v29 = vsel %vm1275_vm7, %v2636_v26, -inf }
0x101a   : > { %2641 = vmax.xlane.f32.xlu1 %v2640_v29  ;;  %v4144_v27 = vld [vmem:[%s6529_s7 + $0x60] sm:$0xff]  ;;  %v4145_v29 = vld [vmem:[%s6529_s7 + $0x68] sm:$0xff] }
0x102b   : > { %2803 = vrot.lane.b32.xlu1 %v6028_v20, %s6593_s2  ;;  %s6597_s2 = sld [smem:[#allocation18_spill]] }
0x10a7   : > { %v2642_v30 = vpop.xlane.xlu1 %2641 }
0x10a8   : > { %v2643_v31 = vsub.f32 %v2636_v26, %v2642_v30  ;;  %v4836_v30 = vpack.c.bf16 %v4145_v29, %v4144_v27  ;;  %v4213_v27 = vld [vmem:[%s6535_s13 + $0x1a8] sm:$0xff] }
0x10aa   : > { %v2644_v32 = vmul.f32 1.442695, %v2643_v31 }
0x10ab   : > { %v2804_v37 = vpop.permute.xlu1 %2803 }
0x10ac   : > { %5027 = vpow2.f32 %v2644_v32 }
0x10b6   : > { %v5028_v33 = vpop.eup %5027 }
0x10b7   : > { %v2646_v34 = vsel %vm1275_vm7, %v5028_v33, 0.0 }
0x10b8   : > { %2647 = vadd.xlane.f32.xlu1 %v2646_v34  ;;  %v4146_v34 = vld [vmem:[%s6529_s7 + $0x70] sm:$0xff] }
0x10b9   : > { %v4839_v36 = vpack.c.bf16 %v4147_v28, %v4146_v34 }
0x10c9   : > { %3041 = vrot.lane.b32.xlu1 %v6028_v20, %s6594_s26 }
0x1145   : > { %v2648_v39 = vpop.xlane.xlu1 %2647 }
0x1146   : > { %5029 = vrcp.f32 %v2648_v39 }
0x1149   : > { %v3042_v45 = vpop.permute.xlu1 %3041 }
0x1150   : > { %v5030_v41 = vpop.eup %5029 }
0x1151   : > { %v2650_v43 = vmul.f32 %v5030_v41, %v5028_v33 }
0x1153   : > { %4581 = vmatmul.mubr.msk.f32.vlgmr.msra.gmra.mrb[16].mxu0 %vm1287_vm8, %v2650_v43 }
0x1154   : > { %4591 = vmatpush3.xpose.msk.msra.mxu0 %vm1200_vm5, %v2804_v37  ;;  %4592 = vmatprep.mubr.msk.f32.mxu0 %vm5116_vm2, %v5115_v50 }
0x1155   : > { %4607 = vmatprep.subr.mxu0 %v5115_v50 }
0x1157   : > { %4593 = vmatmul.mubr.msk.f32.vlgmr.msra.gmra.mrb[18].mxu0 %vm1200_vm5, %v2802_v42 }
0x1158   : > { %4608 = vmatpush3.xpose.msk.msra.mxu0 %vm1200_vm5, %v3044_v44  ;;  %4609 = vmatprep.mubr.msk.f32.mxu0 %vm5116_vm2, %v5115_v50 }
0x1159   : > { %4612 = vmatprep.subr.mxu0 %v5115_v50 }
0x115b   : > { %4610 = vmatmul.mubr.msk.f32.vlgmr.msra.gmra.mrb[20].mxu0 %vm1200_vm5, %v3042_v45 }
0x115c   : > { %4614 = vmatprep.mubr.msk.f32.mxu0 %vm5116_vm2, %v5115_v50 }
0x1226   : > { %v2723_v46 = vpop.f32.mrb[16].mxu0 }
0x1227   : > { %v4582_v47 = vpop.f32.mrb[17].mxu0  ;;  %4588 = vmatmul.mubr.msk.f32.vlgmr.msra.gmra.mrb[20].mxu1 %vm1200_vm5, %v2723_v46 }
0x1228   : > { %4597 = vmatprep.mubr.msk.f32.mxu1 %vm5116_vm2, %v5115_v50 }
0x122a   : > { %v2875_v48 = vpop.f32.mrb[18].mxu0 }
0x122b   : > { %v4594_v49 = vpop.f32.mrb[19].mxu0  ;;  %v2879_v59 = vsel %vm1275_vm7, %v2875_v48, -inf }
0x122e   : > { %v3115_v51 = vpop.f32.mrb[20].mxu0 }
0x122f   : > { %v4611_v52 = vpop.f32.mrb[21].mxu0  ;;  %v3119_v53 = vsel %vm1275_vm7, %v3115_v51, -inf }
0x1230   : > { %3120 = vmax.xlane.f32.xlu0 %v3119_v53  ;;  %v4177_v53 = vld [vmem:[%s6533_s11 + $0x98] sm:$0xff] }
0x1246   : > { %3130 = vrot.lane.b32.xlu0 %v6039_v24, %s6594_s26  ;;  %s4229_s26 = sshll.u32 %s5257_s3, 4  ;;  %s5125_s3 = smov [#allocation2]  }
0x1247   : > { %s5055_s24 = sshll.u32 %s5125_s3, 4  ;;  %s5056_s24 = int_to_ptr.vmem [resolvable:$false] %s5055_s24 }
0x1248   : > { %p5058_p0 = scmp.lt.s32.totalorder %s6482_s0, %s5056_s24 }
0x124a   : > { %3281 = vrot.lane.b32.xlu0 %v6028_v20, %s6595_s20 }
0x12bd   : > { %v3121_v54 = vpop.xlane.xlu0 %3120 }
0x12be   : > { %v3122_v55 = vsub.f32 %v3115_v51, %v3121_v54 }
0x12c0   : > { %v3123_v40 = vmul.f32 1.442695, %v3122_v55  ;;  %v4174_v55 = vld [vmem:[%s6533_s11 + $0x80] sm:$0xff] }
0x12c1   : > { %v3131_v56 = vpop.permute.xlu0 %3130 }
0x12c2   : > { %5031 = vpow2.f32 %v3123_v40  ;;  %4613 = vmatpush3.msk.msra.mxu0 %vm1291_vm6, %v3131_v56  ;;  %v4176_v40 = vld [vmem:[%s6533_s11 + $0x90] sm:$0xff] }
0x12c3   : > { %4624 = vmatprep.subr.mxu0 %v5115_v50  ;;  %v4843_v56 = vpack.c.bf16 %v4176_v40, %v4174_v55  ;;  %v4219_v55 = vld [vmem:[%s6535_s13 + $0x1d8] sm:$0xff] }
0x12c5   : > { %v3282_v1 = vpop.permute.xlu0 %3281 }
0x12cc   : > { %v5032_v57 = vpop.eup %5031 }
0x12cd   : > { %v3125_v58 = vsel %vm1275_vm7, %v5032_v57, 0.0 }
0x12ce   : > { %3126 = vadd.xlane.f32.xlu1 %v3125_v58  ;;  %v4181_v58 = vld [vmem:[%s6533_s11 + $0xb8] sm:$0xff] }
0x12df   : > { %3283 = vrot.lane.b32.xlu1 %v6028_v20, %s6596_s28 }
0x1303   : > { %2880 = vmax.xlane.f32.xlu1 %v2879_v59 }
0x135b   : > { %v3127_v61 = vpop.xlane.xlu1 %3126 }
0x135c   : > { %5033 = vrcp.f32 %v3127_v61  ;;  %v4178_v61 = vld [vmem:[%s6533_s11 + $0xa0] sm:$0xff] }
0x135f   : > { %v3284_v0 = vpop.permute.xlu1 %3283 }
0x1366   : > { %v5034_v62 = vpop.eup %5033 }
0x1367   : > { %v3129_v63 = vmul.f32 %v5034_v62, %v5032_v57  ;;  %v4179_v57 = vld [vmem:[%s6533_s11 + $0xa8] sm:$0xff]  ;;  %v4180_v62 = vld [vmem:[%s6533_s11 + $0xb0] sm:$0xff] }
0x1368   : > { %v4845_v59 = vpack.c.bf16 %v4181_v58, %v4179_v57  ;;  %v4203_v57 = vld [vmem:[%s6535_s13 + $0x158] sm:$0xff] }
0x1369   : > { %4615 = vmatmul.mubr.msk.f32.vlgmr.msra.gmra.mrb[22].mxu0 %vm1287_vm8, %v3129_v63  ;;  %v4847_v63 = vpack.c.bf16 %v4180_v62, %v4178_v61  ;;  %v4221_v61 = vld [vmem:[%s6535_s13 + $0x1e8] sm:$0xff] }
0x136a   : > { %4625 = vmatpush3.xpose.msk.msra.mxu0 %vm1200_vm5, %v3284_v0  ;;  %4626 = vmatprep.mubr.msk.f32.mxu0 %vm5116_vm2, %v5115_v50  ;;  %v4183_v0 = vld [vmem:[%s6533_s11 + $0xc8] sm:$0xff] }
0x136d   : > { %4627 = vmatmul.mubr.msk.f32.vlgmr.msra.gmra.mrb[24].mxu0 %vm1200_vm5, %v3282_v1  ;;  %v4185_v1 = vld [vmem:[%s6533_s11 + $0xd8] sm:$0xff] }
0x136e   : > { %3649 = vmatprep.mubr.f32.mxu0 %v5115_v50 }
0x1390   : > { %v2881_v2 = vpop.xlane.xlu1 %2880 }
0x1391   : > { %v2882_v3 = vsub.f32 %v2875_v48, %v2881_v2  ;;  %v4849_v2 = vpack.c.bf16 %v4185_v1, %v4183_v0  ;;  %v4205_v0 = vld [vmem:[%s6535_s13 + $0x168] sm:$0xff] }
0x1393   : > { %v2883_v4 = vmul.f32 1.442695, %v2882_v3  ;;  %v4182_v3 = vld [vmem:[%s6533_s11 + $0xc0] sm:$0xff] }
0x1395   : > { %5035 = vpow2.f32 %v2883_v4  ;;  %v4184_v4 = vld [vmem:[%s6533_s11 + $0xd0] sm:$0xff] }
0x139f   : > { %v5036_v5 = vpop.eup %5035 }
0x13a0   : > { %v2885_v6 = vsel %vm1275_vm7, %v5036_v5, 0.0 }
0x13a1   : > { %2886 = vadd.xlane.f32.xlu0 %v2885_v6  ;;  %v4187_v6 = vld [vmem:[%s6533_s11 + $0xe8] sm:$0xff] }
0x13b7   : > { %2890 = vrot.lane.b32.xlu0 %v6039_v24, %s6591_s4  ;;  %s5051_s4 = scalar_lea.vmem %s6482_s0, 16 }
0x13b8   : > { %p5052_p11 = scmp.ne.s32.totalorder %s6482_s0, %s5051_s4 }
0x13ba   : > { %p5053_p12 = pnand %p5052_p11, %p5274_p5 }
0x13bc   : > { %p5054_p13 = pneg %p5053_p12 }
0x142e   : > { %v2887_v7 = vpop.xlane.xlu0 %2886 }
0x142f   : > { %5037 = vrcp.f32 %v2887_v7  ;;  %v4189_v7 = vld [vmem:[%s6533_s11 + $0xf8] sm:$0xff] }
0x1432   : > { %v2891_v8 = vpop.permute.xlu0 %2890 }
0x1433   : > { %4596 = vmatpush3.msk.msra.mxu1 %vm1291_vm6, %v2891_v8  ;;  %v4853_v8 = vpack.c.bf16 %v4189_v7, %v4187_v6  ;;  %v4207_v6 = vld [vmem:[%s6535_s13 + $0x178] sm:$0xff] }
0x1434   : > { %4832 = vmatprep.subr.bf16.mxu1 %v5124_v60 }
0x1439   : > { %v5038_v9 = vpop.eup %5037 }
0x143a   : > { %v2889_v10 = vmul.f32 %v5038_v9, %v5036_v5  ;;  %v4851_v5 = vpack.c.bf16 %v4184_v4, %v4182_v3  ;;  %v4186_v9 = vld [vmem:[%s6533_s11 + $0xe0] sm:$0xff]  ;;  %v4223_v3 = vld [vmem:[%s6535_s13 + $0x1f8] sm:$0xff] }
0x143c   : > { %4598 = vmatmul.mubr.msk.f32.vlgmr.msra.gmra.mrb[22].mxu1 %vm1287_vm8, %v2889_v10  ;;  %v3203_v11 = vpop.f32.mrb[22].mxu0  ;;  %v4188_v10 = vld [vmem:[%s6533_s11 + $0xf0] sm:$0xff] }
0x143d   : > { %v4616_v12 = vpop.f32.mrb[23].mxu0  ;;  %4604 = vmatprep.mubr.msk.f32.mxu1 %vm5116_vm2, %v5115_v50  ;;  %4834 = vmatpush3.bf16.msra.mxu1 %v4833_v18  ;;  %v4211_v18 = vld [vmem:[%s6535_s13 + $0x198] sm:$0xff] }
0x143e   : > { %4835 = vmatprep.subr.bf16.mxu1 %v5124_v60  ;;  %v4208_v12 = vld [vmem:[%s6535_s13 + $0x180] sm:$0xff] }
0x1440   : > { %v3355_v13 = vpop.f32.mrb[24].mxu0 }
0x1441   : > { %v4628_v14 = vpop.f32.mrb[25].mxu0  ;;  %v3359_v15 = vsel %vm1275_vm7, %v3355_v13, -inf }
0x1442   : > { %3360 = vmax.xlane.f32.xlu1 %v3359_v15  ;;  %v4192_v14 = vld [vmem:[%s6535_s13 + $0x100] sm:$0xff] }
0x14cf   : > { %v3361_v20 = vpop.xlane.xlu1 %3360 }
0x14d0   : > { %v3362_v21 = vsub.f32 %v3355_v13, %v3361_v20  ;;  %v4209_v13 = vld [vmem:[%s6535_s13 + $0x188] sm:$0xff]  ;;  %v4859_v20 = vpack.c.bf16 %v4193_v16, %v4192_v14 }
0x14d1   : > { %v4857_v15 = vpack.c.bf16 %v4209_v13, %v4208_v12 }
0x14d2   : > { %v3363_v22 = vmul.f32 1.442695, %v3362_v21  ;;  %v4861_v21 = vpack.c.bf16 %v4211_v18, %v4210_v17 }
0x14d4   : > { %5039 = vpow2.f32 %v3363_v22  ;;  %v4194_v22 = vld [vmem:[%s6535_s13 + $0x110] sm:$0xff] }
0x14de   : > { %v5040_v23 = vpop.eup %5039 }
0x14df   : > { %v3365_v26 = vsel %vm1275_vm7, %v5040_v23, 0.0 }
0x14e0   : > { %3366 = vadd.xlane.f32.xlu1 %v3365_v26  ;;  %v4212_v26 = vld [vmem:[%s6535_s13 + $0x1a0] sm:$0xff] }
0x14f1   : > { %3370 = vrot.lane.b32.xlu1 %v6039_v24, %s6595_s20  ;;  %s6598_s20 = sld [smem:[#allocation19_spill]] }
0x14f7   : > { %s6480_s28 = scalar_lea.hbm %s6598_s20, %s4229_s26 }
0x150f   : > { %v2963_v31 = vpop.f32.mrb[22].mxu1 }
0x1510   : > { %v4599_v32 = vpop.f32.mrb[23].mxu1  ;;  %4605 = vmatmul.mubr.msk.f32.vlgmr.msra.gmra.mrb[20].mxu1 %vm1200_vm5, %v2963_v31  ;;  %v4196_v31 = vld [vmem:[%s6535_s13 + $0x120] sm:$0xff] }
0x1511   : > { %4837 = vmatpush3.bf16.msra.mxu1 %v4836_v30  ;;  %4621 = vmatprep.mubr.msk.f32.mxu1 %vm5116_vm2, %v5115_v50  ;;  %v4865_v30 = vpack.c.bf16 %v4213_v27, %v4212_v26  ;;  %v4197_v32 = vld [vmem:[%s6535_s13 + $0x128] sm:$0xff] }
0x1512   : > { %4629 = vmatprep.subr.mxu1 %v5115_v50 }
0x1518   : > { %4622 = vmatmul.mubr.msk.f32.vlgmr.msra.gmra.mrb[20].mxu1 %vm1200_vm5, %v3203_v11  ;;  %v4855_v11 = vpack.c.bf16 %v4188_v10, %v4186_v9 }
0x1519   : > { %4631 = vmatprep.mubr.msk.f32.mxu1 %vm5116_vm2, %v5115_v50 }
0x156d   : > { %v3367_v24 = vpop.xlane.xlu1 %3366 }
0x156e   : > { %5041 = vrcp.f32 %v3367_v24  ;;  %v4867_v24 = vpack.c.bf16 %v4197_v32, %v4196_v31 }
0x1571   : > { %v3371_v33 = vpop.permute.xlu1 %3370 }
0x1572   : > { %4630 = vmatpush3.msk.msra.mxu1 %vm1291_vm6, %v3371_v33 }
0x1573   : > { %4838 = vmatprep.subr.bf16.mxu1 %v5124_v60  ;;  %v4149_v60 = vld [vmem:[%s6530_s8 + $0x1] ss:$0 sm:$0xff] }
0x1574   : > { %v2562_v42 = vadd.f32 %v4149_v60, %v5960_v38  ;;  %v4175_v38 = vld [vmem:[%s6533_s11 + $0x88] sm:$0xff] }
0x1575   : > { %v4841_v54 = vpack.c.bf16 %v4177_v53, %v4175_v38  ;;  %v4201_v38 = vld [vmem:[%s6535_s13 + $0x148] sm:$0xff] }
0x1577   : > { %4842 = vmatprep.subr.bf16.mxu0 %v4841_v54  ;;  %v4218_v54 = vld [vmem:[%s6535_s13 + $0x1d0] sm:$0xff] }
0x1578   : > { %v5042_v35 = vpop.eup %5041  ;;  %4844 = vmatpush1.bf16.msra.mxu0 %v4843_v56  ;;  %v4877_v40 = vpack.c.bf16 %v4219_v55, %v4218_v54  ;;  %v4202_v56 = vld [vmem:[%s6535_s13 + $0x150] sm:$0xff]  ;;  %v3815_v54 = vld [vmem:[%s6539_s17 + $0x40] sm:$0xff] }
0x1579   : > { %v3369_v37 = vmul.f32 %v5042_v35, %v5040_v23  ;;  %4846 = vmatprep.subr.bf16.mxu0 %v4845_v59  ;;  %v4195_v23 = vld [vmem:[%s6535_s13 + $0x118] sm:$0xff]  ;;  %v4879_v58 = vpack.c.bf16 %v4203_v57, %v4202_v56  ;;  %v4220_v59 = vld [vmem:[%s6535_s13 + $0x1e0] sm:$0xff]  ;;  %v3817_v55 = vld [vmem:[%s6539_s17 + $0x50] sm:$0xff] }
0x157a   : > { %v4863_v29 = vpack.c.bf16 %v4195_v23, %v4194_v22  ;;  %v4881_v62 = vpack.c.bf16 %v4221_v61, %v4220_v59  ;;  %v3820_v56 = vld [vmem:[%s6539_s17 + $0x68] sm:$0xff]  ;;  %v3822_v57 = vld [vmem:[%s6539_s17 + $0x78] sm:$0xff]  ;;  %v3819_v59 = vld [vmem:[%s6539_s17 + $0x60] sm:$0xff] }
0x157b   : > { %4632 = vmatmul.mubr.msk.f32.vlgmr.msra.gmra.mrb[24].mxu1 %vm1287_vm8, %v3369_v37  ;;  %v3821_v61 = vld [vmem:[%s6539_s17 + $0x70] sm:$0xff] }
0x157c   : > { %4840 = vmatpush3.bf16.msra.mxu1 %v4839_v36  ;;  %4638 = vmatprep.mubr.msk.f32.mxu1 %vm5116_vm2, %v5115_v50  ;;  %v4172_v36 = vld [vmem:[%s6531_s9 + $0x1] ss:$0 sm:$0xff] }
0x157d   : > { %4848 = vmatpush1.bf16.msra.mxu0 %v4847_v63  ;;  %4858 = vmatprep.subr.bf16.mxu1 %v4857_v15  ;;  %v4204_v63 = vld [vmem:[%s6535_s13 + $0x160] sm:$0xff] }
0x157e   : > { %4850 = vmatprep.subr.bf16.mxu0 %v4849_v2  ;;  %v4883_v1 = vpack.c.bf16 %v4205_v0, %v4204_v63  ;;  %v4222_v2 = vld [vmem:[%s6535_s13 + $0x1f0] sm:$0xff]  ;;  %v3927_v63 = vld [vmem:[%s6541_s19 + $0x80] sm:$0xff]  ;;  %v3928_v0 = vld [vmem:[%s6541_s19 + $0x88] sm:$0xff] }
0x157f   : > { %v4885_v4 = vpack.c.bf16 %v4223_v3, %v4222_v2 }
0x1581   : > { %4852 = vmatpush1.bf16.msra.mxu0 %v4851_v5  ;;  %v4206_v5 = vld [vmem:[%s6535_s13 + $0x170] sm:$0xff] }
0x1582   : > { %4854 = vmatprep.subr.bf16.mxu0 %v4853_v8  ;;  %v4887_v7 = vpack.c.bf16 %v4207_v6, %v4206_v5  ;;  %v4190_v8 = vld [vmem:[%s6534_s12 + $0x2] sm:$0x3]  ;;  %v4226_v6 = vld [vmem:[%s6537_s15] ss:$0 sm:$0xff] }
0x1583   : > { %v3575_v9 = vrot.slane %v4190_v8, %v5668_v19  ;;  %v3579_v10 = vrot.slane %v4190_v8, %v5686_v25  ;;  %v3911_v8 = vld [vmem:[%s6541_s19] sm:$0xff] }
0x1585   : > { %4856 = vmatpush1.bf16.msra.mxu0 %v4855_v11 }
0x164e   : > { %v3443_v39 = vpop.f32.mrb[24].mxu1 }
0x164f   : > { %v4633_v41 = vpop.f32.mrb[25].mxu1  ;;  %4639 = vmatmul.mubr.msk.f32.vlgmr.msra.gmra.mrb[20].mxu1 %vm1200_vm5, %v3443_v39  ;;  %v4173_v39 = vld [vmem:[%s6532_s10 + $0x1] ss:$0 sm:$0xff] }
0x1650   : > { %4860 = vmatpush3.bf16.msra.mxu1 %v4859_v20 }
0x1651   : > { %4862 = vmatprep.subr.bf16.mxu1 %v4861_v21 }
0x1654   : > { %4864 = vmatpush3.bf16.msra.mxu1 %v4863_v29 }
0x1655   : > { %4866 = vmatprep.subr.bf16.mxu1 %v4865_v30  ;;  %v4225_v30 = vld [vmem:[%s6536_s14 + $0x1] ss:$0 sm:$0xff] }
0x1658   : > { %4868 = vmatpush3.bf16.msra.mxu1 %v4867_v24 }
0x1722   : > { %v3516_v43 = vpop.f32.mrb[20].mxu1 }
0x1723   : > { %v6142_v44 = vadd.f32 %v3516_v43, %v2562_v42  ;;  %v4640_v45 = vpop.f32.mrb[21].mxu1  ;;  %v4214_v42 = vld [vmem:[%s6535_s13 + $0x1b0] sm:$0xff]  ;;  %v4215_v43 = vld [vmem:[%s6535_s13 + $0x1b8] sm:$0xff] }
0x1724   : > { %v4869_v45 = vpack.c.bf16 %v4215_v43, %v4214_v42  ;;  %v3809_v43 = vld [vmem:[%s6539_s17 + $0x10] sm:$0xff] }
0x1725   : > { %v3525_v46 = vsel %vm1049_vm3, %v6142_v44, 0.0 }
0x1726   : > { %3526 = vadd.xlane.f32.xlu0 %v3525_v46  ;;  %v4198_v46 = vld [vmem:[%s6535_s13 + $0x130] sm:$0xff]  ;;  %4870 = vmatprep.subr.bf16.mxu1 %v4869_v45 }
0x17b3   : > { %v3527_v47 = vpop.xlane.xlu0 %3526 }
0x17b4   : > { %v3528_v48 = vmul.f32 0.015625, %v3527_v47  ;;  %v4199_v47 = vld [vmem:[%s6535_s13 + $0x138] sm:$0xff] }
0x17b6   : > { %v6147_v49 = vsub.f32 %v6142_v44, %v3528_v48  ;;  %v4871_v48 = vpack.c.bf16 %v4199_v47, %v4198_v46  ;;  %v3812_v46 = vld [vmem:[%s6539_s17 + $0x28] sm:$0xff]  ;;  %v3814_v47 = vld [vmem:[%s6539_s17 + $0x38] sm:$0xff] }
0x17b8   : > { %v3530_v51 = vmul.f32 %v6147_v49, %v6147_v49  ;;  %4872 = vmatpush3.bf16.msra.mxu1 %v4871_v48  ;;  %v4893_v48 = vpack.c.bf16 %v3814_v47, %v3812_v46  ;;  %v3939_v46 = vld [vmem:[%s6541_s19 + $0xe0] sm:$0xff]  ;;  %v3940_v47 = vld [vmem:[%s6541_s19 + $0xe8] sm:$0xff] }
0x17ba   : > { %v3531_v52 = vsel %vm1049_vm3, %v3530_v51, 0.0 }
0x17bb   : > { %3532 = vadd.xlane.f32.xlu1 %v3531_v52  ;;  %v4200_v52 = vld [vmem:[%s6535_s13 + $0x140] sm:$0xff] }
0x17bc   : > { %v4875_v53 = vpack.c.bf16 %v4201_v38, %v4200_v52  ;;  %v3816_v52 = vld [vmem:[%s6539_s17 + $0x48] sm:$0xff]  ;;  %v3818_v38 = vld [vmem:[%s6539_s17 + $0x58] sm:$0xff] }
0x1848   : > { %v3533_v33 = vpop.xlane.xlu1 %3532 }
0x1849   : > { %v3534_v34 = vmul.f32 0.015625, %v3533_v33 }
0x184b   : > { %v3535_v28 = vadd.f32 1e-06, %v3534_v34 }
0x184d   : > { %5043 = vrsqrt.f32 %v3535_v28 }
0x1857   : > { %v5044_v35 = vpop.eup %5043 }
0x1858   : > { %v3537_v37 = vmul.f32 %v5044_v35, %v6147_v49  ;;  %v4217_v49 = vld [vmem:[%s6535_s13 + $0x1c8] sm:$0xff] }
0x185a   : > { %v3544_v41 = vmul.f32 %v4172_v36, %v3537_v37 }
0x185c   : > { %v3551_v60 = vadd.f32 %v4173_v39, %v3544_v41  ;;  %v3808_v41 = vld [vmem:[%s6539_s17 + $0x8] sm:$0xff] }
0x185e   : > { %4191 = vmatmul.mubr.msk.f32.vlgmr.msra.gmra.mrb[26].mxu0 %vm1106_vm4, %v3551_v60  ;;  %v3810_v60 = vld [vmem:[%s6539_s17 + $0x18] sm:$0xff] }
0x185f   : > { %3902 = vmatprep.mubr.f32.mxu0 %v5115_v50  ;;  %v4216_v50 = vld [vmem:[%s6535_s13 + $0x1c0] sm:$0xff]  ;;  %v4889_v42 = vpack.c.bf16 %v3810_v60, %v3808_v41  ;;  %v3937_v41 = vld [vmem:[%s6541_s19 + $0xd0] sm:$0xff]  ;;  %v3938_v60 = vld [vmem:[%s6541_s19 + $0xd8] sm:$0xff] }
0x1860   : > { %v4873_v51 = vpack.c.bf16 %v4217_v49, %v4216_v50  ;;  %v3811_v50 = vld [vmem:[%s6539_s17 + $0x20] sm:$0xff]  ;;  %v3813_v49 = vld [vmem:[%s6539_s17 + $0x30] sm:$0xff] }
0x1861   : > { %4890 = vmatprep.subr.bf16.mxu0 %v4889_v42 }
0x1862   : > { %4874 = vmatprep.subr.bf16.mxu1 %v4873_v51  ;;  %v4895_v51 = vpack.c.bf16 %v3813_v49, %v3811_v50  ;;  %v4929_v50 = vpack.c.bf16 %v3940_v47, %v3939_v46  ;;  %v3923_v49 = vld [vmem:[%s6541_s19 + $0x60] sm:$0xff] }
0x1863   : > { %4876 = vmatpush3.bf16.msra.mxu1 %v4875_v53  ;;  %v4897_v53 = vpack.c.bf16 %v3818_v38, %v3816_v52  ;;  %v3941_v38 = vld [vmem:[%s6541_s19 + $0xf0] sm:$0xff] }
0x1864   : > { %4878 = vmatprep.subr.bf16.mxu1 %v4877_v40  ;;  %v4899_v40 = vpack.c.bf16 %v3817_v55, %v3815_v54  ;;  %v3925_v55 = vld [vmem:[%s6541_s19 + $0x70] sm:$0xff] }
0x1867   : > { %4880 = vmatpush3.bf16.msra.mxu1 %v4879_v58  ;;  %v4901_v58 = vpack.c.bf16 %v3822_v57, %v3820_v56  ;;  %v3823_v57 = vld [vmem:[%s6540_s18] sm:$0x3] }
0x1868   : > { %4882 = vmatprep.subr.bf16.mxu1 %v4881_v62  ;;  %v4903_v62 = vpack.c.bf16 %v3821_v61, %v3819_v59  ;;  %v3832_v59 = vrot.slane %v3823_v57, %v5686_v25 }
0x186b   : > { %4884 = vmatpush3.bf16.msra.mxu1 %v4883_v1  ;;  %v4905_v1 = vpack.c.bf16 %v3928_v0, %v3927_v63 }
0x186c   : > { %4886 = vmatprep.subr.bf16.mxu1 %v4885_v4 }
0x186f   : > { %4888 = vmatpush3.bf16.msra.mxu1 %v4887_v7 }
0x1931   : > { %v3651_v11 = vpop.f32.mrb[26].mxu0 }
0x1932   : > { %v3652_v12 = vadd.f32 %v3651_v11, %v3575_v9  ;;  %v3653_v13 = vpop.f32.mrb[27].mxu0  ;;  %v3912_v9 = vld [vmem:[%s6541_s19 + $0x8] sm:$0xff]  ;;  %v3929_v11 = vld [vmem:[%s6541_s19 + $0x90] sm:$0xff] }
0x1933   : > { %v3654_v14 = vadd.f32 %v3653_v13, %v3579_v10  ;;  %v4227_v10 = vld [vmem:[%s6538_s16] ss:$0 sm:$0xff] }
0x1934   : > { %v3658_v15 = vmul.f32 0.70710677, %v3652_v12  ;;  %v3656_v23 = vmul.f32 0.5, %v3652_v12  ;;  %v3930_v12 = vld [vmem:[%s6541_s19 + $0x98] sm:$0xff] }
0x1935   : > { %v3659_v16 = vmul.f32 0.70710677, %v3654_v14  ;;  %v3657_v21 = vmul.f32 0.5, %v3654_v14  ;;  %v4907_v14 = vpack.c.bf16 %v3912_v9, %v3911_v8 }
0x1936   : > { %5045 = verf.f32 %v3658_v15 }
0x1937   : > { %5047 = verf.f32 %v3659_v16  ;;  %v4909_v16 = vpack.c.bf16 %v3930_v12, %v3929_v11 }
0x1940   : > { %v5046_v17 = vpop.eup %5045 }
0x1941   : > { %v5048_v18 = vpop.eup %5047  ;;  %v3662_v20 = vadd.f32 1.0, %v5046_v17  ;;  %v3913_v17 = vld [vmem:[%s6541_s19 + $0x10] sm:$0xff] }
0x1942   : > { %v3663_v22 = vadd.f32 1.0, %v5048_v18  ;;  %v3914_v18 = vld [vmem:[%s6541_s19 + $0x18] sm:$0xff] }
0x1943   : > { %v3664_v27 = vmul.f32 %v3662_v20, %v3656_v23  ;;  %v3931_v20 = vld [vmem:[%s6541_s19 + $0xa0] sm:$0xff] }
0x1944   : > { %v3665_v26 = vmul.f32 %v3663_v22, %v3657_v21  ;;  %v3932_v21 = vld [vmem:[%s6541_s19 + $0xa8] sm:$0xff]  ;;  %v4911_v22 = vpack.c.bf16 %v3914_v18, %v3913_v17 }
0x1945   : > { %v4913_v23 = vpack.c.bf16 %v3932_v21, %v3931_v20 }
0x1946   : > { %3771 = vmatprep.mubr.f32.mxu1 %v3665_v26  ;;  %v3915_v26 = vld [vmem:[%s6541_s19 + $0x20] sm:$0xff] }
0x1947   : > { %3772 = vmatmul.mubr.f32.vlgmr.msra.gmra.mrb[26].mxu1 %v3664_v27  ;;  %v3916_v27 = vld [vmem:[%s6541_s19 + $0x28] sm:$0xff] }
0x1a1a   : > { %v4462_v29 = vpop.f32.mrb[26].mxu1 }
0x1a1b   : > { %v4463_v31 = vpop.f32.mrb[27].mxu1 }
0x1a1c   : > { %v4464_v32 = vadd.f32 %v4463_v31, %v4462_v29  ;;  %v3933_v29 = vld [vmem:[%s6541_s19 + $0xb0] sm:$0xff]  ;;  %v4915_v31 = vpack.c.bf16 %v3916_v27, %v3915_v26 }
0x1a1e   : > { %v3774_v24 = vadd.f32 %v4464_v32, %v4225_v30  ;;  %v3934_v30 = vld [vmem:[%s6541_s19 + $0xb8] sm:$0xff] }
0x1a1f   : > { %v4917_v32 = vpack.c.bf16 %v3934_v30, %v3933_v29 }
0x1a20   : > { %v3777_v33 = vadd.f32 %v6142_v44, %v3774_v24  ;;  %v3807_v44 = vld [vmem:[%s6539_s17] sm:$0xff]  ;;  %v3917_v24 = vld [vmem:[%s6541_s19 + $0x30] sm:$0xff] }
0x1a21   : > { %v4891_v45 = vpack.c.bf16 %v3809_v43, %v3807_v44  ;;  %v4925_v44 = vpack.c.bf16 %v3938_v60, %v3937_v41  ;;  %v3921_v43 = vld [vmem:[%s6541_s19 + $0x50] sm:$0xff] }
0x1a22   : > { %v3780_v34 = vsel %vm1049_vm3, %v3777_v33, 0.0 }
0x1a23   : > { %3781 = vadd.xlane.f32.xlu0 %v3780_v34  ;;  %4892 = vmatpush1.bf16.msra.mxu0 %v4891_v45  ;;  %v3935_v34 = vld [vmem:[%s6541_s19 + $0xc0] sm:$0xff]  ;;  %v3922_v45 = vld [vmem:[%s6541_s19 + $0x58] sm:$0xff] }
0x1a24   : > { %4894 = vmatprep.subr.bf16.mxu0 %v4893_v48  ;;  %v4927_v48 = vpack.c.bf16 %v3922_v45, %v3921_v43 }
0x1a27   : > { %4896 = vmatpush1.bf16.msra.mxu0 %v4895_v51  ;;  %v3924_v51 = vld [vmem:[%s6541_s19 + $0x68] sm:$0xff] }
0x1a28   : > { %4898 = vmatprep.subr.bf16.mxu0 %v4897_v53  ;;  %v4931_v52 = vpack.c.bf16 %v3924_v51, %v3923_v49  ;;  %v3942_v53 = vld [vmem:[%s6541_s19 + $0xf8] sm:$0xff] }
0x1a29   : > { %v4933_v54 = vpack.c.bf16 %v3942_v53, %v3941_v38 }
0x1a2b   : > { %4900 = vmatpush1.bf16.msra.mxu0 %v4899_v40  ;;  %v3926_v40 = vld [vmem:[%s6541_s19 + $0x78] sm:$0xff] }
0x1a2c   : > { %4902 = vmatprep.subr.bf16.mxu0 %v4901_v58  ;;  %v4935_v56 = vpack.c.bf16 %v3926_v40, %v3925_v55  ;;  %v3828_v58 = vrot.slane %v3823_v57, %v5668_v19 }
0x1a2f   : > { %4904 = vmatpush1.bf16.msra.mxu0 %v4903_v62 }
0x1a30   : > { %4906 = vmatprep.subr.bf16.mxu0 %v4905_v1 }
0x1ab0   : > { %v3782_v28 = vpop.xlane.xlu0 %3781 }
0x1ab1   : > { %v3783_v35 = vmul.f32 0.015625, %v3782_v28  ;;  %v3936_v28 = vld [vmem:[%s6541_s19 + $0xc8] sm:$0xff] }
0x1ab3   : > { %v3784_v36 = vsub.f32 %v3777_v33, %v3783_v35  ;;  %v3918_v33 = vld [vmem:[%s6541_s19 + $0x38] sm:$0xff] }
0x1ab4   : > { %v4919_v35 = vpack.c.bf16 %v3918_v33, %v3917_v24 }
0x1ab5   : > { %v3785_v37 = vmul.f32 %v3784_v36, %v3784_v36 }
0x1ab7   : > { %v3786_v39 = vsel %vm1049_vm3, %v3785_v37, 0.0  ;;  %v3919_v37 = vld [vmem:[%s6541_s19 + $0x40] sm:$0xff] }
0x1ab8   : > { %3787 = vadd.xlane.f32.xlu0 %v3786_v39  ;;  %v3920_v39 = vld [vmem:[%s6541_s19 + $0x48] sm:$0xff] }
0x1ab9   : > { %v4923_v42 = vpack.c.bf16 %v3920_v39, %v3919_v37 }
0x1b45   : > { %v3788_v2 = vpop.xlane.xlu0 %3787 }
0x1b46   : > { %v3789_v3 = vmul.f32 0.015625, %v3788_v2 }
0x1b48   : > { %v3790_v4 = vadd.f32 1e-06, %v3789_v3 }
0x1b4a   : > { %5049 = vrsqrt.f32 %v3790_v4  ;;  %v3943_v4 = vld [vmem:[%s6597_s2] sm:$0x1]  ;;  %s5057_s2 = scalar_lea.vmem %s5056_s24, 32 }
0x1b4b   : > { %p5059_p1 = scmp.lt.s32.totalorder %s5057_s2, %s5051_s4 }
0x1b4d   : > { %p5060_p2 = por %p5059_p1, %p5058_p0 }
0x1b4f   : > { %p5061_p3 = pnand %p5060_p2, %p5054_p13 }
0x1b54   : > { %v5050_v5 = vpop.eup %5049 }
0x1b55   : > { %v3792_v7 = vmul.f32 %v5050_v5, %v3784_v36  ;;  %v4921_v36 = vpack.c.bf16 %v3936_v28, %v3935_v34 }
0x1b57   : > { %v3799_v13 = vmul.f32 %v4226_v6, %v3792_v7 }
0x1b59   : > { %v3806_v15 = vadd.f32 %v4227_v10, %v3799_v13 }
0x1b5b   : > { %4228 = vmatmul.mubr.msk.f32.vlgmr.msra.gmra.mrb[28].mxu0 %vm1106_vm4, %v3806_v15 }
0x1b5c   : > { %4908 = vmatpush3.bf16.msra.mxu0 %v4907_v14 }
0x1b5d   : > { %4910 = vmatprep.subr.bf16.mxu0 %v4909_v16 }
0x1b60   : > { %4912 = vmatpush3.bf16.msra.mxu0 %v4911_v22 }
0x1b61   : > { %4914 = vmatprep.subr.bf16.mxu0 %v4913_v23 }
0x1b64   : > { %4916 = vmatpush3.bf16.msra.mxu0 %v4915_v31 }
0x1b65   : > { %4918 = vmatprep.subr.bf16.mxu0 %v4917_v32 }
0x1b68   : > { %4920 = vmatpush3.bf16.msra.mxu0 %v4919_v35 }
0x1b69   : > { %4922 = vmatprep.subr.bf16.mxu0 %v4921_v36 }
0x1b6c   : > { %4924 = vmatpush3.bf16.msra.mxu0 %v4923_v42 }
0x1b6d   : > { %4926 = vmatprep.subr.bf16.mxu0 %v4925_v44 }
0x1b70   : > { %4928 = vmatpush3.bf16.msra.mxu0 %v4927_v48 }
0x1b71   : > { %4930 = vmatprep.subr.bf16.mxu0 %v4929_v50 }
0x1b74   : > { %4932 = vmatpush3.bf16.msra.mxu0 %v4931_v52 }
0x1b75   : > { %4934 = vmatprep.subr.bf16.mxu0 %v4933_v54 }
0x1b78   : > { %4936 = vmatpush3.bf16.msra.mxu0 %v4935_v56 }
0x1c2e   : > { %v3904_v61 = vpop.f32.mrb[28].mxu0 }
0x1c2f   : > { %v3905_v62 = vadd.f32 %v3904_v61, %v3828_v58  ;;  %v3906_v63 = vpop.f32.mrb[29].mxu0 }
0x1c30   : > { %v3907_v0 = vadd.f32 %v3906_v63, %v3832_v59 }
0x1c31   : > { %v3909_v2 = vmax.f32 %v3905_v62, 0.0 }
0x1c32   : > { %v3910_v1 = vmax.f32 %v3907_v0, 0.0 }
0x1c34   : > { %4008 = vmatprep.mubr.f32.mxu0 %v3910_v1 }
0x1c35   : > { %4009 = vmatmul.mubr.f32.vlgmr.msra.gmra.mrb[30].mxu0 %v3909_v2 }
0x1d08   : > { %v4497_v3 = vpop.f32.mrb[30].mxu0 }
0x1d09   : > { %v4498_v5 = vpop.f32.mrb[31].mxu0 }
0x1d0a   : > { %v4499_v19 = vadd.f32 %v4498_v5, %v4497_v3 }
0x1d0c   : > { %v4011_v25 = vadd.f32 %v4499_v19, %v3943_v4 }
0x1d0e   : > { %4014 = vst [vmem:[%s648_s21] sm:$0x1] %v4011_v25 }
0x1d0f   : > { %5064 = shalt.err (!%p5061_p3)
}
0x1d10   : > { %s5065_s1 = scalar_lea.hbm %s6480_s28, 16  ;;  %s5069_s23 = scalar_lea.hbm %s6598_s20, 32 }
0x1d11   : > { %p5066_p4 = scmp.ne.s32.totalorder %s6480_s28, %s5065_s1  ;;  %p5070_p9 = scmp.lt.u32.totalorder %s6480_s28, %s6598_s20 }
0x1d12   : > { %p5071_p10 = scmp.lt.u32.totalorder %s5069_s23, %s5065_s1  ;;  %p5073_p12 = scmp.lt.u32.totalorder %s5065_s1, %s6480_s28 }
0x1d13   : > { %p5067_p7 = pnand %p5066_p4, %p5274_p5 }
0x1d14   : > { %p5072_p11 = por %p5071_p10, %p5070_p9 }
0x1d15   : > { %p5068_p8 = pneg %p5067_p7 }
0x1d16   : > { %p5074_p13 = por %p5073_p12, %p5072_p11 }
0x1d18   : > { %p5075_p0 = pnand %p5074_p13, %p5068_p8 }
0x1d1a   : > { %5078 = shalt.err (!%p5075_p0)
}
0x1d1b   : > { %4952 = dma.vmem_to_hbm [thread:$0]  (%p5274_p5), %s6482_s0, 16, %s6480_s28, %s4016_s6  }
0x1d1c PF: > { %s6599_s4 = sld [smem:[#allocation7_spill]]  ;;  %s6600_s24 = sld [smem:[#allocation5_spill]] }
0x1d22   : > { %p4958_p1 = scmp.ge.s32.totalorder %s6599_s4, 2  ;;  %s4040_s26 = sand.u32 1, %s6600_s24  }
0x1d23   : > { %s4041_s21 = scalar_lea.sflag [#allocation3], %s4040_s26 }
0x1d24   : > { %p4955_p2 = pnand %p4958_p1, %p5278_p6 }
0x1d26   : > { %5096 = dma.done.wait (!%p4955_p2), %s4041_s21, 16  }
0x1d27   : > { %5098 = vsyncadd (!%p4955_p2), %s4041_s21, 4294967280  ;;  %s6602_s27 = sld [smem:[#allocation8_spill]]  ;;  %s6603_s1 = sld [smem:[#allocation6_spill]] }
0x1d28   : > { %s6604_s26 = sld [smem:[#allocation9_spill]]  ;;  %s6605_s2 = smov %s5105_s25 }
0x1d2d   : > { %p31_p3 = scmp.ge.s32.totalorder %s6602_s27, 4   ;;  %s6606_s25 = smov %s6603_s1 }
0x1d2f   :  { %33 = sbr.rel (!%p31_p3) target bundleno = 13 (0xd), region = 151 }
0x1d36   :  { %4045 = vsyncpa [#allocation3], 1 }
0x1d37   :  { %4047 = vsyncpa [#allocation3 + $0x1], 1 }

</bundles_post_ra>
